<compile_context>
chip_gen: v7x
topology: tpu7x:2x2x1
jax: 0.10.0
libtpu: 0.0.40
codegen_flags: <defaults>
</compile_context>

<pallas_src>
import jax
import jax.numpy as jnp
from jax import lax
from jax.experimental import pallas as pl
from jax.experimental.pallas import tpu as pltpu

EPS = 1e-5                    # nn.BatchNorm1d default eps
EMBED_DIM = 384               # T2t_vit_t_14 embed_dim
PATCH = 16                    # 1/16 tokenization of the backbone stub
IMG_SIZE = 32                 # small synthetic image size
CHANNELS = 3
MATMUL_DTYPE = jnp.bfloat16   # MXU operand dtype (f32 accumulation)


# ----------------------------------------------------------------------------
# Fused Pallas kernel: (folded backbone-stub + projector) -> predictor.
# Single invocation, both contrastive views stacked along the batch (2B rows);
# BN statistics are computed per view with row masks.
# ----------------------------------------------------------------------------
def fused_heads_kernel(x_ref, wf_ref, w2_ref, qw1_ref, qw2_ref,
                       vd_ref, vw_ref, z_ref, p_ref):
    x = x_ref[...]                         # (2B, p_dim) f32 pooled patch vectors
    vd = vd_ref[...]                       # (6, d)  f32: b_fold,g1,b1,g2,b2,qb2
    vw = vw_ref[...]                       # (3, 2d) f32: qb1,qg,qbe

    rows = x.shape[0]
    half = rows // 2                       # rows per view (view1 = rows [0, half))

    def mm(a, w_ref):
        # activations cast to bf16, weights already bf16 in VMEM, f32 accumulation
        return jnp.dot(a.astype(MATMUL_DTYPE), w_ref[...],
                       preferred_element_type=jnp.float32)

    def bn(h, g, be):
        # Per-view train-mode BatchNorm1d (biased variance, exact two-pass, f32).
        # Row masks keep the data as one lane-dense (2B, d) block -- no
        # reshape / slice / concat layout shuffles inside the kernel.
        row_id = lax.broadcasted_iota(jnp.int32, h.shape, 0)
        m1 = (row_id < half).astype(jnp.float32)
        m2 = 1.0 - m1
        inv_b = 1.0 / half
        mu = (m1 * (jnp.sum(h * m1, axis=0, keepdims=True) * inv_b)
              + m2 * (jnp.sum(h * m2, axis=0, keepdims=True) * inv_b))
        diff = h - mu
        d2 = diff * diff
        var = (m1 * (jnp.sum(d2 * m1, axis=0, keepdims=True) * inv_b)
               + m2 * (jnp.sum(d2 * m2, axis=0, keepdims=True) * inv_b))
        return diff * lax.rsqrt(var + EPS) * g + be

    # projector (patch-embed folded into Linear1): Linear -> BN -> ReLU -> Linear -> BN
    h = mm(x, wf_ref) + vd[0:1]            # folded patch bias (cancelled by BN; kept for parity)
    h = jnp.maximum(bn(h, vd[1:2], vd[2:3]), 0.0)
    z = bn(mm(h, w2_ref), vd[3:4], vd[4:5])

    # predictor: Linear -> BN -> ReLU -> Linear
    h2 = mm(z, qw1_ref) + vw[0:1]          # bias also cancelled by the following BN
    h2 = jnp.maximum(bn(h2, vw[1:2], vw[2:3]), 0.0)
    p = mm(h2, qw2_ref) + vd[5:6]

    z_ref[...] = z.astype(z_ref.dtype)
    p_ref[...] = p.astype(p_ref.dtype)


# ----------------------------------------------------------------------------
# pallas_call wrapper — single step, whole arrays resident in VMEM.
# ----------------------------------------------------------------------------
def fused_contrastive_heads(pooled, prm):
    """pooled: (2*B, p_dim) pooled patch vectors (view1 rows first, then view2).
    Returns z, p each of shape (2*B, EMBED_DIM)."""
    rows, _ = pooled.shape
    d = EMBED_DIM
    z, p = pl.pallas_call(
        fused_heads_kernel,
        out_shape=(jax.ShapeDtypeStruct((rows, d), jnp.float32),
                   jax.ShapeDtypeStruct((rows, d), jnp.float32)),
        compiler_params=pltpu.CompilerParams(vmem_limit_bytes=32 << 20),
    )(pooled, prm["w_fold"], prm["proj_w2"], prm["pred_w1"], prm["pred_w2"],
      prm["vec_d"], prm["vec_2d"])
    return z, p


# ----------------------------------------------------------------------------
# Parameters.  Raw params mirror the PyTorch module (Linear weights stored
# pre-transposed as (in, out)); prepare_params() folds the linear backbone
# stub into the projector's first Linear, packs the small vectors, and casts
# the matmul weights to bf16 once (they then live in HBM as bf16).
# ----------------------------------------------------------------------------
def init_raw_params(key):
    d = EMBED_DIM
    p_dim = CHANNELS * PATCH * PATCH
    ks = jax.random.split(key, 8)
    scale = 0.02
    return {
        # backbone-stub patch embedding
        "patch_w": scale * jax.random.normal(ks[0], (p_dim, d), jnp.float32),
        "patch_b": jnp.zeros((1, d), jnp.float32),
        # projector: Linear(d,d,bias=False) BN ReLU Linear(d,d,bias=False) BN
        "proj_w1": scale * jax.random.normal(ks[1], (d, d), jnp.float32),
        "proj_g1": jnp.ones((1, d), jnp.float32),
        "proj_b1": jnp.zeros((1, d), jnp.float32),
        "proj_w2": scale * jax.random.normal(ks[2], (d, d), jnp.float32),
        "proj_g2": jnp.ones((1, d), jnp.float32),
        "proj_b2": jnp.zeros((1, d), jnp.float32),
        # predictor: Linear(d,2d) BN ReLU Linear(2d,d)
        "pred_w1": scale * jax.random.normal(ks[3], (d, 2 * d), jnp.float32),
        "pred_b1": jnp.zeros((1, 2 * d), jnp.float32),
        "pred_g": jnp.ones((1, 2 * d), jnp.float32),
        "pred_be": jnp.zeros((1, 2 * d), jnp.float32),
        "pred_w2": scale * jax.random.normal(ks[4], (2 * d, d), jnp.float32),
        "pred_b2": jnp.zeros((1, d), jnp.float32),
    }


def prepare_params(raw):
    # Exact fold: patch embed (linear + bias) feeds a bias-free Linear, so
    #   (x @ Wp + bp) @ W1 == x @ (Wp @ W1) + bp @ W1
    w_fold = raw["patch_w"] @ raw["proj_w1"]          # (p_dim, d)
    b_fold = raw["patch_b"] @ raw["proj_w1"]          # (1, d)
    vec_d = jnp.concatenate(
        [b_fold, raw["proj_g1"], raw["proj_b1"],
         raw["proj_g2"], raw["proj_b2"], raw["pred_b2"]], axis=0)        # (6, d)
    vec_2d = jnp.concatenate(
        [raw["pred_b1"], raw["pred_g"], raw["pred_be"]], axis=0)         # (3, 2d)
    cast = lambda w: w.astype(MATMUL_DTYPE)
    return {
        "w_fold": cast(w_fold),
        "proj_w2": cast(raw["proj_w2"]),
        "pred_w1": cast(raw["pred_w1"]),
        "pred_w2": cast(raw["pred_w2"]),
        "vec_d": vec_d.astype(jnp.float32),
        "vec_2d": vec_2d.astype(jnp.float32),
    }


# ----------------------------------------------------------------------------
# Forward pass (mirrors ConrastDepthImageNet.forward), fully under jax.jit.
# ----------------------------------------------------------------------------
@jax.jit
def contrast_depth_imagenet_forward(params, image1, image2, image3):
    del image3
    # TODO(synk): T2t_vit_t_14 backbone, Transformer, token_Transformer and
    # Decoder (the saliency `outputs` branch on image3) are external modules
    # whose code is not provided; that branch is not reproduced here.

    bs = image1.shape[0]
    nh, nw = IMG_SIZE // PATCH, IMG_SIZE // PATCH

    # Pooled 1/16 patch vector of each view, both views stacked along batch
    # (rows [0,bs) = view1, [bs,2bs) = view2).  Mean-pool commutes with the
    # (linear) patch-embed stub, so pool first: cheap reshape + mean.
    views = jnp.concatenate([image1, image2], axis=0)                 # (2B,C,H,W)
    pooled = views.reshape(2 * bs, CHANNELS, nh, PATCH, nw, PATCH).mean(axis=(2, 4))
    pooled = pooled.reshape(2 * bs, CHANNELS * PATCH * PATCH)         # (2B, p_dim)

    # fused (folded backbone stub + projector) + predictor, both views at once
    z, p = fused_contrastive_heads(pooled, params)
    z1, z2 = z[:bs], z[bs:]
    p1, p2 = p[:bs], p[bs:]

    # z.detach() -> stop_gradient
    return p1, p2, lax.stop_gradient(z1), lax.stop_gradient(z2)


# ----------------------------------------------------------------------------
if __name__ == "__main__":
    key = jax.random.PRNGKey(0)
    k_img1, k_img2, k_img3, k_prm = jax.random.split(key, 4)

    bs = 2
    image1 = jax.random.normal(k_img1, (bs, CHANNELS, IMG_SIZE, IMG_SIZE), jnp.float32)
    image2 = jax.random.normal(k_img2, (bs, CHANNELS, IMG_SIZE, IMG_SIZE), jnp.float32)
    image3 = jax.random.normal(k_img3, (bs, CHANNELS, IMG_SIZE, IMG_SIZE), jnp.float32)

    params = prepare_params(init_raw_params(k_prm))

    p1, p2, z1, z2 = contrast_depth_imagenet_forward(params, image1, image2, image3)
    jax.block_until_ready((p1, p2, z1, z2))

    assert p1.shape == (bs, EMBED_DIM) and p2.shape == (bs, EMBED_DIM)
    assert z1.shape == (bs, EMBED_DIM) and z2.shape == (bs, EMBED_DIM)
    assert jnp.all(jnp.isfinite(p1)) and jnp.all(jnp.isfinite(p2))
    assert jnp.all(jnp.isfinite(z1)) and jnp.all(jnp.isfinite(z2))

    print("KERNEL_OK")
</pallas_src>

<mosaic_0001>
module attributes {stable_mosaic.version = 11 : i64} {
  func.func @fused_heads_kernel(%arg0: memref<4x768xf32, #tpu.memory_space<vmem>>, %arg1: memref<768x384xbf16, #tpu.memory_space<vmem>>, %arg2: memref<384x384xbf16, #tpu.memory_space<vmem>>, %arg3: memref<384x768xbf16, #tpu.memory_space<vmem>>, %arg4: memref<768x384xbf16, #tpu.memory_space<vmem>>, %arg5: memref<6x384xf32, #tpu.memory_space<vmem>>, %arg6: memref<3x768xf32, #tpu.memory_space<vmem>>, %arg7: memref<4x384xf32, #tpu.memory_space<vmem>>, %arg8: memref<4x384xf32, #tpu.memory_space<vmem>>) attributes {dimension_semantics = [], scalar_prefetch = 0 : i64, scratch_operands = 0 : i64, tpu.core_type = #tpu.core_type<tc>} {
    %c0 = arith.constant 0 : index
    %c0_0 = arith.constant 0 : index
    %0 = vector.load %arg0[%c0, %c0_0] : memref<4x768xf32, #tpu.memory_space<vmem>>, vector<4x768xf32>
    %c0_1 = arith.constant 0 : index
    %c0_2 = arith.constant 0 : index
    %1 = vector.load %arg5[%c0_1, %c0_2] : memref<6x384xf32, #tpu.memory_space<vmem>>, vector<6x384xf32>
    %c0_3 = arith.constant 0 : index
    %c0_4 = arith.constant 0 : index
    %2 = vector.load %arg6[%c0_3, %c0_4] : memref<3x768xf32, #tpu.memory_space<vmem>>, vector<3x768xf32>
    %3 = arith.truncf %0 : vector<4x768xf32> to vector<4x768xbf16>
    %c0_5 = arith.constant 0 : index
    %c0_6 = arith.constant 0 : index
    %4 = vector.load %arg1[%c0_5, %c0_6] : memref<768x384xbf16, #tpu.memory_space<vmem>>, vector<768x384xbf16>
    %cst = arith.constant dense<0.000000e+00> : vector<4x384xf32>
    %5 = tpu.matmul %3, %4, %cst {dimension_numbers = #tpu.dot_dimension_numbers<[1], [0], [0], [1], [0, 0, 1, 1], [], []>} : vector<4x768xbf16>, vector<768x384xbf16>, vector<4x384xf32> -> vector<4x384xf32>
    %6 = vector.extract_strided_slice %1 {offsets = [0, 0], sizes = [1, 384], strides = [1, 1]} : vector<6x384xf32> to vector<1x384xf32>
    %7 = vector.broadcast %6 : vector<1x384xf32> to vector<4x384xf32>
    %8 = arith.addf %5, %7 : vector<4x384xf32>
    %9 = vector.extract_strided_slice %1 {offsets = [1, 0], sizes = [1, 384], strides = [1, 1]} : vector<6x384xf32> to vector<1x384xf32>
    %10 = vector.extract_strided_slice %1 {offsets = [2, 0], sizes = [1, 384], strides = [1, 1]} : vector<6x384xf32> to vector<1x384xf32>
    %11 = tpu.iota {dimensions = array<i32: 0>} : vector<4x384xi32>
    %c2_i32 = arith.constant 2 : i32
    %12 = vector.broadcast %c2_i32 : i32 to vector<4x384xi32>
    %13 = arith.cmpi slt, %11, %12 : vector<4x384xi32>
    %14 = arith.extui %13 : vector<4x384xi1> to vector<4x384xi32>
    %15 = arith.sitofp %14 : vector<4x384xi32> to vector<4x384xf32>
    %cst_7 = arith.constant 1.000000e+00 : f32
    %16 = vector.broadcast %cst_7 : f32 to vector<4x384xf32>
    %17 = arith.subf %16, %15 : vector<4x384xf32>
    %18 = arith.mulf %8, %15 : vector<4x384xf32>
    %cst_8 = arith.constant dense<0.000000e+00> : vector<384xf32>
    %19 = vector.multi_reduction <add>, %18, %cst_8 [0] : vector<4x384xf32> to vector<384xf32>
    %20 = vector.shape_cast %19 : vector<384xf32> to vector<1x384xf32>
    %cst_9 = arith.constant 5.000000e-01 : f32
    %21 = vector.broadcast %cst_9 : f32 to vector<1x384xf32>
    %22 = arith.mulf %20, %21 : vector<1x384xf32>
    %23 = vector.broadcast %22 : vector<1x384xf32> to vector<4x384xf32>
    %24 = arith.mulf %15, %23 : vector<4x384xf32>
    %25 = arith.mulf %8, %17 : vector<4x384xf32>
    %cst_10 = arith.constant dense<0.000000e+00> : vector<384xf32>
    %26 = vector.multi_reduction <add>, %25, %cst_10 [0] : vector<4x384xf32> to vector<384xf32>
    %27 = vector.shape_cast %26 : vector<384xf32> to vector<1x384xf32>
    %cst_11 = arith.constant 5.000000e-01 : f32
    %28 = vector.broadcast %cst_11 : f32 to vector<1x384xf32>
    %29 = arith.mulf %27, %28 : vector<1x384xf32>
    %30 = vector.broadcast %29 : vector<1x384xf32> to vector<4x384xf32>
    %31 = arith.mulf %17, %30 : vector<4x384xf32>
    %32 = arith.addf %24, %31 : vector<4x384xf32>
    %33 = arith.subf %8, %32 : vector<4x384xf32>
    %34 = arith.mulf %33, %33 : vector<4x384xf32>
    %35 = arith.mulf %34, %15 : vector<4x384xf32>
    %cst_12 = arith.constant dense<0.000000e+00> : vector<384xf32>
    %36 = vector.multi_reduction <add>, %35, %cst_12 [0] : vector<4x384xf32> to vector<384xf32>
    %37 = vector.shape_cast %36 : vector<384xf32> to vector<1x384xf32>
    %cst_13 = arith.constant 5.000000e-01 : f32
    %38 = vector.broadcast %cst_13 : f32 to vector<1x384xf32>
    %39 = arith.mulf %37, %38 : vector<1x384xf32>
    %40 = vector.broadcast %39 : vector<1x384xf32> to vector<4x384xf32>
    %41 = arith.mulf %15, %40 : vector<4x384xf32>
    %42 = arith.mulf %34, %17 : vector<4x384xf32>
    %cst_14 = arith.constant dense<0.000000e+00> : vector<384xf32>
    %43 = vector.multi_reduction <add>, %42, %cst_14 [0] : vector<4x384xf32> to vector<384xf32>
    %44 = vector.shape_cast %43 : vector<384xf32> to vector<1x384xf32>
    %cst_15 = arith.constant 5.000000e-01 : f32
    %45 = vector.broadcast %cst_15 : f32 to vector<1x384xf32>
    %46 = arith.mulf %44, %45 : vector<1x384xf32>
    %47 = vector.broadcast %46 : vector<1x384xf32> to vector<4x384xf32>
    %48 = arith.mulf %17, %47 : vector<4x384xf32>
    %49 = arith.addf %41, %48 : vector<4x384xf32>
    %cst_16 = arith.constant 9.99999974E-6 : f32
    %50 = vector.broadcast %cst_16 : f32 to vector<4x384xf32>
    %51 = arith.addf %49, %50 : vector<4x384xf32>
    %52 = math.rsqrt %51 : vector<4x384xf32>
    %53 = arith.mulf %33, %52 : vector<4x384xf32>
    %54 = vector.broadcast %9 : vector<1x384xf32> to vector<4x384xf32>
    %55 = arith.mulf %53, %54 : vector<4x384xf32>
    %56 = vector.broadcast %10 : vector<1x384xf32> to vector<4x384xf32>
    %57 = arith.addf %55, %56 : vector<4x384xf32>
    %cst_17 = arith.constant 0.000000e+00 : f32
    %58 = vector.broadcast %cst_17 : f32 to vector<4x384xf32>
    %59 = arith.maximumf %57, %58 : vector<4x384xf32>
    %60 = arith.truncf %59 : vector<4x384xf32> to vector<4x384xbf16>
    %c0_18 = arith.constant 0 : index
    %c0_19 = arith.constant 0 : index
    %61 = vector.load %arg2[%c0_18, %c0_19] : memref<384x384xbf16, #tpu.memory_space<vmem>>, vector<384x384xbf16>
    %cst_20 = arith.constant dense<0.000000e+00> : vector<4x384xf32>
    %62 = tpu.matmul %60, %61, %cst_20 {dimension_numbers = #tpu.dot_dimension_numbers<[1], [0], [0], [1], [0, 0, 1, 1], [], []>} : vector<4x384xbf16>, vector<384x384xbf16>, vector<4x384xf32> -> vector<4x384xf32>
    %63 = vector.extract_strided_slice %1 {offsets = [3, 0], sizes = [1, 384], strides = [1, 1]} : vector<6x384xf32> to vector<1x384xf32>
    %64 = vector.extract_strided_slice %1 {offsets = [4, 0], sizes = [1, 384], strides = [1, 1]} : vector<6x384xf32> to vector<1x384xf32>
    %65 = tpu.iota {dimensions = array<i32: 0>} : vector<4x384xi32>
    %c2_i32_21 = arith.constant 2 : i32
    %66 = vector.broadcast %c2_i32_21 : i32 to vector<4x384xi32>
    %67 = arith.cmpi slt, %65, %66 : vector<4x384xi32>
    %68 = arith.extui %67 : vector<4x384xi1> to vector<4x384xi32>
    %69 = arith.sitofp %68 : vector<4x384xi32> to vector<4x384xf32>
    %cst_22 = arith.constant 1.000000e+00 : f32
    %70 = vector.broadcast %cst_22 : f32 to vector<4x384xf32>
    %71 = arith.subf %70, %69 : vector<4x384xf32>
    %72 = arith.mulf %62, %69 : vector<4x384xf32>
    %cst_23 = arith.constant dense<0.000000e+00> : vector<384xf32>
    %73 = vector.multi_reduction <add>, %72, %cst_23 [0] : vector<4x384xf32> to vector<384xf32>
    %74 = vector.shape_cast %73 : vector<384xf32> to vector<1x384xf32>
    %cst_24 = arith.constant 5.000000e-01 : f32
    %75 = vector.broadcast %cst_24 : f32 to vector<1x384xf32>
    %76 = arith.mulf %74, %75 : vector<1x384xf32>
    %77 = vector.broadcast %76 : vector<1x384xf32> to vector<4x384xf32>
    %78 = arith.mulf %69, %77 : vector<4x384xf32>
    %79 = arith.mulf %62, %71 : vector<4x384xf32>
    %cst_25 = arith.constant dense<0.000000e+00> : vector<384xf32>
    %80 = vector.multi_reduction <add>, %79, %cst_25 [0] : vector<4x384xf32> to vector<384xf32>
    %81 = vector.shape_cast %80 : vector<384xf32> to vector<1x384xf32>
    %cst_26 = arith.constant 5.000000e-01 : f32
    %82 = vector.broadcast %cst_26 : f32 to vector<1x384xf32>
    %83 = arith.mulf %81, %82 : vector<1x384xf32>
    %84 = vector.broadcast %83 : vector<1x384xf32> to vector<4x384xf32>
    %85 = arith.mulf %71, %84 : vector<4x384xf32>
    %86 = arith.addf %78, %85 : vector<4x384xf32>
    %87 = arith.subf %62, %86 : vector<4x384xf32>
    %88 = arith.mulf %87, %87 : vector<4x384xf32>
    %89 = arith.mulf %88, %69 : vector<4x384xf32>
    %cst_27 = arith.constant dense<0.000000e+00> : vector<384xf32>
    %90 = vector.multi_reduction <add>, %89, %cst_27 [0] : vector<4x384xf32> to vector<384xf32>
    %91 = vector.shape_cast %90 : vector<384xf32> to vector<1x384xf32>
    %cst_28 = arith.constant 5.000000e-01 : f32
    %92 = vector.broadcast %cst_28 : f32 to vector<1x384xf32>
    %93 = arith.mulf %91, %92 : vector<1x384xf32>
    %94 = vector.broadcast %93 : vector<1x384xf32> to vector<4x384xf32>
    %95 = arith.mulf %69, %94 : vector<4x384xf32>
    %96 = arith.mulf %88, %71 : vector<4x384xf32>
    %cst_29 = arith.constant dense<0.000000e+00> : vector<384xf32>
    %97 = vector.multi_reduction <add>, %96, %cst_29 [0] : vector<4x384xf32> to vector<384xf32>
    %98 = vector.shape_cast %97 : vector<384xf32> to vector<1x384xf32>
    %cst_30 = arith.constant 5.000000e-01 : f32
    %99 = vector.broadcast %cst_30 : f32 to vector<1x384xf32>
    %100 = arith.mulf %98, %99 : vector<1x384xf32>
    %101 = vector.broadcast %100 : vector<1x384xf32> to vector<4x384xf32>
    %102 = arith.mulf %71, %101 : vector<4x384xf32>
    %103 = arith.addf %95, %102 : vector<4x384xf32>
    %cst_31 = arith.constant 9.99999974E-6 : f32
    %104 = vector.broadcast %cst_31 : f32 to vector<4x384xf32>
    %105 = arith.addf %103, %104 : vector<4x384xf32>
    %106 = math.rsqrt %105 : vector<4x384xf32>
    %107 = arith.mulf %87, %106 : vector<4x384xf32>
    %108 = vector.broadcast %63 : vector<1x384xf32> to vector<4x384xf32>
    %109 = arith.mulf %107, %108 : vector<4x384xf32>
    %110 = vector.broadcast %64 : vector<1x384xf32> to vector<4x384xf32>
    %111 = arith.addf %109, %110 : vector<4x384xf32>
    %112 = arith.truncf %111 : vector<4x384xf32> to vector<4x384xbf16>
    %c0_32 = arith.constant 0 : index
    %c0_33 = arith.constant 0 : index
    %113 = vector.load %arg3[%c0_32, %c0_33] : memref<384x768xbf16, #tpu.memory_space<vmem>>, vector<384x768xbf16>
    %cst_34 = arith.constant dense<0.000000e+00> : vector<4x768xf32>
    %114 = tpu.matmul %112, %113, %cst_34 {dimension_numbers = #tpu.dot_dimension_numbers<[1], [0], [0], [1], [0, 0, 1, 1], [], []>} : vector<4x384xbf16>, vector<384x768xbf16>, vector<4x768xf32> -> vector<4x768xf32>
    %115 = vector.extract_strided_slice %2 {offsets = [0, 0], sizes = [1, 768], strides = [1, 1]} : vector<3x768xf32> to vector<1x768xf32>
    %116 = vector.broadcast %115 : vector<1x768xf32> to vector<4x768xf32>
    %117 = arith.addf %114, %116 : vector<4x768xf32>
    %118 = vector.extract_strided_slice %2 {offsets = [1, 0], sizes = [1, 768], strides = [1, 1]} : vector<3x768xf32> to vector<1x768xf32>
    %119 = vector.extract_strided_slice %2 {offsets = [2, 0], sizes = [1, 768], strides = [1, 1]} : vector<3x768xf32> to vector<1x768xf32>
    %120 = tpu.iota {dimensions = array<i32: 0>} : vector<4x768xi32>
    %c2_i32_35 = arith.constant 2 : i32
    %121 = vector.broadcast %c2_i32_35 : i32 to vector<4x768xi32>
    %122 = arith.cmpi slt, %120, %121 : vector<4x768xi32>
    %123 = arith.extui %122 : vector<4x768xi1> to vector<4x768xi32>
    %124 = arith.sitofp %123 : vector<4x768xi32> to vector<4x768xf32>
    %cst_36 = arith.constant 1.000000e+00 : f32
    %125 = vector.broadcast %cst_36 : f32 to vector<4x768xf32>
    %126 = arith.subf %125, %124 : vector<4x768xf32>
    %127 = arith.mulf %117, %124 : vector<4x768xf32>
    %cst_37 = arith.constant dense<0.000000e+00> : vector<768xf32>
    %128 = vector.multi_reduction <add>, %127, %cst_37 [0] : vector<4x768xf32> to vector<768xf32>
    %129 = vector.shape_cast %128 : vector<768xf32> to vector<1x768xf32>
    %cst_38 = arith.constant 5.000000e-01 : f32
    %130 = vector.broadcast %cst_38 : f32 to vector<1x768xf32>
    %131 = arith.mulf %129, %130 : vector<1x768xf32>
    %132 = vector.broadcast %131 : vector<1x768xf32> to vector<4x768xf32>
    %133 = arith.mulf %124, %132 : vector<4x768xf32>
    %134 = arith.mulf %117, %126 : vector<4x768xf32>
    %cst_39 = arith.constant dense<0.000000e+00> : vector<768xf32>
    %135 = vector.multi_reduction <add>, %134, %cst_39 [0] : vector<4x768xf32> to vector<768xf32>
    %136 = vector.shape_cast %135 : vector<768xf32> to vector<1x768xf32>
    %cst_40 = arith.constant 5.000000e-01 : f32
    %137 = vector.broadcast %cst_40 : f32 to vector<1x768xf32>
    %138 = arith.mulf %136, %137 : vector<1x768xf32>
    %139 = vector.broadcast %138 : vector<1x768xf32> to vector<4x768xf32>
    %140 = arith.mulf %126, %139 : vector<4x768xf32>
    %141 = arith.addf %133, %140 : vector<4x768xf32>
    %142 = arith.subf %117, %141 : vector<4x768xf32>
    %143 = arith.mulf %142, %142 : vector<4x768xf32>
    %144 = arith.mulf %143, %124 : vector<4x768xf32>
    %cst_41 = arith.constant dense<0.000000e+00> : vector<768xf32>
    %145 = vector.multi_reduction <add>, %144, %cst_41 [0] : vector<4x768xf32> to vector<768xf32>
    %146 = vector.shape_cast %145 : vector<768xf32> to vector<1x768xf32>
    %cst_42 = arith.constant 5.000000e-01 : f32
    %147 = vector.broadcast %cst_42 : f32 to vector<1x768xf32>
    %148 = arith.mulf %146, %147 : vector<1x768xf32>
    %149 = vector.broadcast %148 : vector<1x768xf32> to vector<4x768xf32>
    %150 = arith.mulf %124, %149 : vector<4x768xf32>
    %151 = arith.mulf %143, %126 : vector<4x768xf32>
    %cst_43 = arith.constant dense<0.000000e+00> : vector<768xf32>
    %152 = vector.multi_reduction <add>, %151, %cst_43 [0] : vector<4x768xf32> to vector<768xf32>
    %153 = vector.shape_cast %152 : vector<768xf32> to vector<1x768xf32>
    %cst_44 = arith.constant 5.000000e-01 : f32
    %154 = vector.broadcast %cst_44 : f32 to vector<1x768xf32>
    %155 = arith.mulf %153, %154 : vector<1x768xf32>
    %156 = vector.broadcast %155 : vector<1x768xf32> to vector<4x768xf32>
    %157 = arith.mulf %126, %156 : vector<4x768xf32>
    %158 = arith.addf %150, %157 : vector<4x768xf32>
    %cst_45 = arith.constant 9.99999974E-6 : f32
    %159 = vector.broadcast %cst_45 : f32 to vector<4x768xf32>
    %160 = arith.addf %158, %159 : vector<4x768xf32>
    %161 = math.rsqrt %160 : vector<4x768xf32>
    %162 = arith.mulf %142, %161 : vector<4x768xf32>
    %163 = vector.broadcast %118 : vector<1x768xf32> to vector<4x768xf32>
    %164 = arith.mulf %162, %163 : vector<4x768xf32>
    %165 = vector.broadcast %119 : vector<1x768xf32> to vector<4x768xf32>
    %166 = arith.addf %164, %165 : vector<4x768xf32>
    %cst_46 = arith.constant 0.000000e+00 : f32
    %167 = vector.broadcast %cst_46 : f32 to vector<4x768xf32>
    %168 = arith.maximumf %166, %167 : vector<4x768xf32>
    %169 = arith.truncf %168 : vector<4x768xf32> to vector<4x768xbf16>
    %c0_47 = arith.constant 0 : index
    %c0_48 = arith.constant 0 : index
    %170 = vector.load %arg4[%c0_47, %c0_48] : memref<768x384xbf16, #tpu.memory_space<vmem>>, vector<768x384xbf16>
    %cst_49 = arith.constant dense<0.000000e+00> : vector<4x384xf32>
    %171 = tpu.matmul %169, %170, %cst_49 {dimension_numbers = #tpu.dot_dimension_numbers<[1], [0], [0], [1], [0, 0, 1, 1], [], []>} : vector<4x768xbf16>, vector<768x384xbf16>, vector<4x384xf32> -> vector<4x384xf32>
    %172 = vector.extract_strided_slice %1 {offsets = [5, 0], sizes = [1, 384], strides = [1, 1]} : vector<6x384xf32> to vector<1x384xf32>
    %173 = vector.broadcast %172 : vector<1x384xf32> to vector<4x384xf32>
    %174 = arith.addf %171, %173 : vector<4x384xf32>
    %c0_50 = arith.constant 0 : index
    %c0_51 = arith.constant 0 : index
    %175 = vector.load %arg7[%c0_50, %c0_51] : memref<4x384xf32, #tpu.memory_space<vmem>>, vector<4x384xf32>
    tpu.vector_store %arg7[%c0_50, %c0_51], %111 {strides = array<i32>} : memref<4x384xf32, #tpu.memory_space<vmem>>, vector<4x384xf32>,
    %c0_52 = arith.constant 0 : index
    %c0_53 = arith.constant 0 : index
    %176 = vector.load %arg8[%c0_52, %c0_53] : memref<4x384xf32, #tpu.memory_space<vmem>>, vector<4x384xf32>
    tpu.vector_store %arg8[%c0_52, %c0_53], %174 {strides = array<i32>} : memref<4x384xf32, #tpu.memory_space<vmem>>, vector<4x384xf32>,
    return
  }
}

</mosaic_0001>

<bundles_post_ra>
// kernel: contrast_depth_imagenet_forward.1
= control target key start
LH: loop header
LB: loop body
LE: loop exit
PB: predicated region body
PF: predicated region fallthrough
CT: control target
= control target key end

     0   :  { %14 = vsyncpa [#allocation3], 0  ;;  %s8451_s0 = inlined_call_operand.vmem [shape: f32[4,768], index: 0, kind: input, shape index: {}]   ;;  %s8452_s1 = inlined_call_operand.vmem [shape: bf16[768,384], index: 1, kind: input, shape index: {}]   ;;  %s8453_s2 = inlined_call_operand.hbm [shape: bf16[384,384], index: 2, kind: input, shape index: {}]   ;;  %s8454_s3 = inlined_call_operand.vmem [shape: bf16[384,768], index: 3, kind: input, shape index: {}]   ;;  %s8455_s4 = inlined_call_operand.vmem [shape: bf16[768,384], index: 4, kind: input, shape index: {}]   ;;  %s8456_s5 = inlined_call_operand.vmem [shape: f32[6,384], index: 5, kind: input, shape index: {}]   ;;  %s8457_s6 = inlined_call_operand.hbm [shape: f32[3,768], index: 6, kind: input, shape index: {}]   ;;  %s8458_s7 = inlined_call_operand.vmem [shape: f32[4,384], index: 7, kind: output, shape index: {0}]   ;;  %s8459_s8 = inlined_call_operand.vmem [shape: f32[4,384], index: 8, kind: output, shape index: {1}]  }
   0x1   :  { %15 = vsyncpa [#allocation5], 0  ;;  %s6624_s27 = smov [#allocation2]   ;;  %s6576_s9 = scalar_lea.hbm %s8453_s2, 9216 }
   0x2   :  { %s25_s28 = sshll.u32 %s6624_s27, 4  ;;  %p6577_p0 = scmp.ne.s32.totalorder %s8453_s2, %s6576_s9  ;;  %s26_s28 = int_to_ptr.vmem [resolvable:$true] %s25_s28 }
   0x3   :  { %p6580_p1 = scmp.lt.u32.totalorder %s6576_s9, %s8453_s2 }
   0x5   :  { %p6582_p2 = pnand %p6580_p1, %p6577_p0 }
   0x7   :  { %6585 = shalt.err (!%p6582_p2)
}
   0x8   :  { %s6586_s14 = scalar_lea.vmem %s26_s28, 9216  ;;  %p6591_p4 = scmp.lt.s32.totalorder %s26_s28, %s26_s28 }
   0x9   :  { %p6587_p3 = scmp.ne.s32.totalorder %s26_s28, %s6586_s14  ;;  %p6592_p5 = scmp.lt.s32.totalorder %s6586_s14, %s6586_s14 }
   0xb   :  { %p6593_p6 = por %p6592_p5, %p6591_p4 }
   0xd   :  { %p6594_p7 = pnand %p6593_p6, %p6587_p3 }
   0xf   :  { %6597 = shalt.err (!%p6594_p7)
}
  0x10   :  { %s6625_s15 = smov 192   ;;  %s6626_s16 = smov 12  }
  0x11   :  { %31 = dma.hbm_to_vmem [thread:$0]  %s8453_s2, 9216, %s26_s28, [#allocation3], %s6625_s15, %s6625_s15, %s6626_s16  }
  0x12   :  { %s6627_s19 = smov [#allocation4]   ;;  %s6598_s23 = scalar_lea.hbm %s8457_s6, 384 }
  0x13   :  { %s44_s20 = sshll.u32 %s6627_s19, 4  ;;  %p6599_p8 = scmp.ne.s32.totalorder %s8457_s6, %s6598_s23  ;;  %s45_s20 = int_to_ptr.vmem [resolvable:$true] %s44_s20 }
  0x14   :  { %p6602_p9 = scmp.lt.u32.totalorder %s6598_s23, %s8457_s6 }
  0x16   :  { %p6604_p10 = pnand %p6602_p9, %p6599_p8 }
  0x18   :  { %6607 = shalt.err (!%p6604_p10)
}
  0x19   :  { %s6608_s29 = scalar_lea.vmem %s45_s20, 384  ;;  %p6613_p12 = scmp.lt.s32.totalorder %s45_s20, %s45_s20 }
  0x1a   :  { %p6609_p11 = scmp.ne.s32.totalorder %s45_s20, %s6608_s29  ;;  %p6614_p13 = scmp.lt.s32.totalorder %s6608_s29, %s6608_s29 }
  0x1c   :  { %p6615_p0 = por %p6614_p13, %p6613_p12 }
  0x1e   :  { %p6616_p1 = pnand %p6615_p0, %p6609_p11 }
  0x20   :  { %6619 = shalt.err (!%p6616_p1)
}
  0x21   :  { %47 = dma.hbm_to_vmem [thread:$0]  %s8457_s6, 384, %s45_s20, [#allocation5]  }
  0x22   :  { %6620 = dma.done.wait [#allocation3], 9216  }
  0x23   :  { %6621 = vsyncadd [#allocation3], 4294958080 }
  0x24   :  { %6622 = dma.done.wait [#allocation5], 384  }
  0x25   :  { %6623 = vsyncadd [#allocation5], 4294966912  ;;  %v5849_v0 = vld [vmem:[%s8452_s1 + $0x4] ss:$12 sps:$4 sm:$0xff]   ;;  %v5851_v1 = vld [vmem:[%s8452_s1] ss:$12 sps:$4 sm:$0xff]  }
  0x26   :  { %1051 = vmatprep.subr.bf16.mxu0 %v5849_v0  ;;  %v5852_v2 = vld [vmem:[%s8452_s1 + $0x1c] ss:$12 sps:$4 sm:$0xff]   ;;  %v5854_v3 = vld [vmem:[%s8452_s1 + $0x18] ss:$12 sps:$4 sm:$0xff]   ;;  %v5855_v4 = vld [vmem:[%s8452_s1 + $0x34] ss:$12 sps:$4 sm:$0xff]  }
  0x27   :  { %1052 = vmatpush1.bf16.msra.mxu0 %v5851_v1  ;;  %v5858_v5 = vld [vmem:[%s8452_s1 + $0xc8] ss:$12 sps:$4 sm:$0xff]   ;;  %v5857_v7 = vld [vmem:[%s8452_s1 + $0x30] ss:$12 sps:$4 sm:$0xff]   ;;  %v5860_v8 = vld [vmem:[%s8452_s1 + $0x4c] ss:$12 sps:$4 sm:$0xff]  }
  0x28   :  { %1053 = vmatprep.subr.bf16.mxu0 %v5852_v2  ;;  %v5859_v6 = vld [vmem:[%s8452_s1 + $0x8] ss:$12 sps:$4 sm:$0xff]   ;;  %5617 = vmatprep.subr.bf16.mxu1 %v5858_v5  ;;  %v5863_v9 = vld [vmem:[%s8452_s1 + $0xe0] ss:$12 sps:$4 sm:$0xff]   ;;  %v5865_v12 = vld [vmem:[%s8452_s1 + $0x64] ss:$12 sps:$4 sm:$0xff]  }
  0x29   :  { %5618 = vmatpush3.bf16.msra.mxu1 %v5859_v6  ;;  %v5864_v10 = vld [vmem:[%s8452_s1 + $0x20] ss:$12 sps:$4 sm:$0xff]   ;;  %v5862_v11 = vld [vmem:[%s8452_s1 + $0x48] ss:$12 sps:$4 sm:$0xff]   ;;  %v5868_v13 = vld [vmem:[%s8452_s1 + $0xf8] ss:$12 sps:$4 sm:$0xff]  }
  0x2a   :  { %5619 = vmatprep.subr.bf16.mxu1 %v5863_v9  ;;  %v5869_v14 = vld [vmem:[%s8452_s1 + $0x38] ss:$12 sps:$4 sm:$0xff]   ;;  %v5867_v15 = vld [vmem:[%s8452_s1 + $0x60] ss:$12 sps:$4 sm:$0xff]   ;;  %v5873_v16 = vld [vmem:[%s8452_s1 + $0x110] ss:$12 sps:$4 sm:$0xff]  }
  0x2b   :  { %1054 = vmatpush1.bf16.msra.mxu0 %v5854_v3  ;;  %v5874_v17 = vld [vmem:[%s8452_s1 + $0x50] ss:$12 sps:$4 sm:$0xff]   ;;  %v5872_v19 = vld [vmem:[%s8452_s1 + $0x78] ss:$12 sps:$4 sm:$0xff]   ;;  %v5878_v20 = vld [vmem:[%s8452_s1 + $0x128] ss:$12 sps:$4 sm:$0xff]  }
  0x2c   :  { %1055 = vmatprep.subr.bf16.mxu0 %v5855_v4  ;;  %v5870_v18 = vld [vmem:[%s8452_s1 + $0x7c] ss:$12 sps:$4 sm:$0xff]   ;;  %v5875_v22 = vld [vmem:[%s8452_s1 + $0x94] ss:$12 sps:$4 sm:$0xff]   ;;  %v5880_v25 = vld [vmem:[%s8452_s1 + $0xac] ss:$12 sps:$4 sm:$0xff]  }
  0x2d   :  { %5620 = vmatpush3.bf16.msra.mxu1 %v5864_v10  ;;  %v5879_v21 = vld [vmem:[%s8452_s1 + $0x68] ss:$12 sps:$4 sm:$0xff]   ;;  %v5883_v23 = vld [vmem:[%s8452_s1 + $0x140] ss:$12 sps:$4 sm:$0xff]   ;;  %v5877_v24 = vld [vmem:[%s8452_s1 + $0x90] ss:$12 sps:$4 sm:$0xff]  }
  0x2e   :  { %5621 = vmatprep.subr.bf16.mxu1 %v5868_v13  ;;  %v5884_v26 = vld [vmem:[%s8452_s1 + $0x80] ss:$12 sps:$4 sm:$0xff]   ;;  %v5888_v27 = vld [vmem:[%s8452_s1 + $0x158] ss:$12 sps:$4 sm:$0xff]   ;;  %v5882_v28 = vld [vmem:[%s8452_s1 + $0xa8] ss:$12 sps:$4 sm:$0xff]  }
  0x2f   :  { %1056 = vmatpush1.bf16.msra.mxu0 %v5857_v7  ;;  %v5885_v29 = vld [vmem:[%s8452_s1 + $0xc4] ss:$12 sps:$4 sm:$0xff]   ;;  %v5887_v32 = vld [vmem:[%s8452_s1 + $0xc0] ss:$12 sps:$4 sm:$0xff]   ;;  %v5890_v36 = vld [vmem:[%s8452_s1 + $0xdc] ss:$12 sps:$4 sm:$0xff]  }
  0x30   :  { %1057 = vmatprep.subr.bf16.mxu0 %v5860_v8  ;;  %v5889_v30 = vld [vmem:[%s8452_s1 + $0x98] ss:$12 sps:$4 sm:$0xff]   ;;  %v5893_v31 = vld [vmem:[%s8452_s1 + $0x170] ss:$12 sps:$4 sm:$0xff]   ;;  %v5899_v39 = vld [vmem:[%s8452_s1 + $0x248] ss:$12 sps:$4 sm:$0xff]  }
  0x31   :  { %5622 = vmatpush3.bf16.msra.mxu1 %v5869_v14  ;;  %v55_v33 = vld [vmem:[%s8451_s0] sm:$0xff]  ;;  %v5894_v34 = vld [vmem:[%s8452_s1 + $0xb0] ss:$12 sps:$4 sm:$0xff]   ;;  %v5900_v42 = vld [vmem:[%s8452_s1 + $0x188] ss:$12 sps:$4 sm:$0xff]   ;;  %vm1303_vm1 = vcmask 1043456  }
  0x32   :  { %5623 = vmatprep.subr.bf16.mxu1 %v5873_v16  ;;  %v67_v35 = vcombine.high %v55_v33, %v55_v33  ;;  %v5892_v37 = vld [vmem:[%s8452_s1 + $0xd8] ss:$12 sps:$4 sm:$0xff]   ;;  %v5895_v40 = vld [vmem:[%s8452_s1 + $0xf4] ss:$12 sps:$4 sm:$0xff]   ;;  %v6817_v41 = vpack.c.bf16 %v55_v33, %v55_v33  ;;  %v5897_v44 = vld [vmem:[%s8452_s1 + $0xf0] ss:$12 sps:$4 sm:$0xff]  }
  0x33   :  { %1058 = vmatpush1.bf16.msra.mxu0 %v5862_v11  ;;  %v5904_v43 = vld [vmem:[%s8452_s1 + $0x260] ss:$12 sps:$4 sm:$0xff]   ;;  %v5909_v47 = vld [vmem:[%s8452_s1 + $0x278] ss:$12 sps:$4 sm:$0xff]   ;;  %v5903_v48 = vld [vmem:[%s8452_s1 + $0x108] ss:$12 sps:$4 sm:$0xff]  }
  0x34   :  { %1059 = vmatprep.subr.bf16.mxu0 %v5865_v12  ;;  %v74_v38 = vpack.c.bf16 %v67_v35, %v67_v35  ;;  %v5905_v45 = vld [vmem:[%s8452_s1 + $0x1a0] ss:$12 sps:$4 sm:$0xff]   ;;  %v5906_v49 = vld [vmem:[%s8452_s1 + $0x124] ss:$12 sps:$4 sm:$0xff]   ;;  %v5911_v53 = vld [vmem:[%s8452_s1 + $0x13c] ss:$12 sps:$4 sm:$0xff]  }
  0x35   :  { %5624 = vmatpush3.bf16.msra.mxu1 %v5874_v17  ;;  %v5901_v46 = vld [vmem:[%s8452_s1 + $0x10c] ss:$12 sps:$4 sm:$0xff]   ;;  %v5914_v51 = vld [vmem:[%s8452_s1 + $0x290] ss:$12 sps:$4 sm:$0xff]   ;;  %v5919_v55 = vld [vmem:[%s8452_s1 + $0x2a8] ss:$12 sps:$4 sm:$0xff]  }
  0x36   :  { %5625 = vmatprep.subr.bf16.mxu1 %v5878_v20  ;;  %1206 = vmatprep.mubr.bf16.mxu1 %v74_v38  ;;  %v5910_v50 = vld [vmem:[%s8452_s1 + $0x1b8] ss:$12 sps:$4 sm:$0xff]   ;;  %v5908_v52 = vld [vmem:[%s8452_s1 + $0x120] ss:$12 sps:$4 sm:$0xff]   ;;  %v5915_v54 = vld [vmem:[%s8452_s1 + $0x1d0] ss:$12 sps:$4 sm:$0xff]  }
  0x37   :  { %1060 = vmatpush1.bf16.msra.mxu0 %v5867_v15  ;;  %1083 = vmatprep.mubr.bf16.mxu0 %v74_v38  ;;  %v5913_v56 = vld [vmem:[%s8452_s1 + $0x138] ss:$12 sps:$4 sm:$0xff]   ;;  %v5916_v57 = vld [vmem:[%s8452_s1 + $0x154] ss:$12 sps:$4 sm:$0xff]   ;;  %v5918_v60 = vld [vmem:[%s8452_s1 + $0x150] ss:$12 sps:$4 sm:$0xff]  }
  0x38   :  { %1061 = vmatprep.subr.bf16.mxu0 %v5870_v18  ;;  %v5920_v58 = vld [vmem:[%s8452_s1 + $0x1e8] ss:$12 sps:$4 sm:$0xff]   ;;  %v5924_v59 = vld [vmem:[%s8452_s1 + $0x2c0] ss:$12 sps:$4 sm:$0xff]   ;;  %v5929_v63 = vld [vmem:[%s8452_s1 + $0x2d8] ss:$12 sps:$4 sm:$0xff]  }
  0x39   :  { %5626 = vmatpush3.bf16.msra.mxu1 %v5879_v21  ;;  %v5921_v61 = vld [vmem:[%s8452_s1 + $0x16c] ss:$12 sps:$4 sm:$0xff]   ;;  %v5923_v0 = vld [vmem:[%s8452_s1 + $0x168] ss:$12 sps:$4 sm:$0xff]   ;;  %v5928_v2 = vld [vmem:[%s8452_s1 + $0x184] ss:$12 sps:$4 sm:$0xff]  }
  0x3a   :  { %5627 = vmatprep.subr.bf16.mxu1 %v5883_v23  ;;  %v5925_v62 = vld [vmem:[%s8452_s1 + $0x200] ss:$12 sps:$4 sm:$0xff]   ;;  %v5930_v4 = vld [vmem:[%s8452_s1 + $0x218] ss:$12 sps:$4 sm:$0xff]   ;;  %v5934_v5 = vld [vmem:[%s8452_s1 + $0x2f0] ss:$12 sps:$4 sm:$0xff]  }
  0x3b   :  { %1062 = vmatpush1.bf16.msra.mxu0 %v5872_v19  ;;  %v56_v1 = vld [vmem:[%s8451_s0 + $0x8] sm:$0xff]  ;;  %v5935_v8 = vld [vmem:[%s8452_s1 + $0x230] ss:$12 sps:$4 sm:$0xff]   ;;  %v5931_v11 = vld [vmem:[%s8452_s1 + $0x198] ss:$12 sps:$4 sm:$0xff]   ;;  %vm6630_vm2 = vmmov 0  }
  0x3c   :  { %1063 = vmatprep.subr.bf16.mxu0 %v5875_v22  ;;  %v68_v3 = vcombine.high %v56_v1, %v56_v1  ;;  %v5926_v7 = vld [vmem:[%s8452_s1 + $0x180] ss:$12 sps:$4 sm:$0xff]   ;;  %v5933_v9 = vld [vmem:[%s8452_s1 + $0x19c] ss:$12 sps:$4 sm:$0xff]   ;;  %v6917_v12 = vpack.c.bf16 %v56_v1, %v56_v1  ;;  %v5950_v19 = vld [vmem:[%s8452_s1 + $0x3f8] ss:$12 sps:$4 sm:$0xff]  }
  0x3d   :  { %5628 = vmatpush3.bf16.msra.mxu1 %v5884_v26  ;;  %v5940_v10 = vld [vmem:[%s8452_s1 + $0x3c8] ss:$12 sps:$4 sm:$0xff]   ;;  %v5945_v15 = vld [vmem:[%s8452_s1 + $0x3e0] ss:$12 sps:$4 sm:$0xff]   ;;  %v5936_v16 = vld [vmem:[%s8452_s1 + $0x1b0] ss:$12 sps:$4 sm:$0xff]  }
  0x3e   :  { %5629 = vmatprep.subr.bf16.mxu1 %v5888_v27  ;;  %v76_v6 = vpack.c.bf16 %v68_v3, %v68_v3  ;;  %v5938_v13 = vld [vmem:[%s8452_s1 + $0x1b4] ss:$12 sps:$4 sm:$0xff]   ;;  %v5944_v17 = vld [vmem:[%s8452_s1 + $0x1cc] ss:$12 sps:$4 sm:$0xff]   ;;  %v5949_v21 = vld [vmem:[%s8452_s1 + $0x1e4] ss:$12 sps:$4 sm:$0xff]  }
  0x3f   :  { %1064 = vmatpush1.bf16.msra.mxu0 %v5877_v24  ;;  %v5941_v14 = vld [vmem:[%s8452_s1 + $0x308] ss:$12 sps:$4 sm:$0xff]   ;;  %v5946_v18 = vld [vmem:[%s8452_s1 + $0x320] ss:$12 sps:$4 sm:$0xff]   ;;  %v5951_v22 = vld [vmem:[%s8452_s1 + $0x338] ss:$12 sps:$4 sm:$0xff]  }
  0x40   :  { %1065 = vmatprep.subr.bf16.mxu0 %v5880_v25  ;;  %v5942_v20 = vld [vmem:[%s8452_s1 + $0x1c8] ss:$12 sps:$4 sm:$0xff]   ;;  %v5955_v23 = vld [vmem:[%s8452_s1 + $0x410] ss:$12 sps:$4 sm:$0xff]   ;;  %v5947_v24 = vld [vmem:[%s8452_s1 + $0x1e0] ss:$12 sps:$4 sm:$0xff]  }
  0x41   :  { %5630 = vmatpush3.bf16.msra.mxu1 %v5889_v30  ;;  %v5954_v25 = vld [vmem:[%s8452_s1 + $0x1fc] ss:$12 sps:$4 sm:$0xff]   ;;  %v5959_v30 = vld [vmem:[%s8452_s1 + $0x214] ss:$12 sps:$4 sm:$0xff]   ;;  %v5970_v38 = vld [vmem:[%s8452_s1 + $0x458] ss:$12 sps:$4 sm:$0xff]  }
  0x42   :  { %5631 = vmatprep.subr.bf16.mxu1 %v5893_v31  ;;  %v5956_v26 = vld [vmem:[%s8452_s1 + $0x350] ss:$12 sps:$4 sm:$0xff]   ;;  %v5960_v27 = vld [vmem:[%s8452_s1 + $0x428] ss:$12 sps:$4 sm:$0xff]   ;;  %v5965_v31 = vld [vmem:[%s8452_s1 + $0x440] ss:$12 sps:$4 sm:$0xff]  }
  0x43   :  { %1066 = vmatpush1.bf16.msra.mxu0 %v5882_v28  ;;  %v5952_v28 = vld [vmem:[%s8452_s1 + $0x1f8] ss:$12 sps:$4 sm:$0xff]   ;;  %v5966_v35 = vld [vmem:[%s8452_s1 + $0x380] ss:$12 sps:$4 sm:$0xff]   ;;  %v6002_v1 = vld [vmem:[%s8452_s1 + $0x330] ss:$12 sps:$4 sm:$0xff]  }
  0x44   :  { %1067 = vmatprep.subr.bf16.mxu0 %v5885_v29  ;;  %v5961_v29 = vld [vmem:[%s8452_s1 + $0x368] ss:$12 sps:$4 sm:$0xff]  }
  0x45   :  { %5632 = vmatpush3.bf16.msra.mxu1 %v5894_v34  ;;  %v5957_v34 = vld [vmem:[%s8452_s1 + $0x210] ss:$12 sps:$4 sm:$0xff]   ;;  %v6005_v3 = vld [vmem:[%s8452_s1 + $0x348] ss:$12 sps:$4 sm:$0xff]  }
  0x46   :  { %5639 = vmatprep.subr.bf16.mxu1 %v5899_v39  ;;  %v5962_v39 = vld [vmem:[%s8452_s1 + $0x228] ss:$12 sps:$4 sm:$0xff]  }
  0x47   :  { %1068 = vmatpush1.bf16.msra.mxu0 %v5887_v32  ;;  %v57_v32 = vld [vmem:[%s8451_s0 + $0x10] sm:$0xff] }
  0x48   :  { %1069 = vmatprep.subr.bf16.mxu0 %v5890_v36  ;;  %1207 = vmatmul.mubr.bf16.vlgmr.msra.gmra.mrb[0].mxu1 %v6817_v41  ;;  %v69_v33 = vcombine.high %v57_v32, %v57_v32 }
  0x49   :  { %5640 = vmatpush3.bf16.msra.mxu1 %v5900_v42  ;;  %1246 = vmatprep.mubr.bf16.mxu1 %v76_v6  ;;  %v5975_v42 = vld [vmem:[%s8452_s1 + $0x470] ss:$12 sps:$4 sm:$0xff]  }
  0x4a   :  { %5641 = vmatprep.subr.bf16.mxu1 %v5904_v43  ;;  %v78_v36 = vpack.c.bf16 %v69_v33, %v69_v33  ;;  %v5967_v43 = vld [vmem:[%s8452_s1 + $0x240] ss:$12 sps:$4 sm:$0xff]   ;;  %v271_v33 = vlaneseq }
  0x4b   :  { %1070 = vmatpush1.bf16.msra.mxu0 %v5892_v37  ;;  %v5964_v37 = vld [vmem:[%s8452_s1 + $0x22c] ss:$12 sps:$4 sm:$0xff]  }
  0x4c   :  { %1071 = vmatprep.subr.bf16.mxu0 %v5895_v40  ;;  %v5971_v40 = vld [vmem:[%s8452_s1 + $0x398] ss:$12 sps:$4 sm:$0xff]  }
  0x4d   :  { %5642 = vmatpush3.bf16.msra.mxu1 %v5905_v45  ;;  %v5974_v45 = vld [vmem:[%s8452_s1 + $0x25c] ss:$12 sps:$4 sm:$0xff]  }
  0x4e   :  { %5643 = vmatprep.subr.bf16.mxu1 %v5909_v47  ;;  %v5972_v47 = vld [vmem:[%s8452_s1 + $0x258] ss:$12 sps:$4 sm:$0xff]  }
  0x4f   :  { %1072 = vmatpush1.bf16.msra.mxu0 %v5897_v44  ;;  %v5976_v44 = vld [vmem:[%s8452_s1 + $0x3b0] ss:$12 sps:$4 sm:$0xff]  }
  0x50   :  { %1073 = vmatprep.subr.bf16.mxu0 %v5901_v46  ;;  %v7013_v46 = vpack.c.bf16 %v57_v32, %v57_v32 }
  0x51   :  { %5644 = vmatpush3.bf16.msra.mxu1 %v5910_v50  ;;  %v5983_v50 = vld [vmem:[%s8452_s1 + $0x28c] ss:$12 sps:$4 sm:$0xff]  }
  0x52   :  { %5645 = vmatprep.subr.bf16.mxu1 %v5914_v51  ;;  %v5981_v51 = vld [vmem:[%s8452_s1 + $0x288] ss:$12 sps:$4 sm:$0xff]  }
  0x53   :  { %1074 = vmatpush1.bf16.msra.mxu0 %v5903_v48  ;;  %v5979_v48 = vld [vmem:[%s8452_s1 + $0x274] ss:$12 sps:$4 sm:$0xff]  }
  0x54   :  { %1075 = vmatprep.subr.bf16.mxu0 %v5906_v49  ;;  %v5977_v49 = vld [vmem:[%s8452_s1 + $0x270] ss:$12 sps:$4 sm:$0xff]  }
  0x55   :  { %5646 = vmatpush3.bf16.msra.mxu1 %v5915_v54  ;;  %v5989_v54 = vld [vmem:[%s8452_s1 + $0x2bc] ss:$12 sps:$4 sm:$0xff]  }
  0x56   :  { %5647 = vmatprep.subr.bf16.mxu1 %v5919_v55  ;;  %v5987_v55 = vld [vmem:[%s8452_s1 + $0x2b8] ss:$12 sps:$4 sm:$0xff]  }
  0x57   :  { %1076 = vmatpush1.bf16.msra.mxu0 %v5908_v52  ;;  %v5986_v52 = vld [vmem:[%s8452_s1 + $0x2a4] ss:$12 sps:$4 sm:$0xff]  }
  0x58   :  { %1077 = vmatprep.subr.bf16.mxu0 %v5911_v53  ;;  %v5984_v53 = vld [vmem:[%s8452_s1 + $0x2a0] ss:$12 sps:$4 sm:$0xff]  }
  0x59   :  { %5648 = vmatpush3.bf16.msra.mxu1 %v5920_v58  ;;  %v5995_v58 = vld [vmem:[%s8452_s1 + $0x2ec] ss:$12 sps:$4 sm:$0xff]  }
  0x5a   :  { %5649 = vmatprep.subr.bf16.mxu1 %v5924_v59  ;;  %v5993_v59 = vld [vmem:[%s8452_s1 + $0x2e8] ss:$12 sps:$4 sm:$0xff]  }
  0x5b   :  { %1078 = vmatpush1.bf16.msra.mxu0 %v5913_v56  ;;  %v5992_v56 = vld [vmem:[%s8452_s1 + $0x2d4] ss:$12 sps:$4 sm:$0xff]  }
  0x5c   :  { %1079 = vmatprep.subr.bf16.mxu0 %v5916_v57  ;;  %v5990_v57 = vld [vmem:[%s8452_s1 + $0x2d0] ss:$12 sps:$4 sm:$0xff]  }
  0x5d   :  { %5650 = vmatpush3.bf16.msra.mxu1 %v5925_v62  ;;  %v6001_v62 = vld [vmem:[%s8452_s1 + $0x31c] ss:$12 sps:$4 sm:$0xff]  }
  0x5e   :  { %5651 = vmatprep.subr.bf16.mxu1 %v5929_v63  ;;  %v5999_v63 = vld [vmem:[%s8452_s1 + $0x318] ss:$12 sps:$4 sm:$0xff]  }
  0x5f   :  { %1080 = vmatpush1.bf16.msra.mxu0 %v5918_v60  ;;  %v5998_v60 = vld [vmem:[%s8452_s1 + $0x304] ss:$12 sps:$4 sm:$0xff]  }
  0x60   :  { %1081 = vmatprep.subr.bf16.mxu0 %v5921_v61  ;;  %v5996_v61 = vld [vmem:[%s8452_s1 + $0x300] ss:$12 sps:$4 sm:$0xff]  }
  0x61   :  { %5652 = vmatpush3.bf16.msra.mxu1 %v5930_v4  ;;  %v6010_v4 = vld [vmem:[%s8452_s1 + $0x364] ss:$12 sps:$4 sm:$0xff]  }
  0x62   :  { %5653 = vmatprep.subr.bf16.mxu1 %v5934_v5  ;;  %v6008_v5 = vld [vmem:[%s8452_s1 + $0x360] ss:$12 sps:$4 sm:$0xff]  }
  0x63   :  { %1082 = vmatpush1.bf16.msra.mxu0 %v5923_v0  ;;  %v6004_v0 = vld [vmem:[%s8452_s1 + $0x334] ss:$12 sps:$4 sm:$0xff]  }
  0x64   :  { %1092 = vmatprep.subr.bf16.mxu0 %v5928_v2  ;;  %v6007_v2 = vld [vmem:[%s8452_s1 + $0x34c] ss:$12 sps:$4 sm:$0xff]  }
  0x65   :  { %5654 = vmatpush3.bf16.msra.mxu1 %v5935_v8  ;;  %v6016_v8 = vld [vmem:[%s8452_s1 + $0x394] ss:$12 sps:$4 sm:$0xff]  }
  0x66   :  { %1084 = vmatmul.mubr.bf16.vlgmr.msra.gmra.mrb[0].mxu0 %v6817_v41  ;;  %5661 = vmatprep.subr.bf16.mxu1 %v5940_v10  ;;  %v5969_v41 = vld [vmem:[%s8452_s1 + $0x244] ss:$12 sps:$4 sm:$0xff]   ;;  %v6019_v10 = vld [vmem:[%s8452_s1 + $0x3ac] ss:$12 sps:$4 sm:$0xff]  }
  0x67   :  { %1093 = vmatpush1.bf16.msra.mxu0 %v5926_v7  ;;  %1124 = vmatprep.mubr.bf16.mxu0 %v76_v6  ;;  %v6013_v6 = vld [vmem:[%s8452_s1 + $0x37c] ss:$12 sps:$4 sm:$0xff]   ;;  %v6011_v7 = vld [vmem:[%s8452_s1 + $0x378] ss:$12 sps:$4 sm:$0xff]  }
  0x68   :  { %1094 = vmatprep.subr.bf16.mxu0 %v5933_v9  ;;  %1247 = vmatmul.mubr.bf16.vlgmr.msra.gmra.mrb[4].mxu1 %v6917_v12  ;;  %v6014_v9 = vld [vmem:[%s8452_s1 + $0x390] ss:$12 sps:$4 sm:$0xff]  }
  0x69   :  { %5662 = vmatpush3.bf16.msra.mxu1 %v5941_v14  ;;  %1286 = vmatprep.mubr.bf16.mxu1 %v78_v36  ;;  %v6025_v14 = vld [vmem:[%s8452_s1 + $0x3dc] ss:$12 sps:$4 sm:$0xff]  }
  0x6a   :  { %5663 = vmatprep.subr.bf16.mxu1 %v5945_v15  ;;  %v6023_v15 = vld [vmem:[%s8452_s1 + $0x3d8] ss:$12 sps:$4 sm:$0xff]  }
  0x6b   :  { %1095 = vmatpush1.bf16.msra.mxu0 %v5931_v11  ;;  %v6017_v11 = vld [vmem:[%s8452_s1 + $0x3a8] ss:$12 sps:$4 sm:$0xff]  }
  0x6c   :  { %1096 = vmatprep.subr.bf16.mxu0 %v5938_v13  ;;  %v6020_v13 = vld [vmem:[%s8452_s1 + $0x3c0] ss:$12 sps:$4 sm:$0xff]  }
  0x6d   :  { %5664 = vmatpush3.bf16.msra.mxu1 %v5946_v18  ;;  %v6031_v18 = vld [vmem:[%s8452_s1 + $0x40c] ss:$12 sps:$4 sm:$0xff]  }
  0x6e   :  { %5665 = vmatprep.subr.bf16.mxu1 %v5950_v19  ;;  %v6029_v19 = vld [vmem:[%s8452_s1 + $0x408] ss:$12 sps:$4 sm:$0xff]  }
  0x6f   :  { %1097 = vmatpush1.bf16.msra.mxu0 %v5936_v16  ;;  %v6028_v16 = vld [vmem:[%s8452_s1 + $0x3f4] ss:$12 sps:$4 sm:$0xff]  }
  0x70   :  { %1098 = vmatprep.subr.bf16.mxu0 %v5944_v17  ;;  %v6026_v17 = vld [vmem:[%s8452_s1 + $0x3f0] ss:$12 sps:$4 sm:$0xff]  }
  0x71   :  { %5666 = vmatpush3.bf16.msra.mxu1 %v5951_v22  ;;  %v6037_v22 = vld [vmem:[%s8452_s1 + $0x43c] ss:$12 sps:$4 sm:$0xff]  }
  0x72   :  { %5667 = vmatprep.subr.bf16.mxu1 %v5955_v23  ;;  %v6035_v23 = vld [vmem:[%s8452_s1 + $0x438] ss:$12 sps:$4 sm:$0xff]  }
  0x73   :  { %1099 = vmatpush1.bf16.msra.mxu0 %v5942_v20  ;;  %v6034_v20 = vld [vmem:[%s8452_s1 + $0x424] ss:$12 sps:$4 sm:$0xff]  }
  0x74   :  { %1100 = vmatprep.subr.bf16.mxu0 %v5949_v21  ;;  %v6032_v21 = vld [vmem:[%s8452_s1 + $0x420] ss:$12 sps:$4 sm:$0xff]  }
  0x75   :  { %5668 = vmatpush3.bf16.msra.mxu1 %v5956_v26  ;;  %v6043_v26 = vld [vmem:[%s8452_s1 + $0x46c] ss:$12 sps:$4 sm:$0xff]  }
  0x76   :  { %5669 = vmatprep.subr.bf16.mxu1 %v5960_v27  ;;  %v6041_v27 = vld [vmem:[%s8452_s1 + $0x468] ss:$12 sps:$4 sm:$0xff]  }
  0x77   :  { %1101 = vmatpush1.bf16.msra.mxu0 %v5947_v24  ;;  %v6040_v24 = vld [vmem:[%s8452_s1 + $0x454] ss:$12 sps:$4 sm:$0xff]  }
  0x78   :  { %1102 = vmatprep.subr.bf16.mxu0 %v5954_v25  ;;  %v6038_v25 = vld [vmem:[%s8452_s1 + $0x450] ss:$12 sps:$4 sm:$0xff]  }
  0x79   :  { %5670 = vmatpush3.bf16.msra.mxu1 %v5961_v29 }
  0x7a   :  { %5671 = vmatprep.subr.bf16.mxu1 %v5965_v31 }
  0x7b   :  { %1103 = vmatpush1.bf16.msra.mxu0 %v5952_v28 }
  0x7c   :  { %1104 = vmatprep.subr.bf16.mxu0 %v5959_v30 }
  0x7d   :  { %5672 = vmatpush3.bf16.msra.mxu1 %v5966_v35 }
  0x7e   :  { %5673 = vmatprep.subr.bf16.mxu1 %v5970_v38 }
  0x7f   :  { %1105 = vmatpush1.bf16.msra.mxu0 %v5957_v34  ;;  %v7153_v34 = vshrl.u32 %v271_v33, 7  ;;  %v6103_v33 = vld [vmem:[#allocation2 + $0x168] ss:$12 sps:$4 sm:$0xff]  }
  0x80   :  { %1106 = vmatprep.subr.bf16.mxu0 %v5964_v37 }
  0x81   :  { %5674 = vmatpush3.bf16.msra.mxu1 %v5971_v40  ;;  %v7156_v35 = vsub.s32 0, %v7153_v34  ;;  %vm1296_vm0 = vcmp.lt.s32.totalorder %v7153_v34, 2 }
  0x82   :  { %5675 = vmatprep.subr.bf16.mxu1 %v5975_v42 }
  0x83   :  { %1107 = vmatpush1.bf16.msra.mxu0 %v5962_v39 }
  0x84   :  { %1108 = vmatprep.subr.bf16.mxu0 %v5969_v41 }
  0x85   :  { %5676 = vmatpush3.bf16.msra.mxu1 %v5976_v44  ;;  %v6046_v44 = vld [vmem:[#allocation2 + $0x4] ss:$12 sps:$4 sm:$0xff]  }
  0x86   :  { %1958 = vmatprep.subr.bf16.mxu1 %v6046_v44 }
  0x87   :  { %1109 = vmatpush1.bf16.msra.mxu0 %v5967_v43 }
  0x88   :  { %1110 = vmatprep.subr.bf16.mxu0 %v5974_v45  ;;  %1287 = vmatmul.mubr.bf16.vlgmr.msra.gmra.mrb[8].mxu1 %v7013_v46 }
  0x8b   :  { %1111 = vmatpush1.bf16.msra.mxu0 %v5972_v47  ;;  %v6049_v47 = vld [vmem:[#allocation2 + $0x1c] ss:$12 sps:$4 sm:$0xff]  }
  0x8c   :  { %1112 = vmatprep.subr.bf16.mxu0 %v5979_v48  ;;  %v6047_v48 = vld [vmem:[#allocation2 + $0x18] ss:$12 sps:$4 sm:$0xff]  }
  0x8f   :  { %1113 = vmatpush1.bf16.msra.mxu0 %v5977_v49  ;;  %v6052_v49 = vld [vmem:[#allocation2 + $0x34] ss:$12 sps:$4 sm:$0xff]  }
  0x90   :  { %1114 = vmatprep.subr.bf16.mxu0 %v5983_v50  ;;  %v6050_v50 = vld [vmem:[#allocation2 + $0x30] ss:$12 sps:$4 sm:$0xff]  }
  0x93   :  { %1115 = vmatpush1.bf16.msra.mxu0 %v5981_v51  ;;  %v6055_v51 = vld [vmem:[#allocation2 + $0x4c] ss:$12 sps:$4 sm:$0xff]  }
  0x94   :  { %1116 = vmatprep.subr.bf16.mxu0 %v5986_v52  ;;  %v6053_v52 = vld [vmem:[#allocation2 + $0x48] ss:$12 sps:$4 sm:$0xff]  }
  0x97   :  { %1117 = vmatpush1.bf16.msra.mxu0 %v5984_v53  ;;  %v6058_v53 = vld [vmem:[#allocation2 + $0x64] ss:$12 sps:$4 sm:$0xff]  }
  0x98   :  { %1118 = vmatprep.subr.bf16.mxu0 %v5989_v54  ;;  %v6056_v54 = vld [vmem:[#allocation2 + $0x60] ss:$12 sps:$4 sm:$0xff]  }
  0x9b   :  { %1119 = vmatpush1.bf16.msra.mxu0 %v5987_v55  ;;  %v6061_v55 = vld [vmem:[#allocation2 + $0x7c] ss:$12 sps:$4 sm:$0xff]  }
  0x9c   :  { %1120 = vmatprep.subr.bf16.mxu0 %v5992_v56  ;;  %v6059_v56 = vld [vmem:[#allocation2 + $0x78] ss:$12 sps:$4 sm:$0xff]  }
  0x9f   :  { %1121 = vmatpush1.bf16.msra.mxu0 %v5990_v57  ;;  %v6064_v57 = vld [vmem:[#allocation2 + $0x94] ss:$12 sps:$4 sm:$0xff]  }
  0xa0   :  { %1122 = vmatprep.subr.bf16.mxu0 %v5995_v58  ;;  %v6062_v58 = vld [vmem:[#allocation2 + $0x90] ss:$12 sps:$4 sm:$0xff]  }
  0xa3   :  { %1123 = vmatpush1.bf16.msra.mxu0 %v5993_v59  ;;  %v6067_v59 = vld [vmem:[#allocation2 + $0xac] ss:$12 sps:$4 sm:$0xff]  }
  0xa4   :  { %1133 = vmatprep.subr.bf16.mxu0 %v5998_v60 }
  0xa6   :  { %1125 = vmatmul.mubr.bf16.vlgmr.msra.gmra.mrb[0].mxu0 %v6917_v12  ;;  %v6022_v12 = vld [vmem:[%s8452_s1 + $0x3c4] ss:$12 sps:$4 sm:$0xff]  }
  0xa7   :  { %1134 = vmatpush1.bf16.msra.mxu0 %v5996_v61  ;;  %1165 = vmatprep.mubr.bf16.mxu0 %v78_v36  ;;  %v7161_v36 = vld [vmem:[%s8456_s5 + $0x10] sm:$0x3f] }
  0xa8   :  { %1135 = vmatprep.subr.bf16.mxu0 %v6001_v62  ;;  %v282_v37 = vrot.slane %v7161_v36, %v7156_v35  ;;  %v6065_v61 = vld [vmem:[#allocation2 + $0xa8] ss:$12 sps:$4 sm:$0xff]  }
  0xab   :  { %1136 = vmatpush1.bf16.msra.mxu0 %v5999_v63 }
  0xac   :  { %1137 = vmatprep.subr.bf16.mxu0 %v6004_v0 }
  0xaf   :  { %1138 = vmatpush1.bf16.msra.mxu0 %v6002_v1 }
  0xb0   :  { %1139 = vmatprep.subr.bf16.mxu0 %v6007_v2  ;;  %v6070_v2 = vld [vmem:[#allocation2 + $0xc4] ss:$12 sps:$4 sm:$0xff]  }
  0xb3   :  { %1140 = vmatpush1.bf16.msra.mxu0 %v6005_v3 }
  0xb4   :  { %1141 = vmatprep.subr.bf16.mxu0 %v6010_v4  ;;  %v6068_v4 = vld [vmem:[#allocation2 + $0xc0] ss:$12 sps:$4 sm:$0xff]  }
  0xb7   :  { %1142 = vmatpush1.bf16.msra.mxu0 %v6008_v5  ;;  %v6071_v5 = vld [vmem:[#allocation2 + $0xc8] ss:$12 sps:$4 sm:$0xff]  }
  0xb8   :  { %1143 = vmatprep.subr.bf16.mxu0 %v6013_v6  ;;  %v6072_v6 = vld [vmem:[#allocation2 + $0x8] ss:$12 sps:$4 sm:$0xff]  }
  0xbb   :  { %1144 = vmatpush1.bf16.msra.mxu0 %v6011_v7  ;;  %v6075_v7 = vld [vmem:[#allocation2 + $0xdc] ss:$12 sps:$4 sm:$0xff]  }
  0xbc   :  { %1145 = vmatprep.subr.bf16.mxu0 %v6016_v8  ;;  %v6073_v8 = vld [vmem:[#allocation2 + $0xd8] ss:$12 sps:$4 sm:$0xff]  }
  0xbf   :  { %1146 = vmatpush1.bf16.msra.mxu0 %v6014_v9  ;;  %v6076_v9 = vld [vmem:[#allocation2 + $0xe0] ss:$12 sps:$4 sm:$0xff]  }
  0xc0   :  { %1147 = vmatprep.subr.bf16.mxu0 %v6019_v10  ;;  %v6077_v10 = vld [vmem:[#allocation2 + $0x20] ss:$12 sps:$4 sm:$0xff]  }
  0xc3   :  { %1148 = vmatpush1.bf16.msra.mxu0 %v6017_v11  ;;  %v6080_v11 = vld [vmem:[#allocation2 + $0xf4] ss:$12 sps:$4 sm:$0xff]  }
  0xc4   :  { %1149 = vmatprep.subr.bf16.mxu0 %v6022_v12  ;;  %v6078_v12 = vld [vmem:[#allocation2 + $0xf0] ss:$12 sps:$4 sm:$0xff]  }
  0xc7   :  { %1150 = vmatpush1.bf16.msra.mxu0 %v6020_v13  ;;  %v6081_v13 = vld [vmem:[#allocation2 + $0xf8] ss:$12 sps:$4 sm:$0xff]  }
  0xc8   :  { %1151 = vmatprep.subr.bf16.mxu0 %v6025_v14  ;;  %v6082_v14 = vld [vmem:[#allocation2 + $0x38] ss:$12 sps:$4 sm:$0xff]  }
  0xcb   :  { %1152 = vmatpush1.bf16.msra.mxu0 %v6023_v15  ;;  %v6085_v15 = vld [vmem:[#allocation2 + $0x10c] ss:$12 sps:$4 sm:$0xff]  }
  0xcc   :  { %1153 = vmatprep.subr.bf16.mxu0 %v6028_v16  ;;  %v6083_v16 = vld [vmem:[#allocation2 + $0x108] ss:$12 sps:$4 sm:$0xff]  }
  0xcf   :  { %1154 = vmatpush1.bf16.msra.mxu0 %v6026_v17  ;;  %v6086_v17 = vld [vmem:[#allocation2 + $0x110] ss:$12 sps:$4 sm:$0xff]  }
  0xd0   :  { %1155 = vmatprep.subr.bf16.mxu0 %v6031_v18  ;;  %v6087_v18 = vld [vmem:[#allocation2 + $0x50] ss:$12 sps:$4 sm:$0xff]  }
  0xd3   :  { %1156 = vmatpush1.bf16.msra.mxu0 %v6029_v19  ;;  %v6090_v19 = vld [vmem:[#allocation2 + $0x124] ss:$12 sps:$4 sm:$0xff]  }
  0xd4   :  { %1157 = vmatprep.subr.bf16.mxu0 %v6034_v20  ;;  %v6088_v20 = vld [vmem:[#allocation2 + $0x120] ss:$12 sps:$4 sm:$0xff]  }
  0xd7   :  { %1158 = vmatpush1.bf16.msra.mxu0 %v6032_v21  ;;  %v6091_v21 = vld [vmem:[#allocation2 + $0x128] ss:$12 sps:$4 sm:$0xff]  }
  0xd8   :  { %1159 = vmatprep.subr.bf16.mxu0 %v6037_v22  ;;  %v6092_v22 = vld [vmem:[#allocation2 + $0x68] ss:$12 sps:$4 sm:$0xff]  }
  0xdb   :  { %1160 = vmatpush1.bf16.msra.mxu0 %v6035_v23  ;;  %v6095_v23 = vld [vmem:[#allocation2 + $0x13c] ss:$12 sps:$4 sm:$0xff]  }
  0xdc   :  { %1161 = vmatprep.subr.bf16.mxu0 %v6040_v24  ;;  %v6093_v24 = vld [vmem:[#allocation2 + $0x138] ss:$12 sps:$4 sm:$0xff]  }
  0xdf   :  { %1162 = vmatpush1.bf16.msra.mxu0 %v6038_v25  ;;  %v6096_v25 = vld [vmem:[#allocation2 + $0x140] ss:$12 sps:$4 sm:$0xff]  }
  0xe0   :  { %1163 = vmatprep.subr.bf16.mxu0 %v6043_v26  ;;  %v6097_v26 = vld [vmem:[#allocation2 + $0x80] ss:$12 sps:$4 sm:$0xff]  }
  0xe3   :  { %1164 = vmatpush1.bf16.msra.mxu0 %v6041_v27  ;;  %v6100_v27 = vld [vmem:[#allocation2 + $0x154] ss:$12 sps:$4 sm:$0xff]  }
  0xe4   :  { %5683 = vmatprep.subr.bf16.mxu0 %v6071_v5 }
  0xe6   :  { %1166 = vmatmul.mubr.bf16.vlgmr.msra.gmra.mrb[0].mxu0 %v7013_v46  ;;  %v6044_v46 = vld [vmem:[#allocation2] ss:$12 sps:$4 sm:$0xff]  }
  0xe7   :  { %1959 = vmatpush1.bf16.msra.mxu1 %v6044_v46  ;;  %5684 = vmatpush3.bf16.msra.mxu0 %v6072_v6 }
  0xe8   :  { %1960 = vmatprep.subr.bf16.mxu1 %v6049_v47  ;;  %5685 = vmatprep.subr.bf16.mxu0 %v6076_v9 }
  0xeb   :  { %1961 = vmatpush1.bf16.msra.mxu1 %v6047_v48  ;;  %5686 = vmatpush3.bf16.msra.mxu0 %v6077_v10 }
  0xec   :  { %1962 = vmatprep.subr.bf16.mxu1 %v6052_v49  ;;  %5687 = vmatprep.subr.bf16.mxu0 %v6081_v13 }
  0xef   :  { %1963 = vmatpush1.bf16.msra.mxu1 %v6050_v50  ;;  %5688 = vmatpush3.bf16.msra.mxu0 %v6082_v14 }
  0xf0   :  { %1964 = vmatprep.subr.bf16.mxu1 %v6055_v51  ;;  %5689 = vmatprep.subr.bf16.mxu0 %v6086_v17 }
  0xf3   :  { %1965 = vmatpush1.bf16.msra.mxu1 %v6053_v52  ;;  %5690 = vmatpush3.bf16.msra.mxu0 %v6087_v18  ;;  %v7183_v52 = vld [vmem:[%s8456_s5] sm:$0x3f] }
  0xf4   :  { %1966 = vmatprep.subr.bf16.mxu1 %v6058_v53  ;;  %5691 = vmatprep.subr.bf16.mxu0 %v6091_v21  ;;  %v7188_v53 = vld [vmem:[%s8456_s5 + $0x8] sm:$0x3f] }
  0xf7   :  { %1967 = vmatpush1.bf16.msra.mxu1 %v6056_v54  ;;  %5692 = vmatpush3.bf16.msra.mxu0 %v6092_v22 }
  0xf8   :  { %1968 = vmatprep.subr.bf16.mxu1 %v6061_v55  ;;  %5693 = vmatprep.subr.bf16.mxu0 %v6096_v25 }
  0xfb   :  { %1969 = vmatpush1.bf16.msra.mxu1 %v6059_v56  ;;  %5694 = vmatpush3.bf16.msra.mxu0 %v6097_v26  ;;  %v274_v56 = vrot.slane %v7183_v52, %v7156_v35 }
  0xfc   :  { %1970 = vmatprep.subr.bf16.mxu1 %v6064_v57  ;;  %v278_v57 = vrot.slane %v7188_v53, %v7156_v35 }
  0xff   :  { %1971 = vmatpush1.bf16.msra.mxu1 %v6062_v58 }
 0x100   :  { %1972 = vmatprep.subr.bf16.mxu1 %v6067_v59 }
 0x103   :  { %1973 = vmatpush1.bf16.msra.mxu1 %v6065_v61 }
 0x104   :  { %1974 = vmatprep.subr.bf16.mxu1 %v6070_v2 }
 0x107   :  { %1975 = vmatpush1.bf16.msra.mxu1 %v6068_v4 }
 0x108   :  { %1976 = vmatprep.subr.bf16.mxu1 %v6075_v7 }
 0x10b   :  { %1977 = vmatpush1.bf16.msra.mxu1 %v6073_v8 }
 0x10c   :  { %1978 = vmatprep.subr.bf16.mxu1 %v6080_v11 }
 0x10f   :  { %1979 = vmatpush1.bf16.msra.mxu1 %v6078_v12 }
 0x110   :  { %1980 = vmatprep.subr.bf16.mxu1 %v6085_v15 }
 0x113   :  { %1981 = vmatpush1.bf16.msra.mxu1 %v6083_v16 }
 0x114   :  { %1982 = vmatprep.subr.bf16.mxu1 %v6090_v19 }
 0x117   :  { %1983 = vmatpush1.bf16.msra.mxu1 %v6088_v20 }
 0x118   :  { %1984 = vmatprep.subr.bf16.mxu1 %v6095_v23 }
 0x11b   :  { %v5633_v28 = vpop.f32.mrb[0].mxu1  ;;  %1985 = vmatpush1.bf16.msra.mxu1 %v6093_v24 }
 0x11c   :  { %v5634_v29 = vpop.f32.mrb[1].mxu1  ;;  %1986 = vmatprep.subr.bf16.mxu1 %v6100_v27 }
 0x11d   :  { %v5635_v30 = vadd.f32 %v5634_v29, %v5633_v28  ;;  %v5636_v31 = vpop.f32.mrb[2].mxu1  ;;  %v6098_v28 = vld [vmem:[#allocation2 + $0x150] ss:$12 sps:$4 sm:$0xff]   ;;  %v6101_v29 = vld [vmem:[#allocation2 + $0x158] ss:$12 sps:$4 sm:$0xff]  }
 0x11e   :  { %v5637_v32 = vpop.f32.mrb[3].mxu1  ;;  %v6105_v31 = vld [vmem:[#allocation2 + $0x16c] ss:$12 sps:$4 sm:$0xff]   ;;  %5695 = vmatprep.subr.bf16.mxu0 %v6101_v29 }
 0x11f   :  { %v1209_v38 = vadd.f32 %v5635_v30, %v282_v37  ;;  %v6102_v30 = vld [vmem:[#allocation2 + $0x98] ss:$12 sps:$4 sm:$0xff]   ;;  %v6106_v32 = vld [vmem:[#allocation2 + $0x170] ss:$12 sps:$4 sm:$0xff]   ;;  %1987 = vmatpush1.bf16.msra.mxu1 %v6098_v28 }
 0x120   :  { %5696 = vmatpush3.bf16.msra.mxu0 %v6102_v30  ;;  %1988 = vmatprep.subr.bf16.mxu1 %v6105_v31  ;;  %v6107_v37 = vld [vmem:[#allocation2 + $0xb0] ss:$12 sps:$4 sm:$0xff]  }
 0x121   :  { %5697 = vmatprep.subr.bf16.mxu0 %v6106_v32 }
 0x123   :  { %1989 = vmatpush1.bf16.msra.mxu1 %v6103_v33 }
 0x124   :  { %5698 = vmatpush3.bf16.msra.mxu0 %v6107_v37 }
 0x13b   :  { %v5655_v39 = vpop.f32.mrb[4].mxu1 }
 0x13c   :  { %v5656_v40 = vpop.f32.mrb[5].mxu1 }
 0x13d   :  { %v5657_v41 = vadd.f32 %v5656_v40, %v5655_v39  ;;  %v5658_v42 = vpop.f32.mrb[6].mxu1  ;;  %v6628_v39 = vmov 0.0  }
 0x13e   :  { %v5659_v43 = vpop.f32.mrb[7].mxu1  ;;  %v7169_v40 = vsel %vm1296_vm0, 1.0, %v6628_v39 }
 0x13f   :  { %v1249_v45 = vadd.f32 %v5657_v41, %v1209_v38  ;;  %v6110_v38 = vld [vmem:[#allocation2 + $0x184] ss:$12 sps:$4 sm:$0xff]   ;;  %v7172_v41 = vsub.f32 1.0, %v7169_v40 }
 0x140   :  { %1999 = vmatprep.subr.bf16.mxu1 %v6110_v38 }
 0x15b   :  { %v5677_v60 = vpop.f32.mrb[8].mxu1 }
 0x15c   :  { %v5678_v62 = vpop.f32.mrb[9].mxu1 }
 0x15d   :  { %v5679_v63 = vadd.f32 %v5678_v62, %v5677_v60  ;;  %v5680_v0 = vpop.f32.mrb[10].mxu1 }
 0x15e   :  { %v5681_v1 = vpop.f32.mrb[11].mxu1 }
 0x15f   :  { %v7165_v3 = vadd.f32 %v5679_v63, %v1249_v45 }
 0x161   :  { %v1302_v42 = vmul.f32 %v7169_v40, %v7165_v3  ;;  %v1333_v43 = vmul.f32 %v7172_v41, %v7165_v3 }
 0x163   :  { %v1318_v44 = vsel %vm1303_vm1, %v1302_v42, 0.0  ;;  %v1348_v45 = vsel %vm1303_vm1, %v1333_v43, 0.0 }
 0x164   :  { %v1319_v46 = vrot.slane %v1318_v44, 4  ;;  %v1349_v47 = vrot.slane %v1348_v45, 4 }
 0x166   :  { %v1320_v48 = vadd.f32 %v1319_v46, %v1318_v44  ;;  %v1350_v49 = vadd.f32 %v1349_v47, %v1348_v45 }
 0x168   :  { %v1321_v50 = vrot.slane %v1320_v48, 2  ;;  %v1351_v51 = vrot.slane %v1350_v49, 2 }
 0x16a   :  { %v1322_v54 = vadd.f32 %v1321_v50, %v1320_v48  ;;  %v1352_v55 = vadd.f32 %v1351_v51, %v1350_v49 }
 0x16c   :  { %v1323_v58 = vrot.slane %v1322_v54, 1  ;;  %v1353_v59 = vrot.slane %v1352_v55, 1 }
 0x16e   :  { %v1324_v5 = vadd.f32 %v1323_v58, %v1322_v54  ;;  %v1354_v6 = vadd.f32 %v1353_v59, %v1352_v55 }
 0x170   :  { %v1327_v17 = vmul.f32 0.5, %v1324_v5  ;;  %v1357_v18 = vmul.f32 0.5, %v1354_v6 }
 0x172   :  { %v1330_v27 = vmul.f32 %v7169_v40, %v1327_v17  ;;  %v1360_v28 = vmul.f32 %v1357_v18, %v7172_v41 }
 0x174   :  { %v1363_v43 = vadd.f32 %v1360_v28, %v1330_v27 }
 0x176   :  { %v7205_v54 = vsub.f32 %v7165_v3, %v1363_v43 }
 0x1b9   :  { %v1167_v60 = vpop.f32.mrb[0].mxu0 }
 0x1ba   :  { %v5800_v61 = vadd.f32 %v1167_v60, %v274_v56  ;;  %v1169_v62 = vpop.f32.mrb[1].mxu0 }
 0x1bb   :  { %v5801_v63 = vadd.f32 %v1169_v62, %v278_v57  ;;  %v1171_v0 = vpop.f32.mrb[2].mxu0  ;;  %v1369_v62 = vmul.f32 %v7205_v54, %v7205_v54 }
 0x1bc   :  { %v1300_v1 = vmul.f32 %v5800_v61, %v7169_v40  ;;  %v1331_v2 = vmul.f32 %v5800_v61, %v7172_v41  ;;  %v1172_v4 = vpop.f32.mrb[3].mxu0 }
 0x1bd   :  { %v1301_v7 = vmul.f32 %v5801_v63, %v7169_v40  ;;  %v1332_v8 = vmul.f32 %v5801_v63, %v7172_v41  ;;  %v1372_v4 = vmul.f32 %v7169_v40, %v1369_v62  ;;  %v1402_v5 = vmul.f32 %v1369_v62, %v7172_v41 }
 0x1be   :  { %v1304_v9 = vsel %vm1303_vm1, %v1300_v1, 0.0  ;;  %v1334_v10 = vsel %vm1303_vm1, %v1331_v2, 0.0 }
 0x1bf   :  { %v1305_v11 = vrot.slane %v1304_v9, 4  ;;  %v1335_v12 = vrot.slane %v1334_v10, 4  ;;  %v1311_v13 = vsel %vm1303_vm1, %v1301_v7, 0.0  ;;  %v1341_v14 = vsel %vm1303_vm1, %v1332_v8, 0.0 }
 0x1c0   :  { %v1312_v15 = vrot.slane %v1311_v13, 4  ;;  %v1342_v16 = vrot.slane %v1341_v14, 4 }
 0x1c1   :  { %v1306_v19 = vadd.f32 %v1305_v11, %v1304_v9  ;;  %v1336_v20 = vadd.f32 %v1335_v12, %v1334_v10 }
 0x1c2   :  { %v1313_v21 = vadd.f32 %v1312_v15, %v1311_v13  ;;  %v1343_v22 = vadd.f32 %v1342_v16, %v1341_v14  ;;  %v1387_v14 = vsel %vm1303_vm1, %v1372_v4, 0.0  ;;  %v1417_v15 = vsel %vm1303_vm1, %v1402_v5, 0.0 }
 0x1c3   :  { %v1307_v23 = vrot.slane %v1306_v19, 2  ;;  %v1337_v24 = vrot.slane %v1336_v20, 2 }
 0x1c4   :  { %v1314_v25 = vrot.slane %v1313_v21, 2  ;;  %v1344_v26 = vrot.slane %v1343_v22, 2 }
 0x1c5   :  { %v1308_v29 = vadd.f32 %v1307_v23, %v1306_v19  ;;  %v1338_v30 = vadd.f32 %v1337_v24, %v1336_v20  ;;  %v1418_v23 = vrot.slane %v1417_v15, 4 }
 0x1c6   :  { %v1315_v31 = vadd.f32 %v1314_v25, %v1313_v21  ;;  %v1345_v32 = vadd.f32 %v1344_v26, %v1343_v22  ;;  %v1388_v22 = vrot.slane %v1387_v14, 4 }
 0x1c7   :  { %v1309_v33 = vrot.slane %v1308_v29, 1  ;;  %v1339_v37 = vrot.slane %v1338_v30, 1 }
 0x1c8   :  { %v1316_v38 = vrot.slane %v1315_v31, 1  ;;  %v1346_v42 = vrot.slane %v1345_v32, 1 }
 0x1c9   :  { %v1310_v44 = vadd.f32 %v1309_v33, %v1308_v29  ;;  %v1340_v45 = vadd.f32 %v1339_v37, %v1338_v30  ;;  %v1419_v33 = vadd.f32 %v1418_v23, %v1417_v15 }
 0x1ca   :  { %v1317_v46 = vadd.f32 %v1316_v38, %v1315_v31  ;;  %v1347_v47 = vadd.f32 %v1346_v42, %v1345_v32  ;;  %v1389_v32 = vadd.f32 %v1388_v22, %v1387_v14 }
 0x1cb   :  { %v1325_v48 = vmul.f32 0.5, %v1310_v44  ;;  %v1355_v49 = vmul.f32 0.5, %v1340_v45 }
 0x1cc   :  { %v1326_v50 = vmul.f32 0.5, %v1317_v46  ;;  %v1356_v51 = vmul.f32 0.5, %v1347_v47 }
 0x1cd   :  { %v1328_v55 = vmul.f32 %v7169_v40, %v1325_v48  ;;  %v1358_v56 = vmul.f32 %v1355_v49, %v7172_v41  ;;  %v1390_v48 = vrot.slane %v1389_v32, 2  ;;  %v1420_v49 = vrot.slane %v1419_v33, 2 }
 0x1ce   :  { %v1329_v57 = vmul.f32 %v7169_v40, %v1326_v50  ;;  %v1359_v58 = vmul.f32 %v1356_v51, %v7172_v41 }
 0x1cf   :  { %v1361_v59 = vadd.f32 %v1358_v56, %v1328_v55  ;;  %v1391_v62 = vadd.f32 %v1390_v48, %v1389_v32 }
 0x1d0   :  { %v1362_v60 = vadd.f32 %v1359_v58, %v1329_v57 }
 0x1d1   :  { %v7213_v0 = vsub.f32 %v5800_v61, %v1361_v59 }
 0x1d2   :  { %v7215_v1 = vsub.f32 %v5801_v63, %v1362_v60 }
 0x1d3   :  { %v1367_v3 = vmul.f32 %v7213_v0, %v7213_v0 }
 0x1d4   :  { %v1368_v2 = vmul.f32 %v7215_v1, %v7215_v1 }
 0x1d5   :  { %v1370_v6 = vmul.f32 %v7169_v40, %v1367_v3  ;;  %v1400_v7 = vmul.f32 %v1367_v3, %v7172_v41  ;;  %v1421_v3 = vadd.f32 %v1420_v49, %v1419_v33  ;;  %v6113_v33 = vld [vmem:[#allocation2 + $0x19c] ss:$12 sps:$4 sm:$0xff]  }
 0x1d6   :  { %v1371_v8 = vmul.f32 %v7169_v40, %v1368_v2  ;;  %v1401_v61 = vmul.f32 %v1368_v2, %v7172_v41  ;;  %v6125_v49 = vld [vmem:[#allocation2 + $0x1fc] ss:$12 sps:$4 sm:$0xff]  }
 0x1d7   :  { %v1373_v63 = vsel %vm1303_vm1, %v1370_v6, 0.0  ;;  %v1403_v9 = vsel %vm1303_vm1, %v1400_v7, 0.0  ;;  %v1392_v7 = vrot.slane %v1391_v62, 1 }
 0x1d8   :  { %v1374_v10 = vrot.slane %v1373_v63, 4  ;;  %v1404_v11 = vrot.slane %v1403_v9, 4  ;;  %v1380_v12 = vsel %vm1303_vm1, %v1371_v8, 0.0  ;;  %v1410_v13 = vsel %vm1303_vm1, %v1401_v61, 0.0 }
 0x1d9   :  { %v1381_v16 = vrot.slane %v1380_v12, 4  ;;  %v1411_v17 = vrot.slane %v1410_v13, 4  ;;  %v1422_v8 = vrot.slane %v1421_v3, 1  ;;  %v1393_v61 = vadd.f32 %v1392_v7, %v1391_v62  ;;  %v6137_v7 = vld [vmem:[#allocation2 + $0x200] ss:$12 sps:$4 sm:$0xff]  }
 0x1da   :  { %v1375_v18 = vadd.f32 %v1374_v10, %v1373_v63  ;;  %v1405_v19 = vadd.f32 %v1404_v11, %v1403_v9  ;;  %v7238_v9 = vsub.s32 1, %v7153_v34 }
 0x1db   :  { %v1382_v20 = vadd.f32 %v1381_v16, %v1380_v12  ;;  %v1412_v21 = vadd.f32 %v1411_v17, %v1410_v13  ;;  %v1423_v63 = vadd.f32 %v1422_v8, %v1421_v3  ;;  %v1396_v10 = vmul.f32 0.5, %v1393_v61  ;;  %v6132_v3 = vld [vmem:[#allocation2 + $0x188] ss:$12 sps:$4 sm:$0xff]   ;;  %v6138_v8 = vld [vmem:[#allocation2 + $0x218] ss:$12 sps:$4 sm:$0xff]  }
 0x1dc   :  { %v1376_v24 = vrot.slane %v1375_v18, 2  ;;  %v1406_v25 = vrot.slane %v1405_v19, 2  ;;  %v1445_v12 = vrot.slane %v7183_v52, %v7238_v9  ;;  %v7243_v13 = vsub.s32 2, %v7153_v34  ;;  %v6139_v61 = vld [vmem:[#allocation2 + $0x230] ss:$12 sps:$4 sm:$0xff]  }
 0x1dd   :  { %v1383_v26 = vrot.slane %v1382_v20, 2  ;;  %v1413_v27 = vrot.slane %v1412_v21, 2  ;;  %v1426_v11 = vmul.f32 0.5, %v1423_v63  ;;  %v1449_v15 = vrot.slane %v7188_v53, %v7238_v9  ;;  %v6142_v63 = vld [vmem:[%s8454_s3 + $0x4] ss:$24 sps:$4 sm:$0xff]  }
 0x1de   :  { %v1377_v28 = vadd.f32 %v1376_v24, %v1375_v18  ;;  %v1407_v29 = vadd.f32 %v1406_v25, %v1405_v19  ;;  %v1460_v18 = vrot.slane %v7183_v52, %v7243_v13  ;;  %v1399_v19 = vmul.f32 %v7169_v40, %v1396_v10  ;;  %v6140_v10 = vld [vmem:[%s8454_s3] ss:$24 sps:$4 sm:$0xff]   ;;  %3215 = vmatprep.subr.bf16.mxu0 %v6142_v63 }
 0x1df   :  { %v1384_v30 = vadd.f32 %v1383_v26, %v1382_v20  ;;  %v1414_v31 = vadd.f32 %v1413_v27, %v1412_v21  ;;  %v1429_v20 = vmul.f32 %v1426_v11, %v7172_v41  ;;  %v1464_v22 = vrot.slane %v7188_v53, %v7243_v13  ;;  %v6145_v11 = vld [vmem:[%s8454_s3 + $0xc] ss:$24 sps:$4 sm:$0xff]   ;;  %v6221_v63 = vld [vmem:[%s8454_s3 + $0x278] ss:$24 sps:$4 sm:$0xff]  }
 0x1e0   :  { %v1378_v37 = vrot.slane %v1377_v28, 1  ;;  %v1408_v38 = vrot.slane %v1407_v29, 1 }
 0x1e1   :  { %v1385_v42 = vrot.slane %v1384_v30, 1  ;;  %v1415_v43 = vrot.slane %v1414_v31, 1  ;;  %v1432_v26 = vadd.f32 %v1429_v20, %v1399_v19  ;;  %v6157_v19 = vld [vmem:[%s8454_s3 + $0x6c] ss:$24 sps:$4 sm:$0xff]   ;;  %v6155_v20 = vld [vmem:[%s8454_s3 + $0x68] ss:$24 sps:$4 sm:$0xff]  }
 0x1e2   :  { %v1379_v44 = vadd.f32 %v1378_v37, %v1377_v28  ;;  %v1409_v45 = vadd.f32 %v1408_v38, %v1407_v29  ;;  %v6629_v37 = vmov 0   ;;  %v6116_v38 = vld [vmem:[#allocation2 + $0x1b4] ss:$12 sps:$4 sm:$0xff]  }
 0x1e3   :  { %v1386_v46 = vadd.f32 %v1385_v42, %v1384_v30  ;;  %v1416_v47 = vadd.f32 %v1415_v43, %v1414_v31  ;;  %v6108_v31 = vld [vmem:[#allocation2 + $0x180] ss:$12 sps:$4 sm:$0xff]   ;;  %v6114_v42 = vld [vmem:[#allocation2 + $0x1b0] ss:$12 sps:$4 sm:$0xff]  }
 0x1e4   :  { %v1394_v50 = vmul.f32 0.5, %v1379_v44  ;;  %v1424_v51 = vmul.f32 0.5, %v1409_v45  ;;  %v6119_v43 = vld [vmem:[#allocation2 + $0x1cc] ss:$12 sps:$4 sm:$0xff]   ;;  %v6117_v44 = vld [vmem:[#allocation2 + $0x1c8] ss:$12 sps:$4 sm:$0xff]  }
 0x1e5   :  { %v1395_v55 = vmul.f32 0.5, %v1386_v46  ;;  %v1425_v56 = vmul.f32 0.5, %v1416_v47  ;;  %v6122_v45 = vld [vmem:[#allocation2 + $0x1e4] ss:$12 sps:$4 sm:$0xff]   ;;  %v6120_v47 = vld [vmem:[#allocation2 + $0x1e0] ss:$12 sps:$4 sm:$0xff]  }
 0x1e6   :  { %v1397_v57 = vmul.f32 %v7169_v40, %v1394_v50  ;;  %v1427_v58 = vmul.f32 %v1424_v51, %v7172_v41  ;;  %v1453_v50 = vrot.slane %v7161_v36, %v7238_v9  ;;  %v6123_v51 = vld [vmem:[#allocation2 + $0x1f8] ss:$12 sps:$4 sm:$0xff]  }
 0x1e7   :  { %v1398_v59 = vmul.f32 %v7169_v40, %v1395_v55  ;;  %v1428_v60 = vmul.f32 %v1425_v56, %v7172_v41  ;;  %v6128_v55 = vld [vmem:[#allocation2 + $0x214] ss:$12 sps:$4 sm:$0xff]  }
 0x1e8   :  { %v1430_v2 = vadd.f32 %v1427_v58, %v1397_v57  ;;  %v1468_v57 = vrot.slane %v7161_v36, %v7243_v13  ;;  %v6126_v58 = vld [vmem:[#allocation2 + $0x210] ss:$12 sps:$4 sm:$0xff]   ;;  %v6134_v36 = vld [vmem:[#allocation2 + $0x1b8] ss:$12 sps:$4 sm:$0xff]  }
 0x1e9   :  { %v1431_v4 = vadd.f32 %v1428_v60, %v1398_v59  ;;  %v6131_v59 = vld [vmem:[#allocation2 + $0x22c] ss:$12 sps:$4 sm:$0xff]  }
 0x1ea   :  { %v1433_v5 = vadd.f32 1e-05, %v1430_v2 }
 0x1eb   :  { %v1434_v6 = vadd.f32 1e-05, %v1431_v4  ;;  %v6133_v4 = vld [vmem:[#allocation2 + $0x1a0] ss:$12 sps:$4 sm:$0xff]  }
 0x1ec   :  { %6548 = vrsqrt.f32 %v1433_v5  ;;  %v6135_v5 = vld [vmem:[#allocation2 + $0x1d0] ss:$12 sps:$4 sm:$0xff]  }
 0x1ed   :  { %6550 = vrsqrt.f32 %v1434_v6  ;;  %v6136_v6 = vld [vmem:[#allocation2 + $0x1e8] ss:$12 sps:$4 sm:$0xff]  }
 0x1f6   :  { %v6549_v14 = vpop.eup %6548 }
 0x1f7   :  { %v6551_v16 = vpop.eup %6550  ;;  %v1439_v17 = vmul.f32 %v6549_v14, %v7213_v0  ;;  %v1435_v0 = vadd.f32 1e-05, %v1432_v26  ;;  %v6146_v14 = vld [vmem:[%s8454_s3 + $0x30] ss:$24 sps:$4 sm:$0xff]   ;;  %v6164_v26 = vld [vmem:[%s8454_s3 + $0xc0] ss:$24 sps:$4 sm:$0xff]  }
 0x1f8   :  { %v1440_v21 = vmul.f32 %v6551_v16, %v7215_v1  ;;  %v6111_v1 = vld [vmem:[#allocation2 + $0x198] ss:$12 sps:$4 sm:$0xff]  }
 0x1f9   :  { %v1454_v23 = vmul.f32 %v1445_v12, %v1439_v17  ;;  %6552 = vrsqrt.f32 %v1435_v0  ;;  %v6143_v12 = vld [vmem:[%s8454_s3 + $0x8] ss:$24 sps:$4 sm:$0xff]   ;;  %v6149_v16 = vld [vmem:[%s8454_s3 + $0x38] ss:$24 sps:$4 sm:$0xff]   ;;  %v6154_v17 = vld [vmem:[%s8454_s3 + $0x64] ss:$24 sps:$4 sm:$0xff]  }
 0x1fa   :  { %v1455_v24 = vmul.f32 %v1449_v15, %v1440_v21  ;;  %v6151_v15 = vld [vmem:[%s8454_s3 + $0x3c] ss:$24 sps:$4 sm:$0xff]   ;;  %v6170_v0 = vld [vmem:[%s8454_s3 + $0xf0] ss:$24 sps:$4 sm:$0xff]  }
 0x1fb   :  { %v1469_v25 = vadd.f32 %v1460_v18, %v1454_v23  ;;  %v6152_v18 = vld [vmem:[%s8454_s3 + $0x60] ss:$24 sps:$4 sm:$0xff]   ;;  %v6160_v21 = vld [vmem:[%s8454_s3 + $0x94] ss:$24 sps:$4 sm:$0xff]  }
 0x1fc   :  { %v1470_v27 = vadd.f32 %v1464_v22, %v1455_v24  ;;  %v6158_v22 = vld [vmem:[%s8454_s3 + $0x90] ss:$24 sps:$4 sm:$0xff]   ;;  %v6163_v23 = vld [vmem:[%s8454_s3 + $0x9c] ss:$24 sps:$4 sm:$0xff]  }
 0x1fd   :  { %v1472_v28 = vmax.f32 %v1469_v25, 0.0  ;;  %v6161_v24 = vld [vmem:[%s8454_s3 + $0x98] ss:$24 sps:$4 sm:$0xff]   ;;  %v6166_v25 = vld [vmem:[%s8454_s3 + $0xc4] ss:$24 sps:$4 sm:$0xff]  }
 0x1fe   :  { %v1473_v29 = vmax.f32 %v1470_v27, 0.0  ;;  %v6169_v27 = vld [vmem:[%s8454_s3 + $0xcc] ss:$24 sps:$4 sm:$0xff]  }
 0x1ff   :  { %v1475_v32 = vpack.c.bf16 %v1472_v28, %v1472_v28  ;;  %v6167_v28 = vld [vmem:[%s8454_s3 + $0xc8] ss:$24 sps:$4 sm:$0xff]  }
 0x200   :  { %v1476_v30 = vpack.c.bf16 %v1473_v29, %v1473_v29  ;;  %v6172_v29 = vld [vmem:[%s8454_s3 + $0xf4] ss:$24 sps:$4 sm:$0xff]  }
 0x202   :  { %1990 = vmatprep.mubr.bf16.mxu1 %v1476_v30  ;;  %2072 = vmatprep.mubr.bf16.mxu0 %v1476_v30  ;;  %v6175_v30 = vld [vmem:[%s8454_s3 + $0xfc] ss:$24 sps:$4 sm:$0xff]  }
 0x203   :  { %1991 = vmatmul.mubr.bf16.vlgmr.msra.gmra.mrb[12].mxu1 %v1475_v32  ;;  %2073 = vmatmul.mubr.bf16.vlgmr.msra.gmra.mrb[4].mxu0 %v1475_v32  ;;  %v6553_v46 = vpop.eup %6552  ;;  %v6178_v32 = vld [vmem:[%s8454_s3 + $0x124] ss:$24 sps:$4 sm:$0xff]  }
 0x204   :  { %2000 = vmatpush1.bf16.msra.mxu1 %v6108_v31  ;;  %2031 = vmatprep.mubr.bf16.mxu1 %v6629_v37  ;;  %v1441_v48 = vmul.f32 %v6553_v46, %v7205_v54  ;;  %v6129_v54 = vld [vmem:[#allocation2 + $0x228] ss:$12 sps:$4 sm:$0xff]   ;;  %v6173_v31 = vld [vmem:[%s8454_s3 + $0xf8] ss:$24 sps:$4 sm:$0xff]   ;;  %v6190_v46 = vld [vmem:[%s8454_s3 + $0x184] ss:$24 sps:$4 sm:$0xff]  }
 0x205   :  { %2001 = vmatprep.subr.bf16.mxu1 %v6113_v33  ;;  %3216 = vmatpush1.bf16.msra.mxu0 %v6140_v10  ;;  %v6176_v33 = vld [vmem:[%s8454_s3 + $0x120] ss:$24 sps:$4 sm:$0xff]   ;;  %v6226_v10 = vld [vmem:[%s8454_s3 + $0x2a4] ss:$24 sps:$4 sm:$0xff]  }
 0x206   :  { %v1456_v56 = vmul.f32 %v1453_v50, %v1441_v48  ;;  %v6193_v48 = vld [vmem:[%s8454_s3 + $0x18c] ss:$24 sps:$4 sm:$0xff]  }
 0x207   :  { %v6196_v50 = vld [vmem:[%s8454_s3 + $0x1b4] ss:$24 sps:$4 sm:$0xff]  }
 0x208   :  { %2002 = vmatpush1.bf16.msra.mxu1 %v6111_v1  ;;  %v1471_v60 = vadd.f32 %v1468_v57, %v1456_v56  ;;  %v6181_v1 = vld [vmem:[%s8454_s3 + $0x12c] ss:$24 sps:$4 sm:$0xff]   ;;  %v6197_v56 = vld [vmem:[%s8454_s3 + $0x1b8] ss:$24 sps:$4 sm:$0xff]  }
 0x209   :  { %2003 = vmatprep.subr.bf16.mxu1 %v6116_v38  ;;  %v6179_v38 = vld [vmem:[%s8454_s3 + $0x128] ss:$24 sps:$4 sm:$0xff]   ;;  %v6202_v57 = vld [vmem:[%s8454_s3 + $0x1e4] ss:$24 sps:$4 sm:$0xff]  }
 0x20a   :  { %v1474_v62 = vmax.f32 %v1471_v60, 0.0  ;;  %v6203_v60 = vld [vmem:[%s8454_s3 + $0x1e8] ss:$24 sps:$4 sm:$0xff]  }
 0x20c   :  { %2004 = vmatpush1.bf16.msra.mxu1 %v6114_v42  ;;  %v1477_v2 = vpack.c.bf16 %v1474_v62, %v1474_v62  ;;  %v6184_v42 = vld [vmem:[%s8454_s3 + $0x154] ss:$24 sps:$4 sm:$0xff]   ;;  %v6206_v62 = vld [vmem:[%s8454_s3 + $0x210] ss:$24 sps:$4 sm:$0xff]  }
 0x20d   :  { %2005 = vmatprep.subr.bf16.mxu1 %v6119_v43  ;;  %v6182_v43 = vld [vmem:[%s8454_s3 + $0x150] ss:$24 sps:$4 sm:$0xff]  }
 0x210   :  { %2006 = vmatpush1.bf16.msra.mxu1 %v6117_v44  ;;  %v6187_v44 = vld [vmem:[%s8454_s3 + $0x15c] ss:$24 sps:$4 sm:$0xff]  }
 0x211   :  { %2007 = vmatprep.subr.bf16.mxu1 %v6122_v45  ;;  %v6185_v45 = vld [vmem:[%s8454_s3 + $0x158] ss:$24 sps:$4 sm:$0xff]  }
 0x214   :  { %2008 = vmatpush1.bf16.msra.mxu1 %v6120_v47  ;;  %v6188_v47 = vld [vmem:[%s8454_s3 + $0x180] ss:$24 sps:$4 sm:$0xff]  }
 0x215   :  { %2009 = vmatprep.subr.bf16.mxu1 %v6125_v49  ;;  %v6191_v49 = vld [vmem:[%s8454_s3 + $0x188] ss:$24 sps:$4 sm:$0xff]  }
 0x218   :  { %2010 = vmatpush1.bf16.msra.mxu1 %v6123_v51  ;;  %v6194_v51 = vld [vmem:[%s8454_s3 + $0x1b0] ss:$24 sps:$4 sm:$0xff]  }
 0x219   :  { %2011 = vmatprep.subr.bf16.mxu1 %v6128_v55  ;;  %v6199_v55 = vld [vmem:[%s8454_s3 + $0x1bc] ss:$24 sps:$4 sm:$0xff]  }
 0x21c   :  { %2012 = vmatpush1.bf16.msra.mxu1 %v6126_v58  ;;  %v6200_v58 = vld [vmem:[%s8454_s3 + $0x1e0] ss:$24 sps:$4 sm:$0xff]  }
 0x21d   :  { %2013 = vmatprep.subr.bf16.mxu1 %v6131_v59  ;;  %v6205_v59 = vld [vmem:[%s8454_s3 + $0x1ec] ss:$24 sps:$4 sm:$0xff]  }
 0x220   :  { %2014 = vmatpush1.bf16.msra.mxu1 %v6129_v54  ;;  %v6208_v54 = vld [vmem:[%s8454_s3 + $0x214] ss:$24 sps:$4 sm:$0xff]  }
 0x221   :  { %5780 = vmatprep.subr.bf16.mxu1 %v6628_v39 }
 0x223   :  { %2032 = vmatmul.mubr.bf16.vlgmr.msra.gmra.mrb[12].mxu1 %v1477_v2 }
 0x224   :  { %5781 = vmatpush3.bf16.msra.mxu1 %v6132_v3  ;;  %5796 = vmatprep.mubr.msk.bf16.mxu1 %vm6630_vm2, %v6628_v39  ;;  %v6211_v3 = vld [vmem:[%s8454_s3 + $0x21c] ss:$24 sps:$4 sm:$0xff]  }
 0x225   :  { %5782 = vmatprep.subr.bf16.mxu1 %v6628_v39 }
 0x228   :  { %5783 = vmatpush3.bf16.msra.mxu1 %v6133_v4  ;;  %v6214_v4 = vld [vmem:[%s8454_s3 + $0x244] ss:$24 sps:$4 sm:$0xff]  }
 0x229   :  { %5784 = vmatprep.subr.bf16.mxu1 %v6628_v39 }
 0x22c   :  { %5785 = vmatpush3.bf16.msra.mxu1 %v6134_v36  ;;  %v6212_v36 = vld [vmem:[%s8454_s3 + $0x240] ss:$24 sps:$4 sm:$0xff]  }
 0x22d   :  { %5786 = vmatprep.subr.bf16.mxu1 %v6628_v39 }
 0x230   :  { %5787 = vmatpush3.bf16.msra.mxu1 %v6135_v5  ;;  %v6217_v5 = vld [vmem:[%s8454_s3 + $0x24c] ss:$24 sps:$4 sm:$0xff]  }
 0x231   :  { %5788 = vmatprep.subr.bf16.mxu1 %v6628_v39 }
 0x234   :  { %5789 = vmatpush3.bf16.msra.mxu1 %v6136_v6  ;;  %v6215_v6 = vld [vmem:[%s8454_s3 + $0x248] ss:$24 sps:$4 sm:$0xff]  }
 0x235   :  { %5790 = vmatprep.subr.bf16.mxu1 %v6628_v39 }
 0x238   :  { %5791 = vmatpush3.bf16.msra.mxu1 %v6137_v7  ;;  %v6220_v7 = vld [vmem:[%s8454_s3 + $0x274] ss:$24 sps:$4 sm:$0xff]  }
 0x239   :  { %5792 = vmatprep.subr.bf16.mxu1 %v6628_v39 }
 0x23c   :  { %5793 = vmatpush3.bf16.msra.mxu1 %v6138_v8  ;;  %v6218_v8 = vld [vmem:[%s8454_s3 + $0x270] ss:$24 sps:$4 sm:$0xff]  }
 0x23d   :  { %5794 = vmatprep.subr.bf16.mxu1 %v6628_v39  ;;  %v6148_v39 = vld [vmem:[%s8454_s3 + $0x34] ss:$24 sps:$4 sm:$0xff]  }
 0x23e   :  { %3217 = vmatprep.subr.bf16.mxu0 %v6148_v39  ;;  %v6227_v39 = vld [vmem:[%s8454_s3 + $0x2a8] ss:$24 sps:$4 sm:$0xff]  }
 0x23f   :  { %3218 = vmatpush1.bf16.msra.mxu0 %v6146_v14  ;;  %v6232_v14 = vld [vmem:[%s8454_s3 + $0x2d4] ss:$24 sps:$4 sm:$0xff]  }
 0x240   :  { %5795 = vmatpush3.bf16.msra.mxu1 %v6139_v61  ;;  %3219 = vmatprep.subr.bf16.mxu0 %v6154_v17  ;;  %v6223_v61 = vld [vmem:[%s8454_s3 + $0x27c] ss:$24 sps:$4 sm:$0xff]   ;;  %v6233_v17 = vld [vmem:[%s8454_s3 + $0x2d8] ss:$24 sps:$4 sm:$0xff]  }
 0x241   :  { %3297 = vmatprep.subr.bf16.mxu1 %v6145_v11  ;;  %v6224_v11 = vld [vmem:[%s8454_s3 + $0x2a0] ss:$24 sps:$4 sm:$0xff]  }
 0x243   :  { %5797 = vmatmul.mubr.bf16.vlgmr.msra.gmra.mrb[16].mxu1 %v1477_v2  ;;  %3220 = vmatpush1.bf16.msra.mxu0 %v6152_v18  ;;  %v6209_v2 = vld [vmem:[%s8454_s3 + $0x218] ss:$24 sps:$4 sm:$0xff]   ;;  %v6238_v18 = vld [vmem:[%s8454_s3 + $0x304] ss:$24 sps:$4 sm:$0xff]  }
 0x244   :  { %3298 = vmatpush1.bf16.msra.mxu1 %v6143_v12  ;;  %3221 = vmatprep.subr.bf16.mxu0 %v6160_v21  ;;  %v6229_v12 = vld [vmem:[%s8454_s3 + $0x2ac] ss:$24 sps:$4 sm:$0xff]  }
 0x245   :  { %3299 = vmatprep.subr.bf16.mxu1 %v6151_v15  ;;  %v6230_v15 = vld [vmem:[%s8454_s3 + $0x2d0] ss:$24 sps:$4 sm:$0xff]  }
 0x247   :  { %3222 = vmatpush1.bf16.msra.mxu0 %v6158_v22 }
 0x248   :  { %3300 = vmatpush1.bf16.msra.mxu1 %v6149_v16  ;;  %3223 = vmatprep.subr.bf16.mxu0 %v6166_v25  ;;  %v6235_v16 = vld [vmem:[%s8454_s3 + $0x2dc] ss:$24 sps:$4 sm:$0xff]  }
 0x249   :  { %3301 = vmatprep.subr.bf16.mxu1 %v6157_v19  ;;  %v6241_v19 = vld [vmem:[%s8454_s3 + $0x30c] ss:$24 sps:$4 sm:$0xff]  }
 0x24b   :  { %3224 = vmatpush1.bf16.msra.mxu0 %v6164_v26 }
 0x24c   :  { %3302 = vmatpush1.bf16.msra.mxu1 %v6155_v20  ;;  %3225 = vmatprep.subr.bf16.mxu0 %v6172_v29 }
 0x24d   :  { %3303 = vmatprep.subr.bf16.mxu1 %v6163_v23 }
 0x24f   :  { %3226 = vmatpush1.bf16.msra.mxu0 %v6170_v0 }
 0x250   :  { %3304 = vmatpush1.bf16.msra.mxu1 %v6161_v24  ;;  %3227 = vmatprep.subr.bf16.mxu0 %v6178_v32 }
 0x251   :  { %3305 = vmatprep.subr.bf16.mxu1 %v6169_v27 }
 0x253   :  { %3228 = vmatpush1.bf16.msra.mxu0 %v6176_v33 }
 0x254   :  { %3306 = vmatpush1.bf16.msra.mxu1 %v6167_v28  ;;  %3229 = vmatprep.subr.bf16.mxu0 %v6184_v42 }
 0x255   :  { %3307 = vmatprep.subr.bf16.mxu1 %v6175_v30 }
 0x257   :  { %3230 = vmatpush1.bf16.msra.mxu0 %v6182_v43 }
 0x258   :  { %3308 = vmatpush1.bf16.msra.mxu1 %v6173_v31  ;;  %3231 = vmatprep.subr.bf16.mxu0 %v6190_v46 }
 0x259   :  { %3309 = vmatprep.subr.bf16.mxu1 %v6181_v1 }
 0x25b   :  { %3232 = vmatpush1.bf16.msra.mxu0 %v6188_v47 }
 0x25c   :  { %3310 = vmatpush1.bf16.msra.mxu1 %v6179_v38  ;;  %3233 = vmatprep.subr.bf16.mxu0 %v6196_v50 }
 0x25d   :  { %3311 = vmatprep.subr.bf16.mxu1 %v6187_v44 }
 0x25f   :  { %3234 = vmatpush1.bf16.msra.mxu0 %v6194_v51 }
 0x260   :  { %3312 = vmatpush1.bf16.msra.mxu1 %v6185_v45  ;;  %3235 = vmatprep.subr.bf16.mxu0 %v6202_v57 }
 0x261   :  { %3313 = vmatprep.subr.bf16.mxu1 %v6193_v48 }
 0x263   :  { %3236 = vmatpush1.bf16.msra.mxu0 %v6200_v58 }
 0x264   :  { %3314 = vmatpush1.bf16.msra.mxu1 %v6191_v49  ;;  %3237 = vmatprep.subr.bf16.mxu0 %v6208_v54 }
 0x265   :  { %3315 = vmatprep.subr.bf16.mxu1 %v6199_v55 }
 0x267   :  { %3238 = vmatpush1.bf16.msra.mxu0 %v6206_v62 }
 0x268   :  { %3316 = vmatpush1.bf16.msra.mxu1 %v6197_v56  ;;  %3239 = vmatprep.subr.bf16.mxu0 %v6214_v4 }
 0x269   :  { %3317 = vmatprep.subr.bf16.mxu1 %v6205_v59 }
 0x26b   :  { %3240 = vmatpush1.bf16.msra.mxu0 %v6212_v36 }
 0x26c   :  { %3318 = vmatpush1.bf16.msra.mxu1 %v6203_v60  ;;  %3241 = vmatprep.subr.bf16.mxu0 %v6220_v7 }
 0x26d   :  { %3319 = vmatprep.subr.bf16.mxu1 %v6211_v3 }
 0x26f   :  { %3242 = vmatpush1.bf16.msra.mxu0 %v6218_v8 }
 0x270   :  { %3320 = vmatpush1.bf16.msra.mxu1 %v6209_v2  ;;  %3243 = vmatprep.subr.bf16.mxu0 %v6226_v10 }
 0x271   :  { %3321 = vmatprep.subr.bf16.mxu1 %v6217_v5 }
 0x273   :  { %3244 = vmatpush1.bf16.msra.mxu0 %v6224_v11 }
 0x274   :  { %3322 = vmatpush1.bf16.msra.mxu1 %v6215_v6  ;;  %3245 = vmatprep.subr.bf16.mxu0 %v6232_v14 }
 0x275   :  { %3323 = vmatprep.subr.bf16.mxu1 %v6223_v61 }
 0x277   :  { %3246 = vmatpush1.bf16.msra.mxu0 %v6230_v15 }
 0x278   :  { %3324 = vmatpush1.bf16.msra.mxu1 %v6221_v63  ;;  %3256 = vmatprep.subr.bf16.mxu0 %v6238_v18 }
 0x279   :  { %3325 = vmatprep.subr.bf16.mxu1 %v6229_v12 }
 0x27c   :  { %3326 = vmatpush1.bf16.msra.mxu1 %v6227_v39 }
 0x27d   :  { %3327 = vmatprep.subr.bf16.mxu1 %v6235_v16 }
 0x280   :  { %3328 = vmatpush1.bf16.msra.mxu1 %v6233_v17 }
 0x281   :  { %3338 = vmatprep.subr.bf16.mxu1 %v6241_v19 }
 0x2d6   :  { %v5699_v20 = vpop.f32.mrb[4].mxu0 }
 0x2d7   :  { %v5700_v21 = vpop.f32.mrb[5].mxu0 }
 0x2d8   :  { %v7468_v22 = vadd.f32 %v5700_v21, %v5699_v20  ;;  %v5702_v23 = vpop.f32.mrb[6].mxu0 }
 0x2d9   :  { %v5703_v24 = vpop.f32.mrb[7].mxu0 }
 0x2f6   :  { %v2033_v25 = vpop.f32.mrb[12].mxu1 }
 0x2f7   :  { %v2120_v26 = vmul.f32 %v7169_v40, %v2033_v25  ;;  %v2150_v27 = vmul.f32 %v2033_v25, %v7172_v41  ;;  %v2035_v28 = vpop.f32.mrb[13].mxu1 }
 0x2f8   :  { %v2121_v29 = vmul.f32 %v7169_v40, %v2035_v28  ;;  %v2151_v0 = vmul.f32 %v2035_v28, %v7172_v41  ;;  %v2037_v30 = vpop.f32.mrb[14].mxu1 }
 0x2f9   :  { %v2123_v31 = vsel %vm1303_vm1, %v2120_v26, 0.0  ;;  %v2153_v32 = vsel %vm1303_vm1, %v2150_v27, 0.0  ;;  %v2038_v33 = vpop.f32.mrb[15].mxu1 }
 0x2fa   :  { %v2124_v1 = vrot.slane %v2123_v31, 4  ;;  %v2154_v38 = vrot.slane %v2153_v32, 4  ;;  %v2130_v42 = vsel %vm1303_vm1, %v2121_v29, 0.0  ;;  %v2160_v43 = vsel %vm1303_vm1, %v2151_v0, 0.0 }
 0x2fb   :  { %v2131_v44 = vrot.slane %v2130_v42, 4  ;;  %v2161_v45 = vrot.slane %v2160_v43, 4 }
 0x2fc   :  { %v2125_v46 = vadd.f32 %v2124_v1, %v2123_v31  ;;  %v2155_v47 = vadd.f32 %v2154_v38, %v2153_v32 }
 0x2fd   :  { %v2132_v48 = vadd.f32 %v2131_v44, %v2130_v42  ;;  %v2162_v49 = vadd.f32 %v2161_v45, %v2160_v43 }
 0x2fe   :  { %v2126_v50 = vrot.slane %v2125_v46, 2  ;;  %v2156_v51 = vrot.slane %v2155_v47, 2 }
 0x2ff   :  { %v2133_v55 = vrot.slane %v2132_v48, 2  ;;  %v2163_v56 = vrot.slane %v2162_v49, 2 }
 0x300   :  { %v2127_v57 = vadd.f32 %v2126_v50, %v2125_v46  ;;  %v2157_v58 = vadd.f32 %v2156_v51, %v2155_v47 }
 0x301   :  { %v2134_v59 = vadd.f32 %v2133_v55, %v2132_v48  ;;  %v2164_v60 = vadd.f32 %v2163_v56, %v2162_v49 }
 0x302   :  { %v2128_v54 = vrot.slane %v2127_v57, 1  ;;  %v2158_v62 = vrot.slane %v2157_v58, 1 }
 0x303   :  { %v2135_v3 = vrot.slane %v2134_v59, 1  ;;  %v2165_v2 = vrot.slane %v2164_v60, 1 }
 0x304   :  { %v2129_v4 = vadd.f32 %v2128_v54, %v2127_v57  ;;  %v2159_v36 = vadd.f32 %v2158_v62, %v2157_v58 }
 0x305   :  { %v2136_v5 = vadd.f32 %v2135_v3, %v2134_v59  ;;  %v2166_v6 = vadd.f32 %v2165_v2, %v2164_v60 }
 0x306   :  { %v2144_v7 = vmul.f32 0.5, %v2129_v4  ;;  %v2174_v8 = vmul.f32 0.5, %v2159_v36 }
 0x307   :  { %v2145_v61 = vmul.f32 0.5, %v2136_v5  ;;  %v2175_v63 = vmul.f32 0.5, %v2166_v6 }
 0x308   :  { %v2147_v10 = vmul.f32 %v7169_v40, %v2144_v7  ;;  %v2177_v11 = vmul.f32 %v2174_v8, %v7172_v41 }
 0x309   :  { %v2148_v12 = vmul.f32 %v7169_v40, %v2145_v61  ;;  %v2178_v39 = vmul.f32 %v2175_v63, %v7172_v41 }
 0x30a   :  { %v2180_v14 = vadd.f32 %v2177_v11, %v2147_v10 }
 0x30b   :  { %v2181_v15 = vadd.f32 %v2178_v39, %v2148_v12 }
 0x30c   :  { %v7482_v16 = vsub.f32 %v2033_v25, %v2180_v14 }
 0x30d   :  { %v7484_v17 = vsub.f32 %v2035_v28, %v2181_v15 }
 0x30e   :  { %v2186_v18 = vmul.f32 %v7482_v16, %v7482_v16 }
 0x30f   :  { %v2187_v19 = vmul.f32 %v7484_v17, %v7484_v17 }
 0x310   :  { %v2189_v20 = vmul.f32 %v7169_v40, %v2186_v18  ;;  %v2219_v21 = vmul.f32 %v2186_v18, %v7172_v41 }
 0x311   :  { %v2190_v23 = vmul.f32 %v7169_v40, %v2187_v19  ;;  %v2220_v24 = vmul.f32 %v2187_v19, %v7172_v41 }
 0x312   :  { %v2192_v26 = vsel %vm1303_vm1, %v2189_v20, 0.0  ;;  %v2222_v25 = vsel %vm1303_vm1, %v2219_v21, 0.0 }
 0x313   :  { %v2193_v27 = vrot.slane %v2192_v26, 4  ;;  %v2223_v28 = vrot.slane %v2222_v25, 4  ;;  %v2199_v29 = vsel %vm1303_vm1, %v2190_v23, 0.0  ;;  %v2229_v0 = vsel %vm1303_vm1, %v2220_v24, 0.0 }
 0x314   :  { %v2200_v30 = vrot.slane %v2199_v29, 4  ;;  %v2230_v31 = vrot.slane %v2229_v0, 4 }
 0x315   :  { %v2194_v32 = vadd.f32 %v2193_v27, %v2192_v26  ;;  %v2224_v33 = vadd.f32 %v2223_v28, %v2222_v25 }
 0x316   :  { %v2201_v1 = vadd.f32 %v2200_v30, %v2199_v29  ;;  %v2231_v38 = vadd.f32 %v2230_v31, %v2229_v0  ;;  %v2114_v42 = vpop.f32.mrb[16].mxu1 }
 0x317   :  { %v2195_v43 = vrot.slane %v2194_v32, 2  ;;  %v2225_v44 = vrot.slane %v2224_v33, 2  ;;  %v2115_v45 = vadd.f32 %v7468_v22, %v2114_v42  ;;  %v5798_v46 = vpop.f32.mrb[17].mxu1  ;;  %v7510_v42 = vsub.s32 3, %v7153_v34 }
 0x318   :  { %v2202_v47 = vrot.slane %v2201_v1, 2  ;;  %v2232_v48 = vrot.slane %v2231_v38, 2  ;;  %v2117_v49 = vpop.f32.mrb[18].mxu1 }
 0x319   :  { %v2196_v50 = vadd.f32 %v2195_v43, %v2194_v32  ;;  %v2226_v51 = vadd.f32 %v2225_v44, %v2224_v33  ;;  %v2122_v55 = vmul.f32 %v7169_v40, %v2115_v45  ;;  %v2152_v56 = vmul.f32 %v2115_v45, %v7172_v41  ;;  %v5799_v57 = vpop.f32.mrb[19].mxu1 }
 0x31a   :  { %v2203_v58 = vadd.f32 %v2202_v47, %v2201_v1  ;;  %v2233_v59 = vadd.f32 %v2232_v48, %v2231_v38  ;;  %v7513_v44 = vsub.s32 4, %v7153_v34  ;;  %v2264_v47 = vrot.slane %v7183_v52, %v7510_v42 }
 0x31b   :  { %v2197_v60 = vrot.slane %v2196_v50, 1  ;;  %v2227_v54 = vrot.slane %v2226_v51, 1  ;;  %v2137_v62 = vsel %vm1303_vm1, %v2122_v55, 0.0  ;;  %v2167_v3 = vsel %vm1303_vm1, %v2152_v56, 0.0 }
 0x31c   :  { %v2204_v22 = vrot.slane %v2203_v58, 1  ;;  %v2234_v2 = vrot.slane %v2233_v59, 1  ;;  %v2138_v4 = vrot.slane %v2137_v62, 4  ;;  %v2168_v36 = vrot.slane %v2167_v3, 4 }
 0x31d   :  { %v2198_v5 = vadd.f32 %v2197_v60, %v2196_v50  ;;  %v2228_v6 = vadd.f32 %v2227_v54, %v2226_v51  ;;  %v2268_v50 = vrot.slane %v7188_v53, %v7510_v42  ;;  %v2279_v56 = vrot.slane %v7183_v52, %v7513_v44 }
 0x31e   :  { %v2205_v7 = vadd.f32 %v2204_v22, %v2203_v58  ;;  %v2235_v8 = vadd.f32 %v2234_v2, %v2233_v59  ;;  %v2139_v61 = vadd.f32 %v2138_v4, %v2137_v62  ;;  %v2169_v63 = vadd.f32 %v2168_v36, %v2167_v3 }
 0x31f   :  { %v2213_v10 = vmul.f32 0.5, %v2198_v5  ;;  %v2243_v11 = vmul.f32 0.5, %v2228_v6  ;;  %v2283_v59 = vrot.slane %v7188_v53, %v7513_v44  ;;  %v6236_v53 = vld [vmem:[%s8454_s3 + $0x300] ss:$24 sps:$4 sm:$0xff]  }
 0x320   :  { %v2214_v12 = vmul.f32 0.5, %v2205_v7  ;;  %v2244_v39 = vmul.f32 0.5, %v2235_v8  ;;  %v2140_v14 = vrot.slane %v2139_v61, 2  ;;  %v2170_v15 = vrot.slane %v2169_v63, 2  ;;  %v6239_v8 = vld [vmem:[%s8454_s3 + $0x308] ss:$24 sps:$4 sm:$0xff]  }
 0x321   :  { %v2216_v18 = vmul.f32 %v7169_v40, %v2213_v10  ;;  %v2246_v19 = vmul.f32 %v2243_v11, %v7172_v41  ;;  %v6247_v10 = vld [vmem:[%s8454_s3 + $0x33c] ss:$24 sps:$4 sm:$0xff]  }
 0x322   :  { %v2217_v20 = vmul.f32 %v7169_v40, %v2214_v12  ;;  %v2247_v21 = vmul.f32 %v2244_v39, %v7172_v41  ;;  %v2141_v23 = vadd.f32 %v2140_v14, %v2139_v61  ;;  %v2171_v24 = vadd.f32 %v2170_v15, %v2169_v63  ;;  %v6244_v63 = vld [vmem:[%s8454_s3 + $0x334] ss:$24 sps:$4 sm:$0xff]   ;;  %v6242_v15 = vld [vmem:[%s8454_s3 + $0x330] ss:$24 sps:$4 sm:$0xff]  }
 0x323   :  { %v2249_v26 = vadd.f32 %v2246_v19, %v2216_v18  ;;  %v6245_v18 = vld [vmem:[%s8454_s3 + $0x338] ss:$24 sps:$4 sm:$0xff]   ;;  %v6250_v19 = vld [vmem:[%s8454_s3 + $0x364] ss:$24 sps:$4 sm:$0xff]  }
 0x324   :  { %v2250_v25 = vadd.f32 %v2247_v21, %v2217_v20  ;;  %v2142_v27 = vrot.slane %v2141_v23, 1  ;;  %v2172_v28 = vrot.slane %v2171_v24, 1  ;;  %v6253_v20 = vld [vmem:[%s8454_s3 + $0x36c] ss:$24 sps:$4 sm:$0xff]  }
 0x325   :  { %v2252_v29 = vadd.f32 1e-05, %v2249_v26 }
 0x326   :  { %v2253_v0 = vadd.f32 1e-05, %v2250_v25  ;;  %v2143_v30 = vadd.f32 %v2142_v27, %v2141_v23  ;;  %v2173_v31 = vadd.f32 %v2172_v28, %v2171_v24  ;;  %v6248_v25 = vld [vmem:[%s8454_s3 + $0x360] ss:$24 sps:$4 sm:$0xff]   ;;  %v6256_v28 = vld [vmem:[%s8454_s3 + $0x394] ss:$24 sps:$4 sm:$0xff]  }
 0x327   :  { %6554 = vrsqrt.f32 %v2252_v29  ;;  %v6251_v27 = vld [vmem:[%s8454_s3 + $0x368] ss:$24 sps:$4 sm:$0xff]   ;;  %v6259_v29 = vld [vmem:[%s8454_s3 + $0x39c] ss:$24 sps:$4 sm:$0xff]  }
 0x328   :  { %6556 = vrsqrt.f32 %v2253_v0  ;;  %v2146_v32 = vmul.f32 0.5, %v2143_v30  ;;  %v2176_v33 = vmul.f32 0.5, %v2173_v31 }
 0x32a   :  { %v2149_v1 = vmul.f32 %v7169_v40, %v2146_v32  ;;  %v2179_v38 = vmul.f32 %v2176_v33, %v7172_v41  ;;  %v6254_v32 = vld [vmem:[%s8454_s3 + $0x390] ss:$24 sps:$4 sm:$0xff]  }
 0x32b   :  { %v6257_v33 = vld [vmem:[%s8454_s3 + $0x398] ss:$24 sps:$4 sm:$0xff]  }
 0x32c   :  { %v2182_v43 = vadd.f32 %v2179_v38, %v2149_v1  ;;  %v6262_v1 = vld [vmem:[%s8454_s3 + $0x3c4] ss:$24 sps:$4 sm:$0xff]  }
 0x32d   :  { %v6265_v38 = vld [vmem:[%s8454_s3 + $0x3cc] ss:$24 sps:$4 sm:$0xff]  }
 0x32e   :  { %v7515_v46 = vsub.f32 %v2115_v45, %v2182_v43 }
 0x330   :  { %v2188_v48 = vmul.f32 %v7515_v46, %v7515_v46 }
 0x331   :  { %v6555_v49 = vpop.eup %6554 }
 0x332   :  { %v6557_v51 = vpop.eup %6556  ;;  %v2258_v55 = vmul.f32 %v6555_v49, %v7482_v16  ;;  %v2191_v57 = vmul.f32 %v7169_v40, %v2188_v48  ;;  %v2221_v45 = vmul.f32 %v2188_v48, %v7172_v41  ;;  %v6263_v48 = vld [vmem:[%s8454_s3 + $0x3c8] ss:$24 sps:$4 sm:$0xff]   ;;  %v6268_v49 = vld [vmem:[%s8454_s3 + $0x3f4] ss:$24 sps:$4 sm:$0xff]  }
 0x333   :  { %v2259_v58 = vmul.f32 %v6557_v51, %v7484_v17  ;;  %v6266_v51 = vld [vmem:[%s8454_s3 + $0x3f0] ss:$24 sps:$4 sm:$0xff]  }
 0x334   :  { %v2273_v60 = vmul.f32 %v2264_v47, %v2258_v55  ;;  %v2206_v54 = vsel %vm1303_vm1, %v2191_v57, 0.0  ;;  %v2236_v62 = vsel %vm1303_vm1, %v2221_v45, 0.0  ;;  %v6260_v47 = vld [vmem:[%s8454_s3 + $0x3c0] ss:$24 sps:$4 sm:$0xff]   ;;  %v6277_v57 = vld [vmem:[%s8454_s3 + $0x42c] ss:$24 sps:$4 sm:$0xff]  }
 0x335   :  { %v2274_v3 = vmul.f32 %v2268_v50, %v2259_v58  ;;  %v2207_v22 = vrot.slane %v2206_v54, 4  ;;  %v2237_v16 = vrot.slane %v2236_v62, 4  ;;  %v6271_v50 = vld [vmem:[%s8454_s3 + $0x3fc] ss:$24 sps:$4 sm:$0xff]   ;;  %v6269_v55 = vld [vmem:[%s8454_s3 + $0x3f8] ss:$24 sps:$4 sm:$0xff]  }
 0x336   :  { %v2288_v2 = vadd.f32 %v2279_v56, %v2273_v60  ;;  %v6274_v56 = vld [vmem:[%s8454_s3 + $0x424] ss:$24 sps:$4 sm:$0xff]   ;;  %v6272_v45 = vld [vmem:[%s8454_s3 + $0x420] ss:$24 sps:$4 sm:$0xff]  }
 0x337   :  { %v2208_v4 = vadd.f32 %v2207_v22, %v2206_v54  ;;  %v2238_v52 = vadd.f32 %v2237_v16, %v2236_v62  ;;  %v2289_v36 = vadd.f32 %v2283_v59, %v2274_v3  ;;  %v6275_v58 = vld [vmem:[%s8454_s3 + $0x428] ss:$24 sps:$4 sm:$0xff]   ;;  %v6572_v59 = vld [vmem:[%s8456_s5 + $0x10] sm:$0x3f] }
 0x338   :  { %v7541_v61 = vpack.c.bf16 %v2288_v2, %v2288_v2  ;;  %v2272_v60 = vrot.slane %v6572_v59, %v7510_v42  ;;  %v6280_v54 = vld [vmem:[%s8454_s3 + $0x454] ss:$24 sps:$4 sm:$0xff]   ;;  %v2287_v16 = vrot.slane %v6572_v59, %v7513_v44  ;;  %v6278_v42 = vld [vmem:[%s8454_s3 + $0x450] ss:$24 sps:$4 sm:$0xff]  }
 0x339   :  { %v2209_v5 = vrot.slane %v2208_v4, 2  ;;  %v2239_v6 = vrot.slane %v2238_v52, 2  ;;  %v7533_v7 = vpack.c.bf16 %v2289_v36, %v2289_v36  ;;  %v5092_v17 = vcombine.low %v2288_v2, %v2289_v36  ;;  %v6283_v62 = vld [vmem:[%s8454_s3 + $0x45c] ss:$24 sps:$4 sm:$0xff]   ;;  %v6281_v2 = vld [vmem:[%s8454_s3 + $0x458] ss:$24 sps:$4 sm:$0xff]  }
 0x33a   :  { %v6284_v36 = vld [vmem:[%s8454_s3 + $0x10] ss:$24 sps:$4 sm:$0xff]  }
 0x33b   :  { %v2210_v11 = vadd.f32 %v2209_v5, %v2208_v4  ;;  %v2240_v12 = vadd.f32 %v2239_v6, %v2238_v52  ;;  %3247 = vmatprep.mubr.bf16.mxu0 %v7533_v7  ;;  %5094 = vst [vmem:[%s8458_s7] sm:$0xff] %v5092_v17  ;;  %3329 = vmatprep.mubr.bf16.mxu1 %v7533_v7  ;;  %v6286_v52 = vld [vmem:[%s8454_s3 + $0x14] ss:$24 sps:$4 sm:$0xff]   ;;  %v6289_v6 = vld [vmem:[%s8454_s3 + $0x44] ss:$24 sps:$4 sm:$0xff]   ;;  %v6287_v17 = vld [vmem:[%s8454_s3 + $0x40] ss:$24 sps:$4 sm:$0xff]  }
 0x33c   :  { %3248 = vmatmul.mubr.bf16.vlgmr.msra.gmra.mrb[8].mxu0 %v7541_v61  ;;  %3330 = vmatmul.mubr.bf16.vlgmr.msra.gmra.mrb[20].mxu1 %v7541_v61  ;;  %v6350_v59 = vld [vmem:[%s8454_s3 + $0x430] ss:$24 sps:$4 sm:$0xff]  }
 0x33d   :  { %v2211_v39 = vrot.slane %v2210_v11, 1  ;;  %v2241_v14 = vrot.slane %v2240_v12, 1  ;;  %3257 = vmatpush1.bf16.msra.mxu0 %v6236_v53  ;;  %3339 = vmatpush1.bf16.msra.mxu1 %v6239_v8  ;;  %v6292_v53 = vld [vmem:[%s8454_s3 + $0x74] ss:$24 sps:$4 sm:$0xff]   ;;  %v6290_v8 = vld [vmem:[%s8454_s3 + $0x70] ss:$24 sps:$4 sm:$0xff]  }
 0x33e   :  { %3258 = vmatprep.subr.bf16.mxu0 %v6244_v63  ;;  %3340 = vmatprep.subr.bf16.mxu1 %v6247_v10  ;;  %v6295_v63 = vld [vmem:[%s8454_s3 + $0xa4] ss:$24 sps:$4 sm:$0xff]   ;;  %v6298_v10 = vld [vmem:[%s8454_s3 + $0xd4] ss:$24 sps:$4 sm:$0xff]  }
 0x33f   :  { %v2212_v21 = vadd.f32 %v2211_v39, %v2210_v11  ;;  %v2242_v23 = vadd.f32 %v2241_v14, %v2240_v12  ;;  %3288 = vmatprep.mubr.bf16.mxu0 %v6629_v37  ;;  %3370 = vmatprep.mubr.bf16.mxu1 %v6629_v37  ;;  %v6296_v11 = vld [vmem:[%s8454_s3 + $0xd0] ss:$24 sps:$4 sm:$0xff]   ;;  %v6301_v12 = vld [vmem:[%s8454_s3 + $0x104] ss:$24 sps:$4 sm:$0xff]   ;;  %v6299_v39 = vld [vmem:[%s8454_s3 + $0x100] ss:$24 sps:$4 sm:$0xff]  }
 0x340   :  { %v6304_v14 = vld [vmem:[%s8454_s3 + $0x134] ss:$24 sps:$4 sm:$0xff]  }
 0x341   :  { %v2215_v24 = vmul.f32 0.5, %v2212_v21  ;;  %v2245_v26 = vmul.f32 0.5, %v2242_v23  ;;  %3259 = vmatpush1.bf16.msra.mxu0 %v6242_v15  ;;  %3341 = vmatpush1.bf16.msra.mxu1 %v6245_v18  ;;  %v6302_v15 = vld [vmem:[%s8454_s3 + $0x130] ss:$24 sps:$4 sm:$0xff]   ;;  %v6307_v18 = vld [vmem:[%s8454_s3 + $0x164] ss:$24 sps:$4 sm:$0xff]  }
 0x342   :  { %3260 = vmatprep.subr.bf16.mxu0 %v6250_v19  ;;  %3342 = vmatprep.subr.bf16.mxu1 %v6253_v20  ;;  %v6305_v19 = vld [vmem:[%s8454_s3 + $0x160] ss:$24 sps:$4 sm:$0xff]   ;;  %v6310_v20 = vld [vmem:[%s8454_s3 + $0x194] ss:$24 sps:$4 sm:$0xff]   ;;  %v6308_v21 = vld [vmem:[%s8454_s3 + $0x190] ss:$24 sps:$4 sm:$0xff]  }
 0x343   :  { %v2218_v0 = vmul.f32 %v7169_v40, %v2215_v24  ;;  %v2248_v30 = vmul.f32 %v2245_v26, %v7172_v41  ;;  %v6313_v23 = vld [vmem:[%s8454_s3 + $0x1c4] ss:$24 sps:$4 sm:$0xff]   ;;  %v6311_v24 = vld [vmem:[%s8454_s3 + $0x1c0] ss:$24 sps:$4 sm:$0xff]   ;;  %v6316_v26 = vld [vmem:[%s8454_s3 + $0x1f4] ss:$24 sps:$4 sm:$0xff]  }
 0x345   :  { %v2251_v31 = vadd.f32 %v2248_v30, %v2218_v0  ;;  %3261 = vmatpush1.bf16.msra.mxu0 %v6248_v25  ;;  %3343 = vmatpush1.bf16.msra.mxu1 %v6251_v27  ;;  %v6314_v25 = vld [vmem:[%s8454_s3 + $0x1f0] ss:$24 sps:$4 sm:$0xff]   ;;  %v6319_v27 = vld [vmem:[%s8454_s3 + $0x224] ss:$24 sps:$4 sm:$0xff]  }
 0x346   :  { %3262 = vmatprep.subr.bf16.mxu0 %v6256_v28  ;;  %3344 = vmatprep.subr.bf16.mxu1 %v6259_v29  ;;  %v6317_v28 = vld [vmem:[%s8454_s3 + $0x220] ss:$24 sps:$4 sm:$0xff]   ;;  %v6322_v29 = vld [vmem:[%s8454_s3 + $0x254] ss:$24 sps:$4 sm:$0xff]   ;;  %v6320_v0 = vld [vmem:[%s8454_s3 + $0x250] ss:$24 sps:$4 sm:$0xff]  }
 0x347   :  { %v2254_v43 = vadd.f32 1e-05, %v2251_v31  ;;  %v6325_v30 = vld [vmem:[%s8454_s3 + $0x284] ss:$24 sps:$4 sm:$0xff]   ;;  %v6323_v31 = vld [vmem:[%s8454_s3 + $0x280] ss:$24 sps:$4 sm:$0xff]  }
 0x349   :  { %6558 = vrsqrt.f32 %v2254_v43  ;;  %3263 = vmatpush1.bf16.msra.mxu0 %v6254_v32  ;;  %3345 = vmatpush1.bf16.msra.mxu1 %v6257_v33  ;;  %v6328_v32 = vld [vmem:[%s8454_s3 + $0x2b4] ss:$24 sps:$4 sm:$0xff]   ;;  %v6326_v33 = vld [vmem:[%s8454_s3 + $0x2b0] ss:$24 sps:$4 sm:$0xff]  }
 0x34a   :  { %3264 = vmatprep.subr.bf16.mxu0 %v6262_v1  ;;  %3346 = vmatprep.subr.bf16.mxu1 %v6265_v38  ;;  %v6331_v1 = vld [vmem:[%s8454_s3 + $0x2e4] ss:$24 sps:$4 sm:$0xff]   ;;  %v6329_v38 = vld [vmem:[%s8454_s3 + $0x2e0] ss:$24 sps:$4 sm:$0xff]   ;;  %v6334_v43 = vld [vmem:[%s8454_s3 + $0x314] ss:$24 sps:$4 sm:$0xff]  }
 0x34d   :  { %3265 = vmatpush1.bf16.msra.mxu0 %v6260_v47  ;;  %3347 = vmatpush1.bf16.msra.mxu1 %v6263_v48  ;;  %v6332_v47 = vld [vmem:[%s8454_s3 + $0x310] ss:$24 sps:$4 sm:$0xff]   ;;  %v6337_v48 = vld [vmem:[%s8454_s3 + $0x344] ss:$24 sps:$4 sm:$0xff]  }
 0x34e   :  { %3266 = vmatprep.subr.bf16.mxu0 %v6268_v49  ;;  %3348 = vmatprep.subr.bf16.mxu1 %v6271_v50  ;;  %v6335_v49 = vld [vmem:[%s8454_s3 + $0x340] ss:$24 sps:$4 sm:$0xff]   ;;  %v6340_v50 = vld [vmem:[%s8454_s3 + $0x374] ss:$24 sps:$4 sm:$0xff]  }
 0x351   :  { %3267 = vmatpush1.bf16.msra.mxu0 %v6266_v51  ;;  %3349 = vmatpush1.bf16.msra.mxu1 %v6269_v55  ;;  %v6338_v51 = vld [vmem:[%s8454_s3 + $0x370] ss:$24 sps:$4 sm:$0xff]   ;;  %v6346_v55 = vld [vmem:[%s8454_s3 + $0x3d4] ss:$24 sps:$4 sm:$0xff]  }
 0x352   :  { %3268 = vmatprep.subr.bf16.mxu0 %v6274_v56  ;;  %3350 = vmatprep.subr.bf16.mxu1 %v6277_v57  ;;  %v6344_v56 = vld [vmem:[%s8454_s3 + $0x3d0] ss:$24 sps:$4 sm:$0xff]   ;;  %v6349_v57 = vld [vmem:[%s8454_s3 + $0x404] ss:$24 sps:$4 sm:$0xff]  }
 0x353   :  { %v6559_v3 = vpop.eup %6558 }
 0x354   :  { %v2260_v22 = vmul.f32 %v6559_v3, %v7515_v46  ;;  %v6356_v3 = vld [vmem:[%s8455_s4] ss:$12 sps:$4 sm:$0xff]  }
 0x355   :  { %3269 = vmatpush1.bf16.msra.mxu0 %v6272_v45  ;;  %3351 = vmatpush1.bf16.msra.mxu1 %v6275_v58  ;;  %v6347_v45 = vld [vmem:[%s8454_s3 + $0x400] ss:$24 sps:$4 sm:$0xff]   ;;  %v6352_v58 = vld [vmem:[%s8454_s3 + $0x434] ss:$24 sps:$4 sm:$0xff]  }
 0x356   :  { %v2275_v4 = vmul.f32 %v2272_v60, %v2260_v22  ;;  %3270 = vmatprep.subr.bf16.mxu0 %v6280_v54  ;;  %3352 = vmatprep.subr.bf16.mxu1 %v6283_v62  ;;  %v6355_v60 = vld [vmem:[%s8454_s3 + $0x464] ss:$24 sps:$4 sm:$0xff]   ;;  %v6353_v54 = vld [vmem:[%s8454_s3 + $0x460] ss:$24 sps:$4 sm:$0xff]  }
 0x357   :  { %v6358_v62 = vld [vmem:[%s8455_s4 + $0x4] ss:$12 sps:$4 sm:$0xff]   ;;  %v6361_v22 = vld [vmem:[%s8455_s4 + $0x1c] ss:$12 sps:$4 sm:$0xff]  }
 0x358   :  { %v2290_v46 = vadd.f32 %v2287_v16, %v2275_v4  ;;  %v6359_v16 = vld [vmem:[%s8455_s4 + $0x18] ss:$12 sps:$4 sm:$0xff]  }
 0x359   :  { %3271 = vmatpush1.bf16.msra.mxu0 %v6278_v42  ;;  %3353 = vmatpush1.bf16.msra.mxu1 %v6281_v2  ;;  %v6364_v42 = vld [vmem:[%s8455_s4 + $0x34] ss:$12 sps:$4 sm:$0xff]   ;;  %v6362_v2 = vld [vmem:[%s8455_s4 + $0x30] ss:$12 sps:$4 sm:$0xff]   ;;  %v6367_v4 = vld [vmem:[%s8455_s4 + $0x4c] ss:$12 sps:$4 sm:$0xff]  }
 0x35a   :  { %3379 = vmatprep.subr.bf16.mxu0 %v6286_v52  ;;  %v7650_v5 = vpack.c.bf16 %v2290_v46, %v2290_v46  ;;  %5095 = vst [vmem:[%s8458_s7 + $0x8] sm:$0xf] %v2290_v46  ;;  %4847 = vmatprep.subr.bf16.mxu1 %v6358_v62  ;;  %v6365_v52 = vld [vmem:[%s8455_s4 + $0x48] ss:$12 sps:$4 sm:$0xff]   ;;  %v6370_v46 = vld [vmem:[%s8455_s4 + $0x64] ss:$12 sps:$4 sm:$0xff]  }
 0x35c   :  { %3289 = vmatmul.mubr.bf16.vlgmr.msra.gmra.mrb[8].mxu0 %v7650_v5  ;;  %3371 = vmatmul.mubr.bf16.vlgmr.msra.gmra.mrb[20].mxu1 %v7650_v5 }
 0x35d   :  { %3380 = vmatpush1.bf16.msra.mxu0 %v6284_v36  ;;  %3411 = vmatprep.mubr.bf16.mxu0 %v7533_v7  ;;  %v6293_v7 = vld [vmem:[%s8454_s3 + $0xa0] ss:$24 sps:$4 sm:$0xff]  }
 0x35e   :  { %3381 = vmatprep.subr.bf16.mxu0 %v6289_v6  ;;  %4848 = vmatpush1.bf16.msra.mxu1 %v6356_v3  ;;  %v6368_v36 = vld [vmem:[%s8455_s4 + $0x60] ss:$12 sps:$4 sm:$0xff]   ;;  %v6371_v6 = vld [vmem:[%s8455_s4 + $0x78] ss:$12 sps:$4 sm:$0xff]  }
 0x35f   :  { %4849 = vmatprep.subr.bf16.mxu1 %v6361_v22 }
 0x361   :  { %3382 = vmatpush1.bf16.msra.mxu0 %v6287_v17  ;;  %v6376_v17 = vld [vmem:[%s8455_s4 + $0x94] ss:$12 sps:$4 sm:$0xff]  }
 0x362   :  { %3383 = vmatprep.subr.bf16.mxu0 %v6292_v53  ;;  %4850 = vmatpush1.bf16.msra.mxu1 %v6359_v16  ;;  %v6374_v53 = vld [vmem:[%s8455_s4 + $0x90] ss:$12 sps:$4 sm:$0xff]  }
 0x363   :  { %4851 = vmatprep.subr.bf16.mxu1 %v6364_v42 }
 0x365   :  { %3384 = vmatpush1.bf16.msra.mxu0 %v6290_v8  ;;  %v6379_v8 = vld [vmem:[%s8455_s4 + $0xac] ss:$12 sps:$4 sm:$0xff]  }
 0x366   :  { %3385 = vmatprep.subr.bf16.mxu0 %v6295_v63  ;;  %4852 = vmatpush1.bf16.msra.mxu1 %v6362_v2  ;;  %v6377_v63 = vld [vmem:[%s8455_s4 + $0xa8] ss:$12 sps:$4 sm:$0xff]  }
 0x367   :  { %4853 = vmatprep.subr.bf16.mxu1 %v6367_v4 }
 0x369   :  { %3386 = vmatpush1.bf16.msra.mxu0 %v6293_v7  ;;  %v6382_v7 = vld [vmem:[%s8455_s4 + $0xc4] ss:$12 sps:$4 sm:$0xff]  }
 0x36a   :  { %3387 = vmatprep.subr.bf16.mxu0 %v6298_v10  ;;  %4854 = vmatpush1.bf16.msra.mxu1 %v6365_v52  ;;  %v6383_v10 = vld [vmem:[%s8455_s4 + $0xc8] ss:$12 sps:$4 sm:$0xff]  }
 0x36b   :  { %4855 = vmatprep.subr.bf16.mxu1 %v6370_v46 }
 0x36d   :  { %3388 = vmatpush1.bf16.msra.mxu0 %v6296_v11  ;;  %v6380_v11 = vld [vmem:[%s8455_s4 + $0xc0] ss:$12 sps:$4 sm:$0xff]  }
 0x36e   :  { %3389 = vmatprep.subr.bf16.mxu0 %v6301_v12  ;;  %4856 = vmatpush1.bf16.msra.mxu1 %v6368_v36  ;;  %v6384_v12 = vld [vmem:[%s8455_s4 + $0x8] ss:$12 sps:$4 sm:$0xff]  }
 0x371   :  { %3390 = vmatpush1.bf16.msra.mxu0 %v6299_v39  ;;  %v6387_v39 = vld [vmem:[%s8455_s4 + $0xdc] ss:$12 sps:$4 sm:$0xff]  }
 0x372   :  { %3391 = vmatprep.subr.bf16.mxu0 %v6304_v14  ;;  %v6388_v14 = vld [vmem:[%s8455_s4 + $0xe0] ss:$12 sps:$4 sm:$0xff]  }
 0x375   :  { %3392 = vmatpush1.bf16.msra.mxu0 %v6302_v15  ;;  %v6385_v15 = vld [vmem:[%s8455_s4 + $0xd8] ss:$12 sps:$4 sm:$0xff]  }
 0x376   :  { %3393 = vmatprep.subr.bf16.mxu0 %v6307_v18  ;;  %v6389_v18 = vld [vmem:[%s8455_s4 + $0x20] ss:$12 sps:$4 sm:$0xff]  }
 0x379   :  { %3394 = vmatpush1.bf16.msra.mxu0 %v6305_v19  ;;  %v6392_v19 = vld [vmem:[%s8455_s4 + $0xf4] ss:$12 sps:$4 sm:$0xff]  }
 0x37a   :  { %3395 = vmatprep.subr.bf16.mxu0 %v6310_v20  ;;  %v6393_v20 = vld [vmem:[%s8455_s4 + $0xf8] ss:$12 sps:$4 sm:$0xff]  }
 0x37d   :  { %3396 = vmatpush1.bf16.msra.mxu0 %v6308_v21  ;;  %v6390_v21 = vld [vmem:[%s8455_s4 + $0xf0] ss:$12 sps:$4 sm:$0xff]  }
 0x37e   :  { %3397 = vmatprep.subr.bf16.mxu0 %v6313_v23  ;;  %v6394_v23 = vld [vmem:[%s8455_s4 + $0x38] ss:$12 sps:$4 sm:$0xff]  }
 0x381   :  { %3398 = vmatpush1.bf16.msra.mxu0 %v6311_v24  ;;  %v6397_v24 = vld [vmem:[%s8455_s4 + $0x10c] ss:$12 sps:$4 sm:$0xff]  }
 0x382   :  { %3399 = vmatprep.subr.bf16.mxu0 %v6316_v26  ;;  %v6398_v26 = vld [vmem:[%s8455_s4 + $0x110] ss:$12 sps:$4 sm:$0xff]  }
 0x385   :  { %3400 = vmatpush1.bf16.msra.mxu0 %v6314_v25  ;;  %v6395_v25 = vld [vmem:[%s8455_s4 + $0x108] ss:$12 sps:$4 sm:$0xff]  }
 0x386   :  { %3401 = vmatprep.subr.bf16.mxu0 %v6319_v27  ;;  %v6399_v27 = vld [vmem:[%s8455_s4 + $0x50] ss:$12 sps:$4 sm:$0xff]  }
 0x389   :  { %3402 = vmatpush1.bf16.msra.mxu0 %v6317_v28  ;;  %v6402_v28 = vld [vmem:[%s8455_s4 + $0x124] ss:$12 sps:$4 sm:$0xff]  }
 0x38a   :  { %3403 = vmatprep.subr.bf16.mxu0 %v6322_v29  ;;  %v6403_v29 = vld [vmem:[%s8455_s4 + $0x128] ss:$12 sps:$4 sm:$0xff]  }
 0x38d   :  { %3404 = vmatpush1.bf16.msra.mxu0 %v6320_v0  ;;  %v6400_v0 = vld [vmem:[%s8455_s4 + $0x120] ss:$12 sps:$4 sm:$0xff]  }
 0x38e   :  { %3405 = vmatprep.subr.bf16.mxu0 %v6325_v30  ;;  %v6404_v30 = vld [vmem:[%s8455_s4 + $0x68] ss:$12 sps:$4 sm:$0xff]  }
 0x391   :  { %3406 = vmatpush1.bf16.msra.mxu0 %v6323_v31  ;;  %v6407_v31 = vld [vmem:[%s8455_s4 + $0x13c] ss:$12 sps:$4 sm:$0xff]  }
 0x392   :  { %3407 = vmatprep.subr.bf16.mxu0 %v6328_v32  ;;  %v6408_v32 = vld [vmem:[%s8455_s4 + $0x140] ss:$12 sps:$4 sm:$0xff]  }
 0x395   :  { %3408 = vmatpush1.bf16.msra.mxu0 %v6326_v33  ;;  %v6405_v33 = vld [vmem:[%s8455_s4 + $0x138] ss:$12 sps:$4 sm:$0xff]  }
 0x396   :  { %3409 = vmatprep.subr.bf16.mxu0 %v6331_v1  ;;  %v6409_v1 = vld [vmem:[%s8455_s4 + $0x80] ss:$12 sps:$4 sm:$0xff]  }
 0x399   :  { %3410 = vmatpush1.bf16.msra.mxu0 %v6329_v38  ;;  %v6410_v38 = vld [vmem:[%s8455_s4 + $0x150] ss:$12 sps:$4 sm:$0xff]  }
 0x39a   :  { %3420 = vmatprep.subr.bf16.mxu0 %v6334_v43  ;;  %v6412_v43 = vld [vmem:[%s8455_s4 + $0x154] ss:$12 sps:$4 sm:$0xff]  }
 0x39c   :  { %3412 = vmatmul.mubr.bf16.vlgmr.msra.gmra.mrb[12].mxu0 %v7541_v61  ;;  %v6343_v61 = vld [vmem:[%s8454_s3 + $0x3a4] ss:$24 sps:$4 sm:$0xff]  }
 0x39d   :  { %3421 = vmatpush1.bf16.msra.mxu0 %v6332_v47  ;;  %3452 = vmatprep.mubr.bf16.mxu0 %v6629_v37  ;;  %v6341_v37 = vld [vmem:[%s8454_s3 + $0x3a0] ss:$24 sps:$4 sm:$0xff]  }
 0x39e   :  { %3422 = vmatprep.subr.bf16.mxu0 %v6337_v48  ;;  %v6413_v47 = vld [vmem:[%s8455_s4 + $0x158] ss:$12 sps:$4 sm:$0xff]  }
 0x39f   :  { %v6414_v48 = vld [vmem:[%s8455_s4 + $0x98] ss:$12 sps:$4 sm:$0xff]  }
 0x3a1   :  { %3423 = vmatpush1.bf16.msra.mxu0 %v6335_v49  ;;  %v6417_v49 = vld [vmem:[%s8455_s4 + $0x16c] ss:$12 sps:$4 sm:$0xff]  }
 0x3a2   :  { %3424 = vmatprep.subr.bf16.mxu0 %v6340_v50  ;;  %v6418_v50 = vld [vmem:[%s8455_s4 + $0x170] ss:$12 sps:$4 sm:$0xff]  }
 0x3a5   :  { %3425 = vmatpush1.bf16.msra.mxu0 %v6338_v51  ;;  %v6415_v51 = vld [vmem:[%s8455_s4 + $0x168] ss:$12 sps:$4 sm:$0xff]  }
 0x3a6   :  { %3426 = vmatprep.subr.bf16.mxu0 %v6343_v61  ;;  %v6419_v61 = vld [vmem:[%s8455_s4 + $0xb0] ss:$12 sps:$4 sm:$0xff]  }
 0x3a9   :  { %3427 = vmatpush1.bf16.msra.mxu0 %v6341_v37  ;;  %v6422_v37 = vld [vmem:[%s8455_s4 + $0x184] ss:$12 sps:$4 sm:$0xff]  }
 0x3aa   :  { %3428 = vmatprep.subr.bf16.mxu0 %v6346_v55  ;;  %v6423_v55 = vld [vmem:[%s8455_s4 + $0x248] ss:$12 sps:$4 sm:$0xff]  }
 0x3ad   :  { %3429 = vmatpush1.bf16.msra.mxu0 %v6344_v56  ;;  %v7949_v56 = vld [vmem:[#allocation4] sm:$0x77] }
 0x3ae   :  { %3430 = vmatprep.subr.bf16.mxu0 %v6349_v57  ;;  %v7951_v57 = vld [vmem:[#allocation4 + $0x8] sm:$0x77] }
 0x3b1   :  { %3431 = vmatpush1.bf16.msra.mxu0 %v6347_v45  ;;  %v2444_v45 = vrot.slane %v7949_v56, %v7156_v35 }
 0x3b2   :  { %3432 = vmatprep.subr.bf16.mxu0 %v6352_v58  ;;  %v2452_v58 = vrot.slane %v7951_v57, %v7156_v35 }
 0x3b4   :  { %v2482_v62 = vrot.slane %v2452_v58, %v7156_v35 }
 0x3b5   :  { %3433 = vmatpush1.bf16.msra.mxu0 %v6350_v59  ;;  %v2448_v59 = vrot.slane %v7949_v56, %v7513_v44 }
 0x3b6   :  { %3434 = vmatprep.subr.bf16.mxu0 %v6355_v60  ;;  %v2456_v60 = vrot.slane %v7951_v57, %v7513_v44 }
 0x3b7   :  { %v2478_v3 = vrot.slane %v2448_v59, %v7156_v35 }
 0x3b8   :  { %v2486_v22 = vrot.slane %v2456_v60, %v7156_v35 }
 0x3b9   :  { %3435 = vmatpush1.bf16.msra.mxu0 %v6353_v54  ;;  %v2474_v54 = vrot.slane %v2444_v45, %v7156_v35 }
 0x3ba   :  { %5714 = vmatprep.subr.bf16.mxu0 %v6383_v10 }
 0x3bc   :  { %3453 = vmatmul.mubr.bf16.vlgmr.msra.gmra.mrb[12].mxu0 %v7650_v5  ;;  %v6373_v5 = vld [vmem:[%s8455_s4 + $0x7c] ss:$12 sps:$4 sm:$0xff]  }
 0x3bd   :  { %4857 = vmatprep.subr.bf16.mxu1 %v6373_v5  ;;  %5715 = vmatpush3.bf16.msra.mxu0 %v6384_v12 }
 0x3be   :  { %4858 = vmatpush1.bf16.msra.mxu1 %v6371_v6  ;;  %5716 = vmatprep.subr.bf16.mxu0 %v6388_v14 }
 0x3bf   :  { %4859 = vmatprep.subr.bf16.mxu1 %v6376_v17 }
 0x3c1   :  { %5717 = vmatpush3.bf16.msra.mxu0 %v6389_v18 }
 0x3c2   :  { %4860 = vmatpush1.bf16.msra.mxu1 %v6374_v53  ;;  %5718 = vmatprep.subr.bf16.mxu0 %v6393_v20 }
 0x3c3   :  { %4861 = vmatprep.subr.bf16.mxu1 %v6379_v8 }
 0x3c5   :  { %5719 = vmatpush3.bf16.msra.mxu0 %v6394_v23 }
 0x3c6   :  { %4862 = vmatpush1.bf16.msra.mxu1 %v6377_v63  ;;  %5720 = vmatprep.subr.bf16.mxu0 %v6398_v26 }
 0x3c7   :  { %4863 = vmatprep.subr.bf16.mxu1 %v6382_v7 }
 0x3c9   :  { %5721 = vmatpush3.bf16.msra.mxu0 %v6399_v27 }
 0x3ca   :  { %4864 = vmatpush1.bf16.msra.mxu1 %v6380_v11  ;;  %5722 = vmatprep.subr.bf16.mxu0 %v6403_v29 }
 0x3cb   :  { %4865 = vmatprep.subr.bf16.mxu1 %v6387_v39 }
 0x3cd   :  { %5723 = vmatpush3.bf16.msra.mxu0 %v6404_v30 }
 0x3ce   :  { %4866 = vmatpush1.bf16.msra.mxu1 %v6385_v15  ;;  %5724 = vmatprep.subr.bf16.mxu0 %v6408_v32 }
 0x3cf   :  { %4867 = vmatprep.subr.bf16.mxu1 %v6392_v19 }
 0x3d1   :  { %5725 = vmatpush3.bf16.msra.mxu0 %v6409_v1 }
 0x3d2   :  { %4868 = vmatpush1.bf16.msra.mxu1 %v6390_v21  ;;  %5726 = vmatprep.subr.bf16.mxu0 %v6413_v47 }
 0x3d3   :  { %4869 = vmatprep.subr.bf16.mxu1 %v6397_v24 }
 0x3d5   :  { %5727 = vmatpush3.bf16.msra.mxu0 %v6414_v48 }
 0x3d6   :  { %4870 = vmatpush1.bf16.msra.mxu1 %v6395_v25  ;;  %5728 = vmatprep.subr.bf16.mxu0 %v6418_v50 }
 0x3d7   :  { %4871 = vmatprep.subr.bf16.mxu1 %v6402_v28 }
 0x3d9   :  { %5729 = vmatpush3.bf16.msra.mxu0 %v6419_v61 }
 0x3da   :  { %4872 = vmatpush1.bf16.msra.mxu1 %v6400_v0  ;;  %5736 = vmatprep.subr.bf16.mxu0 %v6423_v55 }
 0x3db   :  { %4873 = vmatprep.subr.bf16.mxu1 %v6407_v31 }
 0x3de   :  { %4874 = vmatpush1.bf16.msra.mxu1 %v6405_v33 }
 0x3df   :  { %4875 = vmatprep.subr.bf16.mxu1 %v6412_v43 }
 0x3e2   :  { %4876 = vmatpush1.bf16.msra.mxu1 %v6410_v38 }
 0x3e3   :  { %4877 = vmatprep.subr.bf16.mxu1 %v6417_v49 }
 0x3e6   :  { %4878 = vmatpush1.bf16.msra.mxu1 %v6415_v51 }
 0x3e7   :  { %4888 = vmatprep.subr.bf16.mxu1 %v6422_v37 }
 0x42f   :  { %v3290_v16 = vpop.f32.mrb[8].mxu0  ;;  %v3372_v42 = vpop.f32.mrb[20].mxu1 }
 0x430   :  { %v7965_v2 = vadd.f32 %v3290_v16, %v2474_v54  ;;  %v7967_v4 = vadd.f32 %v3372_v42, %v2482_v62  ;;  %v3292_v52 = vpop.f32.mrb[9].mxu0  ;;  %v3374_v46 = vpop.f32.mrb[21].mxu1 }
 0x431   :  { %v7969_v36 = vadd.f32 %v3292_v52, %v2478_v3  ;;  %v7971_v5 = vadd.f32 %v3374_v46, %v2486_v22  ;;  %v3294_v6 = vpop.f32.mrb[10].mxu0  ;;  %v3376_v17 = vpop.f32.mrb[22].mxu1 }
 0x432   :  { %v3461_v53 = vmul.f32 %v7965_v2, %v7169_v40  ;;  %v3521_v8 = vmul.f32 %v7965_v2, %v7172_v41  ;;  %v3463_v63 = vmul.f32 %v7967_v4, %v7169_v40  ;;  %v3523_v7 = vmul.f32 %v7967_v4, %v7172_v41  ;;  %v3295_v10 = vpop.f32.mrb[11].mxu0  ;;  %v3377_v11 = vpop.f32.mrb[23].mxu1 }
 0x433   :  { %v3462_v12 = vmul.f32 %v7969_v36, %v7169_v40  ;;  %v3522_v39 = vmul.f32 %v7969_v36, %v7172_v41  ;;  %v3464_v14 = vmul.f32 %v7971_v5, %v7169_v40  ;;  %v3524_v15 = vmul.f32 %v7971_v5, %v7172_v41 }
 0x434   :  { %v3467_v18 = vsel %vm1303_vm1, %v3461_v53, 0.0  ;;  %v3527_v19 = vsel %vm1303_vm1, %v3521_v8, 0.0  ;;  %v3481_v20 = vsel %vm1303_vm1, %v3463_v63, 0.0  ;;  %v3541_v21 = vsel %vm1303_vm1, %v3523_v7, 0.0 }
 0x435   :  { %v3468_v23 = vrot.slane %v3467_v18, 4  ;;  %v3528_v24 = vrot.slane %v3527_v19, 4  ;;  %v3482_v26 = vrot.slane %v3481_v20, 4  ;;  %v3542_v25 = vrot.slane %v3541_v21, 4 }
 0x436   :  { %v3474_v27 = vsel %vm1303_vm1, %v3462_v12, 0.0  ;;  %v3534_v28 = vsel %vm1303_vm1, %v3522_v39, 0.0  ;;  %v3488_v29 = vsel %vm1303_vm1, %v3464_v14, 0.0  ;;  %v3548_v0 = vsel %vm1303_vm1, %v3524_v15, 0.0 }
 0x437   :  { %v3469_v30 = vadd.f32 %v3468_v23, %v3467_v18  ;;  %v3529_v31 = vadd.f32 %v3528_v24, %v3527_v19  ;;  %v3483_v32 = vadd.f32 %v3482_v26, %v3481_v20  ;;  %v3543_v33 = vadd.f32 %v3542_v25, %v3541_v21 }
 0x438   :  { %v3475_v1 = vrot.slane %v3474_v27, 4  ;;  %v3535_v38 = vrot.slane %v3534_v28, 4  ;;  %v3489_v43 = vrot.slane %v3488_v29, 4  ;;  %v3549_v47 = vrot.slane %v3548_v0, 4 }
 0x439   :  { %v3470_v48 = vrot.slane %v3469_v30, 2  ;;  %v3530_v49 = vrot.slane %v3529_v31, 2  ;;  %v3484_v50 = vrot.slane %v3483_v32, 2  ;;  %v3544_v51 = vrot.slane %v3543_v33, 2 }
 0x43a   :  { %v3476_v61 = vadd.f32 %v3475_v1, %v3474_v27  ;;  %v3536_v37 = vadd.f32 %v3535_v38, %v3534_v28  ;;  %v3490_v55 = vadd.f32 %v3489_v43, %v3488_v29  ;;  %v3550_v45 = vadd.f32 %v3549_v47, %v3548_v0 }
 0x43b   :  { %v3471_v58 = vadd.f32 %v3470_v48, %v3469_v30  ;;  %v3531_v59 = vadd.f32 %v3530_v49, %v3529_v31  ;;  %v3485_v60 = vadd.f32 %v3484_v50, %v3483_v32  ;;  %v3545_v54 = vadd.f32 %v3544_v51, %v3543_v33 }
 0x43c   :  { %v3477_v62 = vrot.slane %v3476_v61, 2  ;;  %v3537_v3 = vrot.slane %v3536_v37, 2  ;;  %v3491_v22 = vrot.slane %v3490_v55, 2  ;;  %v3551_v16 = vrot.slane %v3550_v45, 2 }
 0x43d   :  { %v3472_v42 = vrot.slane %v3471_v58, 1  ;;  %v3532_v52 = vrot.slane %v3531_v59, 1  ;;  %v3486_v46 = vrot.slane %v3485_v60, 1  ;;  %v3546_v6 = vrot.slane %v3545_v54, 1 }
 0x43e   :  { %v3478_v17 = vadd.f32 %v3477_v62, %v3476_v61  ;;  %v3538_v53 = vadd.f32 %v3537_v3, %v3536_v37  ;;  %v3492_v8 = vadd.f32 %v3491_v22, %v3490_v55  ;;  %v3552_v63 = vadd.f32 %v3551_v16, %v3550_v45 }
 0x43f   :  { %v3473_v7 = vadd.f32 %v3472_v42, %v3471_v58  ;;  %v3533_v10 = vadd.f32 %v3532_v52, %v3531_v59  ;;  %v3487_v11 = vadd.f32 %v3486_v46, %v3485_v60  ;;  %v3547_v12 = vadd.f32 %v3546_v6, %v3545_v54 }
 0x440   :  { %v3479_v39 = vrot.slane %v3478_v17, 1  ;;  %v3539_v14 = vrot.slane %v3538_v53, 1  ;;  %v3493_v15 = vrot.slane %v3492_v8, 1  ;;  %v3553_v18 = vrot.slane %v3552_v63, 1 }
 0x441   :  { %v3509_v19 = vmul.f32 0.5, %v3473_v7  ;;  %v3569_v20 = vmul.f32 0.5, %v3533_v10  ;;  %v3511_v21 = vmul.f32 0.5, %v3487_v11  ;;  %v3571_v23 = vmul.f32 0.5, %v3547_v12 }
 0x442   :  { %v3480_v24 = vadd.f32 %v3479_v39, %v3478_v17  ;;  %v3540_v26 = vadd.f32 %v3539_v14, %v3538_v53  ;;  %v3494_v25 = vadd.f32 %v3493_v15, %v3492_v8  ;;  %v3554_v27 = vadd.f32 %v3553_v18, %v3552_v63 }
 0x443   :  { %v3515_v28 = vmul.f32 %v7169_v40, %v3509_v19  ;;  %v3575_v29 = vmul.f32 %v3569_v20, %v7172_v41  ;;  %v3517_v0 = vmul.f32 %v7169_v40, %v3511_v21  ;;  %v3577_v30 = vmul.f32 %v3571_v23, %v7172_v41 }
 0x444   :  { %v3510_v31 = vmul.f32 0.5, %v3480_v24  ;;  %v3570_v32 = vmul.f32 0.5, %v3540_v26  ;;  %v3512_v33 = vmul.f32 0.5, %v3494_v25  ;;  %v3572_v1 = vmul.f32 0.5, %v3554_v27 }
 0x445   :  { %v3581_v38 = vadd.f32 %v3575_v29, %v3515_v28  ;;  %v3583_v43 = vadd.f32 %v3577_v30, %v3517_v0 }
 0x446   :  { %v3516_v47 = vmul.f32 %v7169_v40, %v3510_v31  ;;  %v3576_v48 = vmul.f32 %v3570_v32, %v7172_v41  ;;  %v3518_v49 = vmul.f32 %v7169_v40, %v3512_v33  ;;  %v3578_v50 = vmul.f32 %v3572_v1, %v7172_v41 }
 0x447   :  { %v8006_v51 = vsub.f32 %v7965_v2, %v3581_v38  ;;  %v8009_v61 = vsub.f32 %v7967_v4, %v3583_v43 }
 0x448   :  { %v3582_v37 = vadd.f32 %v3576_v48, %v3516_v47  ;;  %v3584_v55 = vadd.f32 %v3578_v50, %v3518_v49 }
 0x449   :  { %v3593_v45 = vmul.f32 %v8006_v51, %v8006_v51  ;;  %v3595_v58 = vmul.f32 %v8009_v61, %v8009_v61 }
 0x44a   :  { %v8016_v59 = vsub.f32 %v7969_v36, %v3582_v37  ;;  %v8019_v60 = vsub.f32 %v7971_v5, %v3584_v55 }
 0x44b   :  { %v3599_v2 = vmul.f32 %v7169_v40, %v3593_v45  ;;  %v3659_v54 = vmul.f32 %v3593_v45, %v7172_v41  ;;  %v3601_v42 = vmul.f32 %v7169_v40, %v3595_v58  ;;  %v3661_v5 = vmul.f32 %v3595_v58, %v7172_v41 }
 0x44c   :  { %v3594_v4 = vmul.f32 %v8016_v59, %v8016_v59  ;;  %v3596_v62 = vmul.f32 %v8019_v60, %v8019_v60 }
 0x44d   :  { %v3605_v3 = vsel %vm1303_vm1, %v3599_v2, 0.0  ;;  %v3665_v22 = vsel %vm1303_vm1, %v3659_v54, 0.0  ;;  %v3619_v14 = vsel %vm1303_vm1, %v3601_v42, 0.0  ;;  %v3679_v15 = vsel %vm1303_vm1, %v3661_v5, 0.0 }
 0x44e   :  { %v3606_v16 = vrot.slane %v3605_v3, 4  ;;  %v3666_v36 = vrot.slane %v3665_v22, 4  ;;  %v3600_v52 = vmul.f32 %v7169_v40, %v3594_v4  ;;  %v3660_v46 = vmul.f32 %v3594_v4, %v7172_v41 }
 0x44f   :  { %v3602_v6 = vmul.f32 %v7169_v40, %v3596_v62  ;;  %v3662_v17 = vmul.f32 %v3596_v62, %v7172_v41  ;;  %v3620_v30 = vrot.slane %v3619_v14, 4  ;;  %v3680_v31 = vrot.slane %v3679_v15, 4 }
 0x450   :  { %v3607_v53 = vadd.f32 %v3606_v16, %v3605_v3  ;;  %v3667_v8 = vadd.f32 %v3666_v36, %v3665_v22  ;;  %v3612_v63 = vsel %vm1303_vm1, %v3600_v52, 0.0  ;;  %v3672_v7 = vsel %vm1303_vm1, %v3660_v46, 0.0 }
 0x451   :  { %v3626_v10 = vsel %vm1303_vm1, %v3602_v6, 0.0  ;;  %v3686_v11 = vsel %vm1303_vm1, %v3662_v17, 0.0  ;;  %v3613_v18 = vrot.slane %v3612_v63, 4  ;;  %v3673_v19 = vrot.slane %v3672_v7, 4 }
 0x452   :  { %v3608_v12 = vrot.slane %v3607_v53, 2  ;;  %v3668_v39 = vrot.slane %v3667_v8, 2  ;;  %v3627_v20 = vrot.slane %v3626_v10, 4  ;;  %v3687_v21 = vrot.slane %v3686_v11, 4 }
 0x453   :  { %v3614_v26 = vadd.f32 %v3613_v18, %v3612_v63  ;;  %v3674_v25 = vadd.f32 %v3673_v19, %v3672_v7  ;;  %v3621_v58 = vadd.f32 %v3620_v30, %v3619_v14  ;;  %v3681_v2 = vadd.f32 %v3680_v31, %v3679_v15 }
 0x454   :  { %v3609_v23 = vadd.f32 %v3608_v12, %v3607_v53  ;;  %v3669_v24 = vadd.f32 %v3668_v39, %v3667_v8  ;;  %v3628_v27 = vadd.f32 %v3627_v20, %v3626_v10  ;;  %v3688_v28 = vadd.f32 %v3687_v21, %v3686_v11 }
 0x455   :  { %v3615_v32 = vrot.slane %v3614_v26, 2  ;;  %v3675_v33 = vrot.slane %v3674_v25, 2  ;;  %v3622_v6 = vrot.slane %v3621_v58, 2  ;;  %v3682_v17 = vrot.slane %v3681_v2, 2 }
 0x456   :  { %v3610_v29 = vrot.slane %v3609_v23, 1  ;;  %v3670_v0 = vrot.slane %v3669_v24, 1  ;;  %v3629_v1 = vrot.slane %v3628_v27, 2  ;;  %v3689_v38 = vrot.slane %v3688_v28, 2 }
 0x457   :  { %v3616_v48 = vadd.f32 %v3615_v32, %v3614_v26  ;;  %v3676_v49 = vadd.f32 %v3675_v33, %v3674_v25  ;;  %v3623_v15 = vadd.f32 %v3622_v6, %v3621_v58  ;;  %v3683_v18 = vadd.f32 %v3682_v17, %v3681_v2 }
 0x458   :  { %v3611_v43 = vadd.f32 %v3610_v29, %v3609_v23  ;;  %v3671_v47 = vadd.f32 %v3670_v0, %v3669_v24  ;;  %v3630_v50 = vadd.f32 %v3629_v1, %v3628_v27  ;;  %v3690_v37 = vadd.f32 %v3689_v38, %v3688_v28 }
 0x459   :  { %v3617_v54 = vrot.slane %v3616_v48, 1  ;;  %v3677_v4 = vrot.slane %v3676_v49, 1  ;;  %v3624_v24 = vrot.slane %v3623_v15, 1  ;;  %v3684_v26 = vrot.slane %v3683_v18, 1 }
 0x45a   :  { %v3647_v55 = vmul.f32 0.5, %v3611_v43  ;;  %v3707_v45 = vmul.f32 0.5, %v3671_v47  ;;  %v3631_v62 = vrot.slane %v3630_v50, 1  ;;  %v3691_v3 = vrot.slane %v3690_v37, 1 }
 0x45b   :  { %v3618_v36 = vadd.f32 %v3617_v54, %v3616_v48  ;;  %v3678_v42 = vadd.f32 %v3677_v4, %v3676_v49  ;;  %v3746_v25 = vrot.slane %v7949_v56, %v7238_v9  ;;  %v8050_v27 = vsub.s32 5, %v7153_v34 }
 0x45c   :  { %v3653_v22 = vmul.f32 %v7169_v40, %v3647_v55  ;;  %v3713_v16 = vmul.f32 %v3707_v45, %v7172_v41  ;;  %v3632_v5 = vadd.f32 %v3631_v62, %v3630_v50  ;;  %v3692_v52 = vadd.f32 %v3691_v3, %v3690_v37 }
 0x45d   :  { %v3648_v53 = vmul.f32 0.5, %v3618_v36  ;;  %v3708_v8 = vmul.f32 0.5, %v3678_v42  ;;  %v3625_v28 = vadd.f32 %v3624_v24, %v3623_v15  ;;  %v3685_v29 = vadd.f32 %v3684_v26, %v3683_v18  ;;  %v6430_v15 = vld [vmem:[%s8455_s4 + $0x1b0] ss:$12 sps:$4 sm:$0xff]   ;;  %v6434_v18 = vld [vmem:[%s8455_s4 + $0x1b8] ss:$12 sps:$4 sm:$0xff]  }
 0x45e   :  { %v3719_v46 = vadd.f32 %v3713_v16, %v3653_v22  ;;  %v3650_v63 = vmul.f32 0.5, %v3632_v5  ;;  %v3710_v7 = vmul.f32 0.5, %v3692_v52  ;;  %v8053_v0 = vsub.s32 6, %v7153_v34  ;;  %v6439_v24 = vld [vmem:[%s8455_s4 + $0x1d0] ss:$12 sps:$4 sm:$0xff]  }
 0x45f   :  { %v3654_v11 = vmul.f32 %v7169_v40, %v3648_v53  ;;  %v3714_v12 = vmul.f32 %v3708_v8, %v7172_v41  ;;  %v3776_v30 = vrot.slane %v3746_v25, %v7238_v9  ;;  %v3806_v31 = vrot.slane %v7949_v56, %v7243_v13  ;;  %v6442_v25 = vld [vmem:[%s8455_s4 + $0x1e4] ss:$12 sps:$4 sm:$0xff]  }
 0x460   :  { %v3725_v10 = vadd.f32 1e-05, %v3719_v46  ;;  %v3656_v39 = vmul.f32 %v7169_v40, %v3650_v63  ;;  %v3716_v14 = vmul.f32 %v3710_v7, %v7172_v41  ;;  %v3750_v33 = vrot.slane %v7949_v56, %v8050_v27  ;;  %v6427_v63 = vld [vmem:[%s8455_s4 + $0x19c] ss:$12 sps:$4 sm:$0xff]   ;;  %v6428_v7 = vld [vmem:[%s8455_s4 + $0x260] ss:$12 sps:$4 sm:$0xff]  }
 0x461   :  { %v3720_v19 = vadd.f32 %v3714_v12, %v3654_v11  ;;  %v3758_v38 = vrot.slane %v7951_v57, %v8050_v27  ;;  %v3649_v43 = vmul.f32 0.5, %v3625_v28  ;;  %v3709_v47 = vmul.f32 0.5, %v3685_v29  ;;  %v6425_v11 = vld [vmem:[%s8455_s4 + $0x198] ss:$12 sps:$4 sm:$0xff]   ;;  %v6429_v12 = vld [vmem:[%s8455_s4 + $0x1a0] ss:$12 sps:$4 sm:$0xff]  }
 0x462   :  { %6560 = vrsqrt.f32 %v3725_v10  ;;  %v3722_v20 = vadd.f32 %v3716_v14, %v3656_v39  ;;  %v3810_v34 = vrot.slane %v7949_v56, %v8053_v0  ;;  %v3836_v49 = vrot.slane %v3806_v31, %v7243_v13  ;;  %v6432_v39 = vld [vmem:[%s8455_s4 + $0x1b4] ss:$12 sps:$4 sm:$0xff]   ;;  %v6433_v14 = vld [vmem:[%s8455_s4 + $0x278] ss:$12 sps:$4 sm:$0xff]  }
 0x463   :  { %v3726_v21 = vadd.f32 1e-05, %v3720_v19  ;;  %v3818_v50 = vrot.slane %v7951_v57, %v8053_v0  ;;  %v3780_v37 = vrot.slane %v3750_v33, %v7238_v9  ;;  %v3788_v45 = vrot.slane %v3758_v38, %v7238_v9  ;;  %v6437_v19 = vld [vmem:[%s8455_s4 + $0x1cc] ss:$12 sps:$4 sm:$0xff]   ;;  %v6443_v28 = vld [vmem:[%s8455_s4 + $0x2a8] ss:$12 sps:$4 sm:$0xff]  }
 0x464   :  { %v3728_v23 = vadd.f32 1e-05, %v3722_v20  ;;  %v3655_v58 = vmul.f32 %v7169_v40, %v3649_v43  ;;  %v3715_v2 = vmul.f32 %v3709_v47, %v7172_v41  ;;  %v3840_v56 = vrot.slane %v3810_v34, %v7243_v13  ;;  %v6438_v20 = vld [vmem:[%s8455_s4 + $0x290] ss:$12 sps:$4 sm:$0xff]   ;;  %v6444_v33 = vld [vmem:[%s8455_s4 + $0x1e8] ss:$12 sps:$4 sm:$0xff]  }
 0x465   :  { %6562 = vrsqrt.f32 %v3726_v21  ;;  %v3848_v3 = vrot.slane %v3818_v50, %v7243_v13  ;;  %v8112_v21 = vld [vmem:[#allocation4 + $0x10] sm:$0x77]  ;;  %v3754_v26 = vrot.slane %v7951_v57, %v7238_v9  ;;  %v6448_v43 = vld [vmem:[%s8455_s4 + $0x2c0] ss:$12 sps:$4 sm:$0xff]   ;;  %v3814_v47 = vrot.slane %v7951_v57, %v7243_v13 }
 0x466   :  { %6564 = vrsqrt.f32 %v3728_v23  ;;  %v3721_v36 = vadd.f32 %v3715_v2, %v3655_v58  ;;  %v6435_v23 = vld [vmem:[%s8455_s4 + $0x1c8] ss:$12 sps:$4 sm:$0xff]   ;;  %v2464_v31 = vrot.slane %v8112_v21, %v7513_v44 }
 0x467   :  { %v3784_v38 = vrot.slane %v3754_v26, %v7238_v9  ;;  %v6447_v44 = vld [vmem:[%s8455_s4 + $0x1fc] ss:$12 sps:$4 sm:$0xff]   ;;  %v6452_v57 = vld [vmem:[%s8455_s4 + $0x214] ss:$12 sps:$4 sm:$0xff]  }
 0x468   :  { %v3727_v17 = vadd.f32 1e-05, %v3721_v36  ;;  %v6457_v36 = vld [vmem:[%s8455_s4 + $0x22c] ss:$12 sps:$4 sm:$0xff]  }
 0x469   :  { %v6460_v26 = vld [vmem:[%s8455_s4 + $0x240] ss:$12 sps:$4 sm:$0xff]  }
 0x46a   :  { %6566 = vrsqrt.f32 %v3727_v17 }
 0x46c   :  { %v6561_v32 = vpop.eup %6560 }
 0x46d   :  { %v3737_v1 = vmul.f32 %v6561_v32, %v8006_v51  ;;  %v6440_v32 = vld [vmem:[%s8455_s4 + $0x1e0] ss:$12 sps:$4 sm:$0xff]  }
 0x46f   :  { %v3797_v48 = vmul.f32 %v3776_v30, %v3737_v1  ;;  %v6563_v55 = vpop.eup %6562  ;;  %v2460_v30 = vrot.slane %v8112_v21, %v7156_v35 }
 0x470   :  { %v6565_v51 = vpop.eup %6564  ;;  %v3738_v54 = vmul.f32 %v6563_v55, %v8016_v59  ;;  %v6420_v59 = vld [vmem:[%s8455_s4 + $0x180] ss:$12 sps:$4 sm:$0xff]   ;;  %v3844_v55 = vrot.slane %v3814_v47, %v7243_v13 }
 0x471   :  { %v3740_v4 = vmul.f32 %v6565_v51, %v8019_v60  ;;  %v3857_v62 = vadd.f32 %v3836_v49, %v3797_v48  ;;  %v6424_v60 = vld [vmem:[%s8455_s4 + $0x188] ss:$12 sps:$4 sm:$0xff]   ;;  %v2490_v34 = vrot.slane %v2460_v30, %v7156_v35  ;;  %v2494_v48 = vrot.slane %v2464_v31, %v7156_v35  ;;  %v6449_v49 = vld [vmem:[%s8455_s4 + $0x200] ss:$12 sps:$4 sm:$0xff]   ;;  %v6453_v35 = vld [vmem:[%s8455_s4 + $0x2d8] ss:$12 sps:$4 sm:$0xff]  }
 0x472   :  { %v3798_v22 = vmul.f32 %v3780_v37, %v3738_v54  ;;  %v6465_v31 = vld [vmem:[%s8455_s4 + $0x25c] ss:$12 sps:$4 sm:$0xff]  }
 0x473   :  { %v3800_v16 = vmul.f32 %v3788_v45, %v3740_v4  ;;  %v3863_v5 = vmax.f32 %v3857_v62, 0.0  ;;  %v6450_v4 = vld [vmem:[%s8455_s4 + $0x210] ss:$12 sps:$4 sm:$0xff]  }
 0x474   :  { %v3858_v42 = vadd.f32 %v3840_v56, %v3798_v22  ;;  %v6567_v29 = vpop.eup %6566 }
 0x475   :  { %v3860_v52 = vadd.f32 %v3848_v3, %v3800_v16  ;;  %v3869_v8 = vpack.c.bf16 %v3863_v5, %v3863_v5  ;;  %v3739_v1 = vmul.f32 %v6567_v29, %v8009_v61  ;;  %v6445_v61 = vld [vmem:[%s8455_s4 + $0x1f8] ss:$12 sps:$4 sm:$0xff]  }
 0x476   :  { %v3864_v46 = vmax.f32 %v3858_v42, 0.0  ;;  %v6454_v3 = vld [vmem:[%s8455_s4 + $0x218] ss:$12 sps:$4 sm:$0xff]   ;;  %v6458_v42 = vld [vmem:[%s8455_s4 + $0x2f0] ss:$12 sps:$4 sm:$0xff]  }
 0x477   :  { %v3866_v6 = vmax.f32 %v3860_v52, 0.0  ;;  %v3799_v50 = vmul.f32 %v3784_v38, %v3739_v1 }
 0x478   :  { %v3870_v53 = vpack.c.bf16 %v3864_v46, %v3864_v46 }
 0x479   :  { %v3872_v10 = vpack.c.bf16 %v3866_v6, %v3866_v6  ;;  %v3859_v5 = vadd.f32 %v3844_v55, %v3799_v50  ;;  %v6468_v50 = vld [vmem:[%s8455_s4 + $0x274] ss:$12 sps:$4 sm:$0xff]  }
 0x47a   :  { %4879 = vmatprep.mubr.bf16.mxu1 %v3870_v53  ;;  %5002 = vmatprep.mubr.bf16.mxu0 %v3870_v53 }
 0x47b   :  { %4880 = vmatmul.mubr.bf16.vlgmr.msra.gmra.mrb[24].mxu1 %v3869_v8  ;;  %5003 = vmatmul.mubr.bf16.vlgmr.msra.gmra.mrb[16].mxu0 %v3869_v8 }
 0x47c   :  { %4889 = vmatpush1.bf16.msra.mxu1 %v6420_v59  ;;  %5737 = vmatpush3.bf16.msra.mxu0 %v6424_v60 }
 0x47d   :  { %4920 = vmatprep.mubr.bf16.mxu1 %v3872_v10  ;;  %5042 = vmatprep.mubr.bf16.mxu0 %v3872_v10 }
 0x47e   :  { %4890 = vmatprep.subr.bf16.mxu1 %v6427_v63  ;;  %5738 = vmatprep.subr.bf16.mxu0 %v6428_v7  ;;  %v6455_v63 = vld [vmem:[%s8455_s4 + $0x228] ss:$12 sps:$4 sm:$0xff]   ;;  %v6459_v7 = vld [vmem:[%s8455_s4 + $0x230] ss:$12 sps:$4 sm:$0xff]  }
 0x480   :  { %4891 = vmatpush1.bf16.msra.mxu1 %v6425_v11  ;;  %5739 = vmatpush3.bf16.msra.mxu0 %v6429_v12  ;;  %v6462_v12 = vld [vmem:[%s8455_s4 + $0x244] ss:$12 sps:$4 sm:$0xff]  }
 0x481   :  { %4892 = vmatprep.subr.bf16.mxu1 %v6432_v39  ;;  %5740 = vmatprep.subr.bf16.mxu0 %v6433_v14  ;;  %v3865_v39 = vmax.f32 %v3859_v5, 0.0  ;;  %v6487_v14 = vld [vmem:[%s8455_s4 + $0x3c8] ss:$12 sps:$4 sm:$0xff]  }
 0x483   :  { %v8209_v30 = vpack.c.bf16 %v3865_v39, %v3865_v39 }
 0x484   :  { %4893 = vmatpush1.bf16.msra.mxu1 %v6430_v15  ;;  %5741 = vmatpush3.bf16.msra.mxu0 %v6434_v18 }
 0x485   :  { %4894 = vmatprep.subr.bf16.mxu1 %v6437_v19  ;;  %5742 = vmatprep.subr.bf16.mxu0 %v6438_v20 }
 0x488   :  { %4895 = vmatpush1.bf16.msra.mxu1 %v6435_v23  ;;  %5743 = vmatpush3.bf16.msra.mxu0 %v6439_v24 }
 0x489   :  { %4896 = vmatprep.subr.bf16.mxu1 %v6442_v25  ;;  %5744 = vmatprep.subr.bf16.mxu0 %v6443_v28  ;;  %v6488_v25 = vld [vmem:[%s8455_s4 + $0x308] ss:$12 sps:$4 sm:$0xff]  }
 0x48c   :  { %4897 = vmatpush1.bf16.msra.mxu1 %v6440_v32  ;;  %5745 = vmatpush3.bf16.msra.mxu0 %v6444_v33  ;;  %v6492_v32 = vld [vmem:[%s8455_s4 + $0x3e0] ss:$12 sps:$4 sm:$0xff]  }
 0x48d   :  { %4898 = vmatprep.subr.bf16.mxu1 %v6447_v44  ;;  %5746 = vmatprep.subr.bf16.mxu0 %v6448_v43 }
 0x48f   :  { %v3454_v37 = vpop.f32.mrb[12].mxu0 }
 0x490   :  { %v8163_v45 = vadd.f32 %v3454_v37, %v2490_v34  ;;  %v3456_v51 = vpop.f32.mrb[13].mxu0  ;;  %4899 = vmatpush1.bf16.msra.mxu1 %v6445_v61  ;;  %5747 = vmatpush3.bf16.msra.mxu0 %v6449_v49  ;;  %v6463_v34 = vld [vmem:[%s8455_s4 + $0x258] ss:$12 sps:$4 sm:$0xff]  }
 0x491   :  { %v8165_v58 = vadd.f32 %v3456_v51, %v2494_v48  ;;  %v3458_v2 = vpop.f32.mrb[14].mxu0  ;;  %4900 = vmatprep.subr.bf16.mxu1 %v6452_v57  ;;  %5748 = vmatprep.subr.bf16.mxu0 %v6453_v35  ;;  %v6493_v48 = vld [vmem:[%s8455_s4 + $0x320] ss:$12 sps:$4 sm:$0xff]   ;;  %v6497_v37 = vld [vmem:[%s8455_s4 + $0x3f8] ss:$12 sps:$4 sm:$0xff]  }
 0x492   :  { %v3465_v54 = vmul.f32 %v8163_v45, %v7169_v40  ;;  %v3525_v56 = vmul.f32 %v8163_v45, %v7172_v41  ;;  %v3459_v62 = vpop.f32.mrb[15].mxu0 }
 0x493   :  { %v3466_v22 = vmul.f32 %v8165_v58, %v7169_v40  ;;  %v3526_v16 = vmul.f32 %v8165_v58, %v7172_v41 }
 0x494   :  { %v3495_v52 = vsel %vm1303_vm1, %v3465_v54, 0.0  ;;  %v3555_v46 = vsel %vm1303_vm1, %v3525_v56, 0.0  ;;  %4901 = vmatpush1.bf16.msra.mxu1 %v6450_v4  ;;  %5749 = vmatpush3.bf16.msra.mxu0 %v6454_v3  ;;  %v6466_v56 = vld [vmem:[%s8455_s4 + $0x270] ss:$12 sps:$4 sm:$0xff]   ;;  %v6498_v4 = vld [vmem:[%s8455_s4 + $0x338] ss:$12 sps:$4 sm:$0xff]  }
 0x495   :  { %v3496_v6 = vrot.slane %v3495_v52, 4  ;;  %v3556_v17 = vrot.slane %v3555_v46, 4  ;;  %v3502_v53 = vsel %vm1303_vm1, %v3466_v22, 0.0  ;;  %v3562_v59 = vsel %vm1303_vm1, %v3526_v16, 0.0  ;;  %4902 = vmatprep.subr.bf16.mxu1 %v6457_v36  ;;  %5750 = vmatprep.subr.bf16.mxu0 %v6458_v42  ;;  %v6471_v22 = vld [vmem:[%s8455_s4 + $0x28c] ss:$12 sps:$4 sm:$0xff]  }
 0x496   :  { %v3503_v60 = vrot.slane %v3502_v53, 4  ;;  %v3563_v8 = vrot.slane %v3562_v59, 4  ;;  %v6502_v16 = vld [vmem:[%s8455_s4 + $0x410] ss:$12 sps:$4 sm:$0xff]  }
 0x497   :  { %v3497_v10 = vadd.f32 %v3496_v6, %v3495_v52  ;;  %v3557_v11 = vadd.f32 %v3556_v17, %v3555_v46  ;;  %v6469_v46 = vld [vmem:[%s8455_s4 + $0x288] ss:$12 sps:$4 sm:$0xff]   ;;  %v6503_v6 = vld [vmem:[%s8455_s4 + $0x350] ss:$12 sps:$4 sm:$0xff]  }
 0x498   :  { %v3504_v15 = vadd.f32 %v3503_v60, %v3502_v53  ;;  %v3564_v18 = vadd.f32 %v3563_v8, %v3562_v59  ;;  %4903 = vmatpush1.bf16.msra.mxu1 %v6455_v63  ;;  %5751 = vmatpush3.bf16.msra.mxu0 %v6459_v7  ;;  %v6474_v53 = vld [vmem:[%s8455_s4 + $0x2a4] ss:$12 sps:$4 sm:$0xff]   ;;  %v6507_v59 = vld [vmem:[%s8455_s4 + $0x428] ss:$12 sps:$4 sm:$0xff]   ;;  %v6472_v63 = vld [vmem:[%s8455_s4 + $0x2a0] ss:$12 sps:$4 sm:$0xff]  }
 0x499   :  { %v3498_v19 = vrot.slane %v3497_v10, 2  ;;  %v3558_v20 = vrot.slane %v3557_v11, 2  ;;  %4904 = vmatprep.subr.bf16.mxu1 %v6462_v12  ;;  %5758 = vmatprep.subr.bf16.mxu0 %v6487_v14  ;;  %v6508_v7 = vld [vmem:[%s8455_s4 + $0x368] ss:$12 sps:$4 sm:$0xff]   ;;  %v6512_v12 = vld [vmem:[%s8455_s4 + $0x440] ss:$12 sps:$4 sm:$0xff]  }
 0x49a   :  { %v3505_v23 = vrot.slane %v3504_v15, 2  ;;  %v3565_v24 = vrot.slane %v3564_v18, 2 }
 0x49b   :  { %v3499_v28 = vadd.f32 %v3498_v19, %v3497_v10  ;;  %v3559_v29 = vadd.f32 %v3558_v20, %v3557_v11  ;;  %5043 = vmatmul.mubr.bf16.vlgmr.msra.gmra.mrb[20].mxu0 %v8209_v30  ;;  %v6477_v11 = vld [vmem:[%s8455_s4 + $0x2bc] ss:$12 sps:$4 sm:$0xff]   ;;  %v6475_v19 = vld [vmem:[%s8455_s4 + $0x2b8] ss:$12 sps:$4 sm:$0xff]  }
 0x49c   :  { %v3506_v33 = vadd.f32 %v3505_v23, %v3504_v15  ;;  %v3566_v1 = vadd.f32 %v3565_v24, %v3564_v18  ;;  %4905 = vmatpush1.bf16.msra.mxu1 %v6460_v26  ;;  %5759 = vmatpush3.bf16.msra.mxu0 %v6488_v25  ;;  %v6513_v25 = vld [vmem:[%s8455_s4 + $0x380] ss:$12 sps:$4 sm:$0xff]  }
 0x49d   :  { %v3500_v38 = vrot.slane %v3499_v28, 1  ;;  %v3560_v44 = vrot.slane %v3559_v29, 1  ;;  %4906 = vmatprep.subr.bf16.mxu1 %v6465_v31  ;;  %5760 = vmatprep.subr.bf16.mxu0 %v6492_v32  ;;  %v6480_v31 = vld [vmem:[%s8455_s4 + $0x2d4] ss:$12 sps:$4 sm:$0xff]   ;;  %v6517_v32 = vld [vmem:[%s8455_s4 + $0x458] ss:$12 sps:$4 sm:$0xff]  }
 0x49e   :  { %v3507_v43 = vrot.slane %v3506_v33, 1  ;;  %v3567_v47 = vrot.slane %v3566_v1, 1 }
 0x49f   :  { %v3501_v61 = vadd.f32 %v3500_v38, %v3499_v28  ;;  %v3561_v49 = vadd.f32 %v3560_v44, %v3559_v29 }
 0x4a0   :  { %v3508_v57 = vadd.f32 %v3507_v43, %v3506_v33  ;;  %v3568_v35 = vadd.f32 %v3567_v47, %v3566_v1  ;;  %4907 = vmatpush1.bf16.msra.mxu1 %v6463_v34  ;;  %5761 = vmatpush3.bf16.msra.mxu0 %v6493_v48  ;;  %v6478_v34 = vld [vmem:[%s8455_s4 + $0x2d0] ss:$12 sps:$4 sm:$0xff]   ;;  %v6518_v48 = vld [vmem:[%s8455_s4 + $0x398] ss:$12 sps:$4 sm:$0xff]  }
 0x4a1   :  { %v3513_v55 = vmul.f32 0.5, %v3501_v61  ;;  %v3573_v51 = vmul.f32 0.5, %v3561_v49  ;;  %4908 = vmatprep.subr.bf16.mxu1 %v6468_v50  ;;  %5762 = vmatprep.subr.bf16.mxu0 %v6497_v37  ;;  %v6483_v50 = vld [vmem:[%s8455_s4 + $0x2ec] ss:$12 sps:$4 sm:$0xff]   ;;  %v6522_v37 = vld [vmem:[%s8455_s4 + $0x470] ss:$12 sps:$4 sm:$0xff]  }
 0x4a2   :  { %v3514_v2 = vmul.f32 0.5, %v3508_v57  ;;  %v3574_v54 = vmul.f32 0.5, %v3568_v35 }
 0x4a3   :  { %v3519_v62 = vmul.f32 %v7169_v40, %v3513_v55  ;;  %v3579_v3 = vmul.f32 %v3573_v51, %v7172_v41 }
 0x4a4   :  { %v3520_v36 = vmul.f32 %v7169_v40, %v3514_v2  ;;  %v3580_v42 = vmul.f32 %v3574_v54, %v7172_v41  ;;  %4909 = vmatpush1.bf16.msra.mxu1 %v6466_v56  ;;  %5763 = vmatpush3.bf16.msra.mxu0 %v6498_v4  ;;  %v6481_v56 = vld [vmem:[%s8455_s4 + $0x2e8] ss:$12 sps:$4 sm:$0xff]   ;;  %v6523_v4 = vld [vmem:[%s8455_s4 + $0x3b0] ss:$12 sps:$4 sm:$0xff]  }
 0x4a5   :  { %v3585_v5 = vadd.f32 %v3579_v3, %v3519_v62  ;;  %4910 = vmatprep.subr.bf16.mxu1 %v6471_v22  ;;  %5764 = vmatprep.subr.bf16.mxu0 %v6502_v16  ;;  %v6486_v22 = vld [vmem:[%s8455_s4 + $0x304] ss:$12 sps:$4 sm:$0xff]  }
 0x4a6   :  { %v3586_v52 = vadd.f32 %v3580_v42, %v3520_v36 }
 0x4a7   :  { %v8253_v17 = vsub.f32 %v8163_v45, %v3585_v5 }
 0x4a8   :  { %v8262_v60 = vsub.f32 %v8165_v58, %v3586_v52  ;;  %4911 = vmatpush1.bf16.msra.mxu1 %v6469_v46  ;;  %5765 = vmatpush3.bf16.msra.mxu0 %v6503_v6  ;;  %v6484_v6 = vld [vmem:[%s8455_s4 + $0x300] ss:$12 sps:$4 sm:$0xff]  }
 0x4a9   :  { %v3597_v8 = vmul.f32 %v8253_v17, %v8253_v17  ;;  %4912 = vmatprep.subr.bf16.mxu1 %v6474_v53  ;;  %5766 = vmatprep.subr.bf16.mxu0 %v6507_v59 }
 0x4aa   :  { %v3598_v45 = vmul.f32 %v8262_v60, %v8262_v60 }
 0x4ab   :  { %v3603_v10 = vmul.f32 %v7169_v40, %v3597_v8  ;;  %v3663_v58 = vmul.f32 %v3597_v8, %v7172_v41  ;;  %v6491_v8 = vld [vmem:[%s8455_s4 + $0x31c] ss:$12 sps:$4 sm:$0xff]  }
 0x4ac   :  { %v3604_v39 = vmul.f32 %v7169_v40, %v3598_v45  ;;  %v3664_v14 = vmul.f32 %v3598_v45, %v7172_v41  ;;  %4913 = vmatpush1.bf16.msra.mxu1 %v6472_v63  ;;  %5767 = vmatpush3.bf16.msra.mxu0 %v6508_v7 }
 0x4ad   :  { %v3633_v15 = vsel %vm1303_vm1, %v3603_v10, 0.0  ;;  %v3693_v18 = vsel %vm1303_vm1, %v3663_v58, 0.0  ;;  %4914 = vmatprep.subr.bf16.mxu1 %v6477_v11  ;;  %5768 = vmatprep.subr.bf16.mxu0 %v6512_v12  ;;  %v6489_v11 = vld [vmem:[%s8455_s4 + $0x318] ss:$12 sps:$4 sm:$0xff]  }
 0x4ae   :  { %v3634_v20 = vrot.slane %v3633_v15, 4  ;;  %v3694_v23 = vrot.slane %v3693_v18, 4  ;;  %v3640_v24 = vsel %vm1303_vm1, %v3604_v39, 0.0  ;;  %v3700_v26 = vsel %vm1303_vm1, %v3664_v14, 0.0  ;;  %v6496_v39 = vld [vmem:[%s8455_s4 + $0x334] ss:$12 sps:$4 sm:$0xff]  }
 0x4af   :  { %v3641_v28 = vrot.slane %v3640_v24, 4  ;;  %v3701_v29 = vrot.slane %v3700_v26, 4 }
 0x4b0   :  { %v3635_v33 = vadd.f32 %v3634_v20, %v3633_v15  ;;  %v3695_v1 = vadd.f32 %v3694_v23, %v3693_v18  ;;  %4915 = vmatpush1.bf16.msra.mxu1 %v6475_v19  ;;  %5769 = vmatpush3.bf16.msra.mxu0 %v6513_v25  ;;  %v3762_v18 = vrot.slane %v8112_v21, %v7238_v9  ;;  %v6506_v19 = vld [vmem:[%s8455_s4 + $0x364] ss:$12 sps:$4 sm:$0xff]  }
 0x4b1   :  { %v3642_v38 = vadd.f32 %v3641_v28, %v3640_v24  ;;  %v3702_v44 = vadd.f32 %v3701_v29, %v3700_v26  ;;  %4916 = vmatprep.subr.bf16.mxu1 %v6480_v31  ;;  %5770 = vmatprep.subr.bf16.mxu0 %v6517_v32  ;;  %v3766_v20 = vrot.slane %v8112_v21, %v8050_v27  ;;  %v6504_v24 = vld [vmem:[%s8455_s4 + $0x360] ss:$12 sps:$4 sm:$0xff]   ;;  %v6511_v28 = vld [vmem:[%s8455_s4 + $0x37c] ss:$12 sps:$4 sm:$0xff]  }
 0x4b2   :  { %v3636_v43 = vrot.slane %v3635_v33, 2  ;;  %v3696_v47 = vrot.slane %v3695_v1, 2  ;;  %v3822_v23 = vrot.slane %v8112_v21, %v7243_v13  ;;  %v3826_v26 = vrot.slane %v8112_v21, %v8053_v0  ;;  %v6509_v0 = vld [vmem:[%s8455_s4 + $0x378] ss:$12 sps:$4 sm:$0xff]  }
 0x4b3   :  { %v3643_v61 = vrot.slane %v3642_v38, 2  ;;  %v3703_v49 = vrot.slane %v3702_v44, 2  ;;  %v3792_v25 = vrot.slane %v3762_v18, %v7238_v9  ;;  %v3796_v31 = vrot.slane %v3766_v20, %v7238_v9  ;;  %v6516_v9 = vld [vmem:[%s8455_s4 + $0x394] ss:$12 sps:$4 sm:$0xff]  }
 0x4b4   :  { %v3637_v57 = vadd.f32 %v3636_v43, %v3635_v33  ;;  %v3697_v35 = vadd.f32 %v3696_v47, %v3695_v1  ;;  %4917 = vmatpush1.bf16.msra.mxu1 %v6478_v34  ;;  %5771 = vmatpush3.bf16.msra.mxu0 %v6518_v48  ;;  %v3852_v1 = vrot.slane %v3822_v23, %v7243_v13  ;;  %v6521_v34 = vld [vmem:[%s8455_s4 + $0x3ac] ss:$12 sps:$4 sm:$0xff]  }
 0x4b5   :  { %v3644_v55 = vadd.f32 %v3643_v61, %v3642_v38  ;;  %v3704_v51 = vadd.f32 %v3703_v49, %v3702_v44  ;;  %4918 = vmatprep.subr.bf16.mxu1 %v6483_v50  ;;  %5772 = vmatprep.subr.bf16.mxu0 %v6522_v37  ;;  %v3856_v21 = vrot.slane %v3826_v26, %v7243_v13  ;;  %v6519_v61 = vld [vmem:[%s8455_s4 + $0x3a8] ss:$12 sps:$4 sm:$0xff]   ;;  %v6526_v50 = vld [vmem:[%s8455_s4 + $0x3c4] ss:$12 sps:$4 sm:$0xff]  }
 0x4b6   :  { %v3638_v2 = vrot.slane %v3637_v57, 1  ;;  %v3698_v54 = vrot.slane %v3697_v35, 1  ;;  %v6575_v23 = vld [vmem:[%s8456_s5 + $0x8] sm:$0x3f] }
 0x4b7   :  { %v3645_v62 = vrot.slane %v3644_v55, 1  ;;  %v3705_v3 = vrot.slane %v3704_v51, 1 }
 0x4b8   :  { %v3639_v16 = vadd.f32 %v3638_v2, %v3637_v57  ;;  %v3699_v36 = vadd.f32 %v3698_v54, %v3697_v35  ;;  %4919 = vmatpush1.bf16.msra.mxu1 %v6481_v56  ;;  %5773 = vmatpush3.bf16.msra.mxu0 %v6523_v4  ;;  %v6524_v57 = vld [vmem:[%s8455_s4 + $0x3c0] ss:$12 sps:$4 sm:$0xff]   ;;  %v6529_v35 = vld [vmem:[%s8455_s4 + $0x3dc] ss:$12 sps:$4 sm:$0xff]   ;;  %v6538_v4 = vld [vmem:[%s8455_s4 + $0x424] ss:$12 sps:$4 sm:$0xff]  }
 0x4b9   :  { %v3646_v42 = vadd.f32 %v3645_v62, %v3644_v55  ;;  %v3706_v5 = vadd.f32 %v3705_v3, %v3704_v51  ;;  %4929 = vmatprep.subr.bf16.mxu1 %v6486_v22  ;;  %v6527_v55 = vld [vmem:[%s8455_s4 + $0x3d8] ss:$12 sps:$4 sm:$0xff]   ;;  %v6532_v51 = vld [vmem:[%s8455_s4 + $0x3f4] ss:$12 sps:$4 sm:$0xff]   ;;  %v6530_v2 = vld [vmem:[%s8455_s4 + $0x3f0] ss:$12 sps:$4 sm:$0xff]  }
 0x4ba   :  { %v3651_v52 = vmul.f32 0.5, %v3639_v16  ;;  %v3711_v46 = vmul.f32 0.5, %v3699_v36  ;;  %v6535_v54 = vld [vmem:[%s8455_s4 + $0x40c] ss:$12 sps:$4 sm:$0xff]   ;;  %v6533_v56 = vld [vmem:[%s8455_s4 + $0x408] ss:$12 sps:$4 sm:$0xff]  }
 0x4bb   :  { %v3652_v53 = vmul.f32 0.5, %v3646_v42  ;;  %v3712_v59 = vmul.f32 0.5, %v3706_v5  ;;  %4921 = vmatmul.mubr.bf16.vlgmr.msra.gmra.mrb[24].mxu1 %v8209_v30  ;;  %v6499_v30 = vld [vmem:[%s8455_s4 + $0x348] ss:$12 sps:$4 sm:$0xff]   ;;  %v6536_v62 = vld [vmem:[%s8455_s4 + $0x420] ss:$12 sps:$4 sm:$0xff]  }
 0x4bc   :  { %v3657_v45 = vmul.f32 %v7169_v40, %v3651_v52  ;;  %v3717_v63 = vmul.f32 %v3711_v46, %v7172_v41  ;;  %4930 = vmatpush1.bf16.msra.mxu1 %v6484_v6  ;;  %v6541_v3 = vld [vmem:[%s8455_s4 + $0x43c] ss:$12 sps:$4 sm:$0xff]   ;;  %v6539_v22 = vld [vmem:[%s8455_s4 + $0x438] ss:$12 sps:$4 sm:$0xff]   ;;  %v6544_v16 = vld [vmem:[%s8455_s4 + $0x454] ss:$12 sps:$4 sm:$0xff]  }
 0x4bd   :  { %v3658_v7 = vmul.f32 %v7169_v40, %v3652_v53  ;;  %v3718_v10 = vmul.f32 %v3712_v59, %v7172_v41  ;;  %4931 = vmatprep.subr.bf16.mxu1 %v6491_v8  ;;  %v6494_v40 = vld [vmem:[%s8455_s4 + $0x330] ss:$12 sps:$4 sm:$0xff]   ;;  %v6501_v41 = vld [vmem:[%s8455_s4 + $0x34c] ss:$12 sps:$4 sm:$0xff]   ;;  %v6545_v5 = vld [vmem:[%s8455_s4 + $0x468] ss:$12 sps:$4 sm:$0xff]  }
 0x4be   :  { %v3723_v58 = vadd.f32 %v3717_v63, %v3657_v45  ;;  %v6542_v36 = vld [vmem:[%s8455_s4 + $0x450] ss:$12 sps:$4 sm:$0xff]   ;;  %v6547_v42 = vld [vmem:[%s8455_s4 + $0x46c] ss:$12 sps:$4 sm:$0xff]  }
 0x4bf   :  { %v3724_v12 = vadd.f32 %v3718_v10, %v3658_v7  ;;  %v6573_v8 = vld [vmem:[%s8456_s5 + $0x10] sm:$0x3f] }
 0x4c0   :  { %v3729_v14 = vadd.f32 1e-05, %v3723_v58  ;;  %4932 = vmatpush1.bf16.msra.mxu1 %v6489_v11  ;;  %v4078_v45 = vrot.slane %v6573_v8, %v8050_v27 }
 0x4c1   :  { %v3730_v15 = vadd.f32 1e-05, %v3724_v12  ;;  %4933 = vmatprep.subr.bf16.mxu1 %v6496_v39 }
 0x4c2   :  { %6568 = vrsqrt.f32 %v3729_v14 }
 0x4c3   :  { %6570 = vrsqrt.f32 %v3730_v15 }
 0x4c4   :  { %4934 = vmatpush1.bf16.msra.mxu1 %v6494_v40 }
 0x4c5   :  { %4935 = vmatprep.subr.bf16.mxu1 %v6501_v41 }
 0x4c8   :  { %4936 = vmatpush1.bf16.msra.mxu1 %v6499_v30 }
 0x4c9   :  { %4937 = vmatprep.subr.bf16.mxu1 %v6506_v19  ;;  %v6574_v19 = vld [vmem:[%s8456_s5] sm:$0x3f] }
 0x4ca   :  { %v4070_v20 = vrot.slane %v6574_v19, %v8050_v27 }
 0x4cc   :  { %v6569_v29 = vpop.eup %6568  ;;  %4938 = vmatpush1.bf16.msra.mxu1 %v6504_v24  ;;  %v4074_v24 = vrot.slane %v6575_v23, %v8050_v27 }
 0x4cd   :  { %v6571_v32 = vpop.eup %6570  ;;  %v3741_v33 = vmul.f32 %v6569_v29, %v8253_v17  ;;  %4939 = vmatprep.subr.bf16.mxu1 %v6511_v28  ;;  %v6514_v17 = vld [vmem:[%s8455_s4 + $0x390] ss:$12 sps:$4 sm:$0xff]  }
 0x4ce   :  { %v3742_v38 = vmul.f32 %v6571_v32, %v8262_v60 }
 0x4cf   :  { %v3801_v44 = vmul.f32 %v3792_v25, %v3741_v33 }
 0x4d0   :  { %v3802_v43 = vmul.f32 %v3796_v31, %v3742_v38  ;;  %4940 = vmatpush1.bf16.msra.mxu1 %v6509_v0 }
 0x4d1   :  { %v3861_v47 = vadd.f32 %v3852_v1, %v3801_v44  ;;  %4941 = vmatprep.subr.bf16.mxu1 %v6516_v9 }
 0x4d2   :  { %v3862_v60 = vadd.f32 %v3856_v21, %v3802_v43 }
 0x4d3   :  { %v3867_v13 = vmax.f32 %v3861_v47, 0.0 }
 0x4d4   :  { %v3868_v48 = vmax.f32 %v3862_v60, 0.0  ;;  %4942 = vmatpush1.bf16.msra.mxu1 %v6514_v17 }
 0x4d5   :  { %4943 = vmatprep.subr.bf16.mxu1 %v6521_v34  ;;  %v3873_v37 = vpack.c.bf16 %v3867_v13, %v3867_v13 }
 0x4d6   :  { %v3874_v49 = vpack.c.bf16 %v3868_v48, %v3868_v48 }
 0x4d8   :  { %4961 = vmatprep.mubr.bf16.mxu1 %v3874_v49  ;;  %5082 = vmatprep.mubr.bf16.mxu0 %v3874_v49 }
 0x4d9   :  { %5083 = vmatmul.mubr.bf16.vlgmr.msra.gmra.mrb[24].mxu0 %v3873_v37  ;;  %4944 = vmatpush1.bf16.msra.mxu1 %v6519_v61 }
 0x4da   :  { %4945 = vmatprep.subr.bf16.mxu1 %v6526_v50 }
 0x4dd   :  { %4946 = vmatpush1.bf16.msra.mxu1 %v6524_v57 }
 0x4de   :  { %4947 = vmatprep.subr.bf16.mxu1 %v6529_v35 }
 0x4e1   :  { %4948 = vmatpush1.bf16.msra.mxu1 %v6527_v55 }
 0x4e2   :  { %4949 = vmatprep.subr.bf16.mxu1 %v6532_v51 }
 0x4e5   :  { %4950 = vmatpush1.bf16.msra.mxu1 %v6530_v2 }
 0x4e6   :  { %4951 = vmatprep.subr.bf16.mxu1 %v6535_v54 }
 0x4e9   :  { %4952 = vmatpush1.bf16.msra.mxu1 %v6533_v56 }
 0x4ea   :  { %4953 = vmatprep.subr.bf16.mxu1 %v6538_v4 }
 0x4ed   :  { %4954 = vmatpush1.bf16.msra.mxu1 %v6536_v62 }
 0x4ee   :  { %4955 = vmatprep.subr.bf16.mxu1 %v6541_v3 }
 0x4f1   :  { %4956 = vmatpush1.bf16.msra.mxu1 %v6539_v22 }
 0x4f2   :  { %4957 = vmatprep.subr.bf16.mxu1 %v6544_v16 }
 0x4f5   :  { %4958 = vmatpush1.bf16.msra.mxu1 %v6542_v36 }
 0x4f6   :  { %4959 = vmatprep.subr.bf16.mxu1 %v6547_v42 }
 0x4f9   :  { %4960 = vmatpush1.bf16.msra.mxu1 %v6545_v5 }
 0x4fc   :  { %4962 = vmatmul.mubr.bf16.vlgmr.msra.gmra.mrb[24].mxu1 %v3873_v37 }
 0x54e   :  { %v5730_v52 = vpop.f32.mrb[16].mxu0 }
 0x54f   :  { %v5731_v46 = vpop.f32.mrb[17].mxu0 }
 0x550   :  { %v5732_v6 = vadd.f32 %v5731_v46, %v5730_v52  ;;  %v5733_v53 = vpop.f32.mrb[18].mxu0 }
 0x551   :  { %v5734_v59 = vpop.f32.mrb[19].mxu0 }
 0x552   :  { %v5005_v10 = vadd.f32 %v5732_v6, %v4078_v45 }
 0x56e   :  { %v5752_v63 = vpop.f32.mrb[20].mxu0 }
 0x56f   :  { %v5753_v7 = vpop.f32.mrb[21].mxu0 }
 0x570   :  { %v5754_v58 = vadd.f32 %v5753_v7, %v5752_v63  ;;  %v5755_v11 = vpop.f32.mrb[22].mxu0 }
 0x571   :  { %v5756_v12 = vpop.f32.mrb[23].mxu0 }
 0x572   :  { %v5045_v39 = vadd.f32 %v5754_v58, %v5005_v10 }
 0x5ac   :  { %v5774_v14 = vpop.f32.mrb[24].mxu0 }
 0x5ad   :  { %v5775_v15 = vpop.f32.mrb[25].mxu0 }
 0x5ae   :  { %v5776_v40 = vadd.f32 %v5775_v15, %v5774_v14  ;;  %v5777_v41 = vpop.f32.mrb[26].mxu0 }
 0x5af   :  { %v5778_v30 = vpop.f32.mrb[27].mxu0 }
 0x5b0   :  { %v5085_v18 = vadd.f32 %v5776_v40, %v5045_v39 }
 0x5b2   :  { %5101 = vst [vmem:[%s8459_s8 + $0x8] sm:$0xf] %v5085_v18 }
 0x5cf   :  { %v4963_v26 = vpop.f32.mrb[24].mxu1 }
 0x5d0   :  { %v5808_v25 = vadd.f32 %v4963_v26, %v4070_v20  ;;  %v4965_v28 = vpop.f32.mrb[25].mxu1 }
 0x5d1   :  { %v5809_v29 = vadd.f32 %v4965_v28, %v4074_v24  ;;  %v4967_v31 = vpop.f32.mrb[26].mxu1 }
 0x5d2   :  { %v4968_v32 = vpop.f32.mrb[27].mxu1 }
 0x5d3   :  { %v5098_v33 = vcombine.low %v5808_v25, %v5809_v29 }
 0x5d5   :  { %5100 = vst [vmem:[%s8459_s8] sm:$0xff] %v5098_v33 }
 0x5d6   :  { %5110 = vsyncpa [#allocation3], 1 }
 0x5d7   :  { %5111 = vsyncpa [#allocation5], 1 }

</bundles_post_ra>
